<compile_context>
chip_gen: v6e
topology: v6e:2x2x1
jax: 0.10.0
libtpu: 0.0.40
codegen_flags: <defaults>
</compile_context>

<pallas_src>
import functools

import jax
import jax.numpy as jnp
from jax.experimental import pallas as pl
from jax.experimental.pallas import tpu as pltpu

EPS = 1e-6


def _round_up(x: int, m: int) -> int:
    return ((x + m - 1) // m) * m


# ----------------------------- Pallas kernel --------------------------------
def _ffn_kernel(scales_ref,                     # SMEM (3,) f32: [inv_s1, inv_s3, inv_s2]
                x_ref, w1_ref, w3_ref, w2_ref,  # VMEM input blocks
                o_ref,                          # VMEM output block (tm, dim)
                xq_sc, c1_sc, c3_sc, ssq_sc, amax_sc, qf_sc, deq_sc, h_sc, acc_sc):
    p = pl.program_id(1)      # phase: 0 = build h, 1 = consume h
    k = pl.program_id(2)      # hidden-block index
    nk = pl.num_programs(2)

    # ---- phase 0, first block: RMSNorm + 8-bit quant of x; reset running h stats ----
    @pl.when(jnp.logical_and(p == 0, k == 0))
    def _():
        x = x_ref[...].astype(jnp.float32)
        xn = x * jax.lax.rsqrt(jnp.mean(x * x, axis=-1, keepdims=True) + EPS)
        amax = jnp.maximum(jnp.max(jnp.abs(xn), axis=-1, keepdims=True), 1e-5)
        qs = 127.0 / amax
        # int8 code values; |v| <= 128 -> exactly representable in bf16 for the MXU.
        xq_sc[...] = jnp.clip(jnp.round(xn * qs), -128.0, 127.0).astype(jnp.bfloat16)
        inv_a = amax * (1.0 / 127.0)            # per-row activation dequant scale
        c1_sc[...] = inv_a * scales_ref[0]      # fold in w1's global weight scale
        c3_sc[...] = inv_a * scales_ref[1]      # fold in w3's global weight scale
        ssq_sc[...] = jnp.zeros_like(ssq_sc)
        amax_sc[...] = jnp.zeros_like(amax_sc)

    # ---- phase 0: hidden block k of SwiGLU + running RMSNorm stats ----
    @pl.when(p == 0)
    def _():
        xq = xq_sc[...]
        g1 = jnp.dot(xq, w1_ref[...], preferred_element_type=jnp.float32) * c1_sc[...]
        g3 = jnp.dot(xq, w3_ref[...], preferred_element_type=jnp.float32) * c3_sc[...]
        hk = (g1 * jax.nn.sigmoid(g1)) * g3
        h_sc[k] = hk
        ssq_sc[...] += jnp.sum(hk * hk, axis=-1, keepdims=True)
        amax_sc[...] = jnp.maximum(
            amax_sc[...], jnp.max(jnp.abs(hk), axis=-1, keepdims=True))

    # ---- phase 1, first block: finalize h quant scales; reset output accumulator ----
    @pl.when(jnp.logical_and(p == 1, k == 0))
    def _():
        hidden = h_sc.shape[0] * h_sc.shape[2]
        inv_rms = jax.lax.rsqrt(ssq_sc[...] * (1.0 / hidden) + EPS)
        maxn = jnp.maximum(amax_sc[...] * inv_rms, 1e-5)
        qf_sc[...] = inv_rms * (127.0 / maxn)               # h -> int8 code values
        deq_sc[...] = maxn * (1.0 / 127.0) * scales_ref[2]  # act scale * w2 weight scale
        acc_sc[...] = jnp.zeros_like(acc_sc)

    # ---- phase 1: quantize h block k, accumulate the w2 matmul ----
    @pl.when(p == 1)
    def _():
        hq = jnp.clip(jnp.round(h_sc[k] * qf_sc[...]),
                      -128.0, 127.0).astype(jnp.bfloat16)
        acc_sc[...] += jnp.dot(hq, w2_ref[...], preferred_element_type=jnp.float32)

    # ---- phase 1, last block: dequantize and write the output tile ----
    @pl.when(jnp.logical_and(p == 1, k == nk - 1))
    def _():
        o_ref[...] = (acc_sc[...] * deq_sc[...]).astype(o_ref.dtype)


# ------------------------------ JAX wrapper ----------------------------------
def _weight_quant_int(w):
    """BitNet b1.58 ternary weight quant: integer codes + global dequant scale."""
    inv_scale = jnp.maximum(jnp.mean(jnp.abs(w)), 1e-5)   # == 1 / w_scale
    wi = jnp.clip(jnp.round(w / inv_scale), -1.0, 1.0)
    return wi, inv_scale


@functools.partial(jax.jit, static_argnames=("tm", "tk"))
def feed_forward(x, w1, w2, w3, *, tm=256, tk=512):
    """x: (B, S, dim). w1, w3: (hidden, dim). w2: (dim, hidden). Returns (B, S, dim)."""
    B, S, dim = x.shape
    hidden = w1.shape[0]
    M = B * S

    # Weight quantization is a global scalar reduction -> plain-JAX glue.
    # Ternary codes are exact in bf16; transpose to (in, out) for row-major matmul.
    w1i, inv_s1 = _weight_quant_int(w1)
    w3i, inv_s3 = _weight_quant_int(w3)
    w2i, inv_s2 = _weight_quant_int(w2)
    w1b = w1i.T.astype(jnp.bfloat16)     # (dim, hidden)
    w3b = w3i.T.astype(jnp.bfloat16)     # (dim, hidden)
    w2b = w2i.T.astype(jnp.bfloat16)     # (hidden, dim)
    scales = jnp.stack([inv_s1, inv_s3, inv_s2]).astype(jnp.float32)   # (3,) in SMEM

    # ---- tiling (tail handled via padding, no divisibility assert) ----
    tm = min(tm, _round_up(M, 128))
    tk = min(tk, hidden)
    if hidden % tk != 0:
        tk = hidden                      # fallback: single hidden tile
    m_pad = _round_up(M, tm)
    nm = m_pad // tm
    nk = hidden // tk

    x2d = x.reshape(M, dim)
    if m_pad != M:
        x2d = jnp.pad(x2d, ((0, m_pad - M), (0, 0)))

    cost = pl.CostEstimate(
        flops=6 * m_pad * dim * hidden,
        transcendentals=m_pad * hidden + 2 * m_pad,
        bytes_accessed=(x2d.size * x2d.dtype.itemsize
                        + m_pad * dim * x.dtype.itemsize
                        + nm * 2 * (w1b.size + w3b.size + w2b.size)),
    )

    out = pl.pallas_call(
        _ffn_kernel,
        out_shape=jax.ShapeDtypeStruct((m_pad, dim), x.dtype),
        grid=(nm, 2, nk),
        in_specs=[
            pl.BlockSpec(memory_space=pltpu.MemorySpace.SMEM),            # weight scales
            pl.BlockSpec((tm, dim), lambda i, p, k: (i, 0)),              # x row tile
            pl.BlockSpec((dim, tk), lambda i, p, k: (0, k * (1 - p))),    # w1 column block
            pl.BlockSpec((dim, tk), lambda i, p, k: (0, k * (1 - p))),    # w3 column block
            pl.BlockSpec((tk, dim), lambda i, p, k: (k * p, 0)),          # w2 row block
        ],
        out_specs=pl.BlockSpec((tm, dim), lambda i, p, k: (i, 0)),
        scratch_shapes=[
            pltpu.VMEM((tm, dim), jnp.bfloat16),     # xq: int8 codes of RMSNorm(x)
            pltpu.VMEM((tm, 1), jnp.float32),        # c1 = inv_a * inv_s1
            pltpu.VMEM((tm, 1), jnp.float32),        # c3 = inv_a * inv_s3
            pltpu.VMEM((tm, 1), jnp.float32),        # running sum(h^2)
            pltpu.VMEM((tm, 1), jnp.float32),        # running max|h|
            pltpu.VMEM((tm, 1), jnp.float32),        # h quant factor
            pltpu.VMEM((tm, 1), jnp.float32),        # output dequant factor
            pltpu.VMEM((nk, tm, tk), jnp.float32),   # staged h (SwiGLU output)
            pltpu.VMEM((tm, dim), jnp.float32),      # output accumulator
        ],
        compiler_params=pltpu.CompilerParams(
            dimension_semantics=("parallel", "arbitrary", "arbitrary"),
            vmem_limit_bytes=64 * 1024 * 1024,
        ),
        cost_estimate=cost,
    )(scales, x2d, w1b, w3b, w2b)

    return out[:M].reshape(B, S, dim)


# --------------------------- pure-JAX reference -------------------------------
def _bitlinear_ref(x, w):
    xn = x * jax.lax.rsqrt(jnp.mean(x * x, axis=-1, keepdims=True) + EPS)
    s = 127.0 / jnp.maximum(jnp.max(jnp.abs(xn), axis=-1, keepdims=True), 1e-5)
    xq = jnp.clip(jnp.round(xn * s), -128.0, 127.0) / s
    ws = 1.0 / jnp.maximum(jnp.mean(jnp.abs(w)), 1e-5)
    wq = jnp.clip(jnp.round(w * ws), -1.0, 1.0) / ws
    return xq @ wq.T


def feed_forward_ref(x, w1, w2, w3):
    h1 = _bitlinear_ref(x, w1)
    h3 = _bitlinear_ref(x, w3)
    h = (h1 * jax.nn.sigmoid(h1)) * h3
    return _bitlinear_ref(h, w2)


# ---------------------------------- main --------------------------------------
if __name__ == "__main__":
    batch, seq, dim, hidden_dim = 2, 8, 128, 256

    key = jax.random.PRNGKey(0)
    kx, k1, k2, k3 = jax.random.split(key, 4)

    x = jax.random.normal(kx, (batch, seq, dim), dtype=jnp.float32)
    # nn.Linear-style (out_features, in_features) weights, deterministic init.
    w1 = jax.random.normal(k1, (hidden_dim, dim), dtype=jnp.float32) * (dim ** -0.5)
    w2 = jax.random.normal(k2, (dim, hidden_dim), dtype=jnp.float32) * (hidden_dim ** -0.5)
    w3 = jax.random.normal(k3, (hidden_dim, dim), dtype=jnp.float32) * (dim ** -0.5)

    y = feed_forward(x, w1, w2, w3)
    jax.block_until_ready(y)

    y_ref = feed_forward_ref(x, w1, w2, w3)
    assert y.shape == (batch, seq, dim)
    # Kernel uses the integer-exact "scale after dot" formulation; tiny f32 rounding-order
    # differences vs the dequantize-then-matmul reference can flip an occasional round().
    assert jnp.allclose(y, y_ref, atol=3e-2, rtol=3e-2), "mismatch vs reference"

    # TODO(synk): inference=True path (pre-packed int8 weights + stored scales) is a
    # deployment-time variant; only the training forward (inference=False) is implemented.
    print("KERNEL_OK")
</pallas_src>

<mosaic_0001>
module attributes {stable_mosaic.version = 11 : i64} {
  func.func @_ffn_kernel(%arg0: i32, %arg1: i32, %arg2: i32, %arg3: memref<3xf32, #tpu.memory_space<smem>>, %arg4: memref<128x128xf32, #tpu.memory_space<vmem>>, %arg5: memref<128x256xbf16, #tpu.memory_space<vmem>>, %arg6: memref<128x256xbf16, #tpu.memory_space<vmem>>, %arg7: memref<256x128xbf16, #tpu.memory_space<vmem>>, %arg8: memref<128x128xf32, #tpu.memory_space<vmem>>, %arg9: memref<128x128xbf16, #tpu.memory_space<vmem>>, %arg10: memref<128x1xf32, #tpu.memory_space<vmem>>, %arg11: memref<128x1xf32, #tpu.memory_space<vmem>>, %arg12: memref<128x1xf32, #tpu.memory_space<vmem>>, %arg13: memref<128x1xf32, #tpu.memory_space<vmem>>, %arg14: memref<128x1xf32, #tpu.memory_space<vmem>>, %arg15: memref<128x1xf32, #tpu.memory_space<vmem>>, %arg16: memref<1x128x256xf32, #tpu.memory_space<vmem>>, %arg17: memref<128x128xf32, #tpu.memory_space<vmem>>) attributes {dimension_semantics = [#tpu.dimension_semantics<parallel>, #tpu.dimension_semantics<arbitrary>, #tpu.dimension_semantics<arbitrary>], iteration_bounds = array<i64: 1, 2, 1>, scalar_prefetch = 0 : i64, scratch_operands = 9 : i64, tpu.core_type = #tpu.core_type<tc>, window_params = [{transform_indices = @transform_0, window_bounds = array<i64: 3>}, {transform_indices = @transform_1, window_bounds = array<i64: 128, 128>}, {transform_indices = @transform_2, window_bounds = array<i64: 128, 256>}, {transform_indices = @transform_3, window_bounds = array<i64: 128, 256>}, {transform_indices = @transform_4, window_bounds = array<i64: 256, 128>}, {transform_indices = @transform_5, window_bounds = array<i64: 128, 128>}]} {
    %c0_i32 = arith.constant 0 : i32
    %0 = arith.cmpi eq, %arg1, %c0_i32 : i32
    %c0_i32_0 = arith.constant 0 : i32
    %1 = arith.cmpi eq, %arg2, %c0_i32_0 : i32
    %2 = arith.andi %0, %1 : i1
    %3 = arith.extui %2 : i1 to i32
    %c0_i32_1 = arith.constant 0 : i32
    %4 = arith.cmpi ne, %3, %c0_i32_1 : i32
    scf.if %4 {
      %c0 = arith.constant 0 : index
      %c0_11 = arith.constant 0 : index
      %21 = vector.load %arg4[%c0, %c0_11] : memref<128x128xf32, #tpu.memory_space<vmem>>, vector<128x128xf32>
      %22 = arith.mulf %21, %21 : vector<128x128xf32>
      %cst = arith.constant dense<0.000000e+00> : vector<128xf32>
      %23 = vector.multi_reduction <add>, %22, %cst [1] : vector<128x128xf32> to vector<128xf32>
      %24 = vector.shape_cast %23 : vector<128xf32> to vector<128x1xf32>
      %cst_12 = arith.constant 1.280000e+02 : f32
      %25 = vector.broadcast %cst_12 : f32 to vector<128x1xf32>
      %26 = arith.divf %24, %25 : vector<128x1xf32>
      %cst_13 = arith.constant 9.99999997E-7 : f32
      %27 = vector.broadcast %cst_13 : f32 to vector<128x1xf32>
      %28 = arith.addf %26, %27 : vector<128x1xf32>
      %29 = math.rsqrt %28 : vector<128x1xf32>
      %30 = vector.broadcast %29 : vector<128x1xf32> to vector<128x128xf32>
      %31 = arith.mulf %21, %30 : vector<128x128xf32>
      %32 = math.absf %31 : vector<128x128xf32>
      %cst_14 = arith.constant dense<0xFF800000> : vector<128xf32>
      %33 = vector.multi_reduction <maximumf>, %32, %cst_14 [1] : vector<128x128xf32> to vector<128xf32>
      %34 = vector.shape_cast %33 : vector<128xf32> to vector<128x1xf32>
      %cst_15 = arith.constant 9.99999974E-6 : f32
      %35 = vector.broadcast %cst_15 : f32 to vector<128x1xf32>
      %36 = arith.maximumf %34, %35 : vector<128x1xf32>
      %cst_16 = arith.constant 1.270000e+02 : f32
      %37 = vector.broadcast %cst_16 : f32 to vector<128x1xf32>
      %38 = arith.divf %37, %36 : vector<128x1xf32>
      %39 = vector.broadcast %38 : vector<128x1xf32> to vector<128x128xf32>
      %40 = arith.mulf %31, %39 : vector<128x128xf32>
      %41 = math.roundeven %40 : vector<128x128xf32>
      %cst_17 = arith.constant -1.280000e+02 : f32
      %cst_18 = arith.constant 1.270000e+02 : f32
      %42 = vector.broadcast %cst_17 : f32 to vector<128x128xf32>
      %43 = arith.maximumf %42, %41 : vector<128x128xf32>
      %44 = vector.broadcast %cst_18 : f32 to vector<128x128xf32>
      %45 = arith.minimumf %44, %43 : vector<128x128xf32>
      %46 = arith.truncf %45 : vector<128x128xf32> to vector<128x128xbf16>
      %c0_19 = arith.constant 0 : index
      %c0_20 = arith.constant 0 : index
      %47 = vector.load %arg9[%c0_19, %c0_20] : memref<128x128xbf16, #tpu.memory_space<vmem>>, vector<128x128xbf16>
      tpu.vector_store %arg9[%c0_19, %c0_20], %46 {strides = array<i32>} : memref<128x128xbf16, #tpu.memory_space<vmem>>, vector<128x128xbf16>,
      %cst_21 = arith.constant 0.00787401571 : f32
      %48 = vector.broadcast %cst_21 : f32 to vector<128x1xf32>
      %49 = arith.mulf %36, %48 : vector<128x1xf32>
      %c0_22 = arith.constant 0 : index
      %50 = memref.load %arg3[%c0_22] : memref<3xf32, #tpu.memory_space<smem>>
      %51 = vector.broadcast %50 : f32 to vector<128x1xf32>
      %52 = arith.mulf %49, %51 : vector<128x1xf32>
      %c0_23 = arith.constant 0 : index
      %c0_24 = arith.constant 0 : index
      %53 = vector.load %arg10[%c0_23, %c0_24] : memref<128x1xf32, #tpu.memory_space<vmem>>, vector<128x1xf32>
      tpu.vector_store %arg10[%c0_23, %c0_24], %52 {strides = array<i32>} : memref<128x1xf32, #tpu.memory_space<vmem>>, vector<128x1xf32>,
      %c1 = arith.constant 1 : index
      %54 = memref.load %arg3[%c1] : memref<3xf32, #tpu.memory_space<smem>>
      %55 = vector.broadcast %54 : f32 to vector<128x1xf32>
      %56 = arith.mulf %49, %55 : vector<128x1xf32>
      %c0_25 = arith.constant 0 : index
      %c0_26 = arith.constant 0 : index
      %57 = vector.load %arg11[%c0_25, %c0_26] : memref<128x1xf32, #tpu.memory_space<vmem>>, vector<128x1xf32>
      tpu.vector_store %arg11[%c0_25, %c0_26], %56 {strides = array<i32>} : memref<128x1xf32, #tpu.memory_space<vmem>>, vector<128x1xf32>,
      %cst_27 = arith.constant 0.000000e+00 : f32
      %58 = vector.broadcast %cst_27 : f32 to vector<128x1xf32>
      %c0_28 = arith.constant 0 : index
      %c0_29 = arith.constant 0 : index
      %59 = vector.load %arg12[%c0_28, %c0_29] : memref<128x1xf32, #tpu.memory_space<vmem>>, vector<128x1xf32>
      tpu.vector_store %arg12[%c0_28, %c0_29], %58 {strides = array<i32>} : memref<128x1xf32, #tpu.memory_space<vmem>>, vector<128x1xf32>,
      %cst_30 = arith.constant 0.000000e+00 : f32
      %60 = vector.broadcast %cst_30 : f32 to vector<128x1xf32>
      %c0_31 = arith.constant 0 : index
      %c0_32 = arith.constant 0 : index
      %61 = vector.load %arg13[%c0_31, %c0_32] : memref<128x1xf32, #tpu.memory_space<vmem>>, vector<128x1xf32>
      tpu.vector_store %arg13[%c0_31, %c0_32], %60 {strides = array<i32>} : memref<128x1xf32, #tpu.memory_space<vmem>>, vector<128x1xf32>,
    } else {
    }
    %c0_i32_2 = arith.constant 0 : i32
    %5 = arith.cmpi eq, %arg1, %c0_i32_2 : i32
    %6 = arith.extui %5 : i1 to i32
    %c0_i32_3 = arith.constant 0 : i32
    %7 = arith.cmpi ne, %6, %c0_i32_3 : i32
    scf.if %7 {
      %c0 = arith.constant 0 : index
      %c0_11 = arith.constant 0 : index
      %21 = vector.load %arg9[%c0, %c0_11] : memref<128x128xbf16, #tpu.memory_space<vmem>>, vector<128x128xbf16>
      %c0_12 = arith.constant 0 : index
      %c0_13 = arith.constant 0 : index
      %22 = vector.load %arg5[%c0_12, %c0_13] : memref<128x256xbf16, #tpu.memory_space<vmem>>, vector<128x256xbf16>
      %cst = arith.constant dense<0.000000e+00> : vector<128x256xf32>
      %23 = tpu.matmul %21, %22, %cst {dimension_numbers = #tpu.dot_dimension_numbers<[1], [0], [0], [1], [0, 0, 1, 1], [], []>} : vector<128x128xbf16>, vector<128x256xbf16>, vector<128x256xf32> -> vector<128x256xf32>
      %c0_14 = arith.constant 0 : index
      %c0_15 = arith.constant 0 : index
      %24 = vector.load %arg10[%c0_14, %c0_15] : memref<128x1xf32, #tpu.memory_space<vmem>>, vector<128x1xf32>
      %25 = vector.broadcast %24 : vector<128x1xf32> to vector<128x256xf32>
      %26 = arith.mulf %23, %25 : vector<128x256xf32>
      %c0_16 = arith.constant 0 : index
      %c0_17 = arith.constant 0 : index
      %27 = vector.load %arg6[%c0_16, %c0_17] : memref<128x256xbf16, #tpu.memory_space<vmem>>, vector<128x256xbf16>
      %cst_18 = arith.constant dense<0.000000e+00> : vector<128x256xf32>
      %28 = tpu.matmul %21, %27, %cst_18 {dimension_numbers = #tpu.dot_dimension_numbers<[1], [0], [0], [1], [0, 0, 1, 1], [], []>} : vector<128x128xbf16>, vector<128x256xbf16>, vector<128x256xf32> -> vector<128x256xf32>
      %c0_19 = arith.constant 0 : index
      %c0_20 = arith.constant 0 : index
      %29 = vector.load %arg11[%c0_19, %c0_20] : memref<128x1xf32, #tpu.memory_space<vmem>>, vector<128x1xf32>
      %30 = vector.broadcast %29 : vector<128x1xf32> to vector<128x256xf32>
      %31 = arith.mulf %28, %30 : vector<128x256xf32>
      %32 = arith.negf %26 : vector<128x256xf32>
      %33 = math.exp %32 : vector<128x256xf32>
      %cst_21 = arith.constant 1.000000e+00 : f32
      %34 = vector.broadcast %cst_21 : f32 to vector<128x256xf32>
      %35 = arith.addf %34, %33 : vector<128x256xf32>
      %36 = arith.divf %34, %35 : vector<128x256xf32>
      %37 = arith.mulf %26, %36 : vector<128x256xf32>
      %38 = arith.mulf %37, %31 : vector<128x256xf32>
      %39 = arith.index_cast %arg2 : i32 to index
      %c0_22 = arith.constant 0 : index
      %c0_23 = arith.constant 0 : index
      %40 = vector.load %arg16[%39, %c0_22, %c0_23] : memref<1x128x256xf32, #tpu.memory_space<vmem>>, vector<1x128x256xf32>
      %41 = vector.shape_cast %40 : vector<1x128x256xf32> to vector<128x256xf32>
      %42 = vector.shape_cast %38 : vector<128x256xf32> to vector<1x128x256xf32>
      tpu.vector_store %arg16[%39, %c0_22, %c0_23], %42 {strides = array<i32>} : memref<1x128x256xf32, #tpu.memory_space<vmem>>, vector<1x128x256xf32>,
      %c0_24 = arith.constant 0 : index
      %c0_25 = arith.constant 0 : index
      %43 = vector.load %arg12[%c0_24, %c0_25] : memref<128x1xf32, #tpu.memory_space<vmem>>, vector<128x1xf32>
      %44 = arith.mulf %38, %38 : vector<128x256xf32>
      %cst_26 = arith.constant dense<0.000000e+00> : vector<128xf32>
      %45 = vector.multi_reduction <add>, %44, %cst_26 [1] : vector<128x256xf32> to vector<128xf32>
      %46 = vector.shape_cast %45 : vector<128xf32> to vector<128x1xf32>
      %47 = arith.addf %43, %46 : vector<128x1xf32>
      %c0_27 = arith.constant 0 : index
      %c0_28 = arith.constant 0 : index
      %48 = vector.load %arg12[%c0_27, %c0_28] : memref<128x1xf32, #tpu.memory_space<vmem>>, vector<128x1xf32>
      tpu.vector_store %arg12[%c0_27, %c0_28], %47 {strides = array<i32>} : memref<128x1xf32, #tpu.memory_space<vmem>>, vector<128x1xf32>,
      %c0_29 = arith.constant 0 : index
      %c0_30 = arith.constant 0 : index
      %49 = vector.load %arg13[%c0_29, %c0_30] : memref<128x1xf32, #tpu.memory_space<vmem>>, vector<128x1xf32>
      %50 = math.absf %38 : vector<128x256xf32>
      %cst_31 = arith.constant dense<0xFF800000> : vector<128xf32>
      %51 = vector.multi_reduction <maximumf>, %50, %cst_31 [1] : vector<128x256xf32> to vector<128xf32>
      %52 = vector.shape_cast %51 : vector<128xf32> to vector<128x1xf32>
      %53 = arith.maximumf %49, %52 : vector<128x1xf32>
      %c0_32 = arith.constant 0 : index
      %c0_33 = arith.constant 0 : index
      %54 = vector.load %arg13[%c0_32, %c0_33] : memref<128x1xf32, #tpu.memory_space<vmem>>, vector<128x1xf32>
      tpu.vector_store %arg13[%c0_32, %c0_33], %53 {strides = array<i32>} : memref<128x1xf32, #tpu.memory_space<vmem>>, vector<128x1xf32>,
    } else {
    }
    %c1_i32 = arith.constant 1 : i32
    %8 = arith.cmpi eq, %arg1, %c1_i32 : i32
    %c0_i32_4 = arith.constant 0 : i32
    %9 = arith.cmpi eq, %arg2, %c0_i32_4 : i32
    %10 = arith.andi %8, %9 : i1
    %11 = arith.extui %10 : i1 to i32
    %c0_i32_5 = arith.constant 0 : i32
    %12 = arith.cmpi ne, %11, %c0_i32_5 : i32
    scf.if %12 {
      %c0 = arith.constant 0 : index
      %c0_11 = arith.constant 0 : index
      %21 = vector.load %arg12[%c0, %c0_11] : memref<128x1xf32, #tpu.memory_space<vmem>>, vector<128x1xf32>
      %cst = arith.constant 3.906250e-03 : f32
      %22 = vector.broadcast %cst : f32 to vector<128x1xf32>
      %23 = arith.mulf %21, %22 : vector<128x1xf32>
      %cst_12 = arith.constant 9.99999997E-7 : f32
      %24 = vector.broadcast %cst_12 : f32 to vector<128x1xf32>
      %25 = arith.addf %23, %24 : vector<128x1xf32>
      %26 = math.rsqrt %25 : vector<128x1xf32>
      %c0_13 = arith.constant 0 : index
      %c0_14 = arith.constant 0 : index
      %27 = vector.load %arg13[%c0_13, %c0_14] : memref<128x1xf32, #tpu.memory_space<vmem>>, vector<128x1xf32>
      %28 = arith.mulf %27, %26 : vector<128x1xf32>
      %cst_15 = arith.constant 9.99999974E-6 : f32
      %29 = vector.broadcast %cst_15 : f32 to vector<128x1xf32>
      %30 = arith.maximumf %28, %29 : vector<128x1xf32>
      %cst_16 = arith.constant 1.270000e+02 : f32
      %31 = vector.broadcast %cst_16 : f32 to vector<128x1xf32>
      %32 = arith.divf %31, %30 : vector<128x1xf32>
      %33 = arith.mulf %26, %32 : vector<128x1xf32>
      %c0_17 = arith.constant 0 : index
      %c0_18 = arith.constant 0 : index
      %34 = vector.load %arg14[%c0_17, %c0_18] : memref<128x1xf32, #tpu.memory_space<vmem>>, vector<128x1xf32>
      tpu.vector_store %arg14[%c0_17, %c0_18], %33 {strides = array<i32>} : memref<128x1xf32, #tpu.memory_space<vmem>>, vector<128x1xf32>,
      %cst_19 = arith.constant 0.00787401571 : f32
      %35 = vector.broadcast %cst_19 : f32 to vector<128x1xf32>
      %36 = arith.mulf %30, %35 : vector<128x1xf32>
      %c2 = arith.constant 2 : index
      %37 = memref.load %arg3[%c2] : memref<3xf32, #tpu.memory_space<smem>>
      %38 = vector.broadcast %37 : f32 to vector<128x1xf32>
      %39 = arith.mulf %36, %38 : vector<128x1xf32>
      %c0_20 = arith.constant 0 : index
      %c0_21 = arith.constant 0 : index
      %40 = vector.load %arg15[%c0_20, %c0_21] : memref<128x1xf32, #tpu.memory_space<vmem>>, vector<128x1xf32>
      tpu.vector_store %arg15[%c0_20, %c0_21], %39 {strides = array<i32>} : memref<128x1xf32, #tpu.memory_space<vmem>>, vector<128x1xf32>,
      %cst_22 = arith.constant 0.000000e+00 : f32
      %41 = vector.broadcast %cst_22 : f32 to vector<128x128xf32>
      %c0_23 = arith.constant 0 : index
      %c0_24 = arith.constant 0 : index
      %42 = vector.load %arg17[%c0_23, %c0_24] : memref<128x128xf32, #tpu.memory_space<vmem>>, vector<128x128xf32>
      tpu.vector_store %arg17[%c0_23, %c0_24], %41 {strides = array<i32>} : memref<128x128xf32, #tpu.memory_space<vmem>>, vector<128x128xf32>,
    } else {
    }
    %c1_i32_6 = arith.constant 1 : i32
    %13 = arith.cmpi eq, %arg1, %c1_i32_6 : i32
    %14 = arith.extui %13 : i1 to i32
    %c0_i32_7 = arith.constant 0 : i32
    %15 = arith.cmpi ne, %14, %c0_i32_7 : i32
    scf.if %15 {
      %21 = arith.index_cast %arg2 : i32 to index
      %c0 = arith.constant 0 : index
      %c0_11 = arith.constant 0 : index
      %22 = vector.load %arg16[%21, %c0, %c0_11] : memref<1x128x256xf32, #tpu.memory_space<vmem>>, vector<1x128x256xf32>
      %23 = vector.shape_cast %22 : vector<1x128x256xf32> to vector<128x256xf32>
      %c0_12 = arith.constant 0 : index
      %c0_13 = arith.constant 0 : index
      %24 = vector.load %arg14[%c0_12, %c0_13] : memref<128x1xf32, #tpu.memory_space<vmem>>, vector<128x1xf32>
      %25 = vector.broadcast %24 : vector<128x1xf32> to vector<128x256xf32>
      %26 = arith.mulf %23, %25 : vector<128x256xf32>
      %27 = math.roundeven %26 : vector<128x256xf32>
      %cst = arith.constant -1.280000e+02 : f32
      %cst_14 = arith.constant 1.270000e+02 : f32
      %28 = vector.broadcast %cst : f32 to vector<128x256xf32>
      %29 = arith.maximumf %28, %27 : vector<128x256xf32>
      %30 = vector.broadcast %cst_14 : f32 to vector<128x256xf32>
      %31 = arith.minimumf %30, %29 : vector<128x256xf32>
      %32 = arith.truncf %31 : vector<128x256xf32> to vector<128x256xbf16>
      %c0_15 = arith.constant 0 : index
      %c0_16 = arith.constant 0 : index
      %33 = vector.load %arg17[%c0_15, %c0_16] : memref<128x128xf32, #tpu.memory_space<vmem>>, vector<128x128xf32>
      %c0_17 = arith.constant 0 : index
      %c0_18 = arith.constant 0 : index
      %34 = vector.load %arg7[%c0_17, %c0_18] : memref<256x128xbf16, #tpu.memory_space<vmem>>, vector<256x128xbf16>
      %cst_19 = arith.constant dense<0.000000e+00> : vector<128x128xf32>
      %35 = tpu.matmul %32, %34, %cst_19 {dimension_numbers = #tpu.dot_dimension_numbers<[1], [0], [0], [1], [0, 0, 1, 1], [], []>} : vector<128x256xbf16>, vector<256x128xbf16>, vector<128x128xf32> -> vector<128x128xf32>
      %36 = arith.addf %33, %35 : vector<128x128xf32>
      %c0_20 = arith.constant 0 : index
      %c0_21 = arith.constant 0 : index
      %37 = vector.load %arg17[%c0_20, %c0_21] : memref<128x128xf32, #tpu.memory_space<vmem>>, vector<128x128xf32>
      tpu.vector_store %arg17[%c0_20, %c0_21], %36 {strides = array<i32>} : memref<128x128xf32, #tpu.memory_space<vmem>>, vector<128x128xf32>,
    } else {
    }
    %c1_i32_8 = arith.constant 1 : i32
    %16 = arith.cmpi eq, %arg1, %c1_i32_8 : i32
    %c0_i32_9 = arith.constant 0 : i32
    %17 = arith.cmpi eq, %arg2, %c0_i32_9 : i32
    %18 = arith.andi %16, %17 : i1
    %19 = arith.extui %18 : i1 to i32
    %c0_i32_10 = arith.constant 0 : i32
    %20 = arith.cmpi ne, %19, %c0_i32_10 : i32
    scf.if %20 {
      %c0 = arith.constant 0 : index
      %c0_11 = arith.constant 0 : index
      %21 = vector.load %arg17[%c0, %c0_11] : memref<128x128xf32, #tpu.memory_space<vmem>>, vector<128x128xf32>
      %c0_12 = arith.constant 0 : index
      %c0_13 = arith.constant 0 : index
      %22 = vector.load %arg15[%c0_12, %c0_13] : memref<128x1xf32, #tpu.memory_space<vmem>>, vector<128x1xf32>
      %23 = vector.broadcast %22 : vector<128x1xf32> to vector<128x128xf32>
      %24 = arith.mulf %21, %23 : vector<128x128xf32>
      %c0_14 = arith.constant 0 : index
      %c0_15 = arith.constant 0 : index
      %25 = vector.load %arg8[%c0_14, %c0_15] : memref<128x128xf32, #tpu.memory_space<vmem>>, vector<128x128xf32>
      tpu.vector_store %arg8[%c0_14, %c0_15], %24 {strides = array<i32>} : memref<128x128xf32, #tpu.memory_space<vmem>>, vector<128x128xf32>,
    } else {
    }
    return
  }
  func.func @transform_0(%arg0: i32, %arg1: i32, %arg2: i32) -> i32 {
    %c0_i32 = arith.constant 0 : i32
    %c0_i32_0 = arith.constant 0 : i32
    return %c0_i32 : i32
  }
  func.func @transform_1(%arg0: i32, %arg1: i32, %arg2: i32) -> (i32, i32) {
    %c0_i32 = arith.constant 0 : i32
    %c0_i32_0 = arith.constant 0 : i32
    return %arg0, %c0_i32 : i32, i32
  }
  func.func @transform_2(%arg0: i32, %arg1: i32, %arg2: i32) -> (i32, i32) {
    %c1_i32 = arith.constant 1 : i32
    %0 = arith.subi %c1_i32, %arg1 : i32
    %1 = arith.muli %arg2, %0 : i32
    %c0_i32 = arith.constant 0 : i32
    %c0_i32_0 = arith.constant 0 : i32
    return %c0_i32, %1 : i32, i32
  }
  func.func @transform_3(%arg0: i32, %arg1: i32, %arg2: i32) -> (i32, i32) {
    %c1_i32 = arith.constant 1 : i32
    %0 = arith.subi %c1_i32, %arg1 : i32
    %1 = arith.muli %arg2, %0 : i32
    %c0_i32 = arith.constant 0 : i32
    %c0_i32_0 = arith.constant 0 : i32
    return %c0_i32, %1 : i32, i32
  }
  func.func @transform_4(%arg0: i32, %arg1: i32, %arg2: i32) -> (i32, i32) {
    %0 = arith.muli %arg2, %arg1 : i32
    %c0_i32 = arith.constant 0 : i32
    %c0_i32_0 = arith.constant 0 : i32
    return %0, %c0_i32 : i32, i32
  }
  func.func @transform_5(%arg0: i32, %arg1: i32, %arg2: i32) -> (i32, i32) {
    %c0_i32 = arith.constant 0 : i32
    %c0_i32_0 = arith.constant 0 : i32
    return %arg0, %c0_i32 : i32, i32
  }
}

</mosaic_0001>

<bundles_post_ra>
// kernel: feed_forward.1
= control target key start
LH: loop header
LB: loop body
LE: loop exit
PB: predicated region body
PF: predicated region fallthrough
CT: control target
= control target key end

     0   :  { %10 = vsyncpa [#allocation12], 0  ;;  %s4315_s18 = smov 0   ;;  %s4317_s19 = smov 0   ;;  %s5962_s0 = inlined_call_operand.vmem [shape: f32[3], index: 0, kind: input, shape index: {}]   ;;  %s5963_s1 = inlined_call_operand.vmem [shape: f32[128,128], index: 1, kind: input, shape index: {}]   ;;  %s5964_s2 = inlined_call_operand.vmem [shape: bf16[128,256], index: 2, kind: input, shape index: {}]   ;;  %s5965_s3 = inlined_call_operand.vmem [shape: bf16[128,256], index: 3, kind: input, shape index: {}]   ;;  %s5966_s4 = inlined_call_operand.vmem [shape: bf16[256,128], index: 4, kind: input, shape index: {}]   ;;  %s5967_s5 = inlined_call_operand.vmem [shape: f32[128,128], index: 5, kind: output, shape index: {}]  }
   0x1   :  { %s4319_s20 = smov 0  }
   0x2 LB: > { %s3209_s21 = sadd.s32 4294967295, %s4277_s20   ;;  %s31_s22 = sadd.s32 1, %s4273_s19  ;;  %s4277_s20 = sphi %s4319_s20, %s16_s20   ;;  %s4273_s19 = sphi %s4317_s19, %s6051_s19   ;;  %s4269_s18 = sphi %s4315_s18, %s6050_s18  }
   0x3   : > { %p33_p0 = scmp.ge.s32.totalorder %s31_s22, 2  ;;  %p3210_p1 = scmp.ge.s32.totalorder %s4277_s20, 1 }
   0x4   : > { %p201_p2 = scmp.lt.s32.totalorder %s4277_s20, 3  ;;  %p4340_p4 = scmp.eq.s32.totalorder %s3209_s21, 0 }
   0x5   : > { %s6053_s22 = smov (%p33_p0, %s31_s22), 0  ;;  %s214_s27 = sshll.u32 %s5962_s0, 4  ;;  %s215_s27 = int_to_ptr.vmem [resolvable:$true] %s214_s27 }
   0x6   : > { %p4336_p3 = pnand %p3210_p1, %p201_p2  ;;  %s4236_s28 = scalar_lea.vmem %s215_s27, 16 }
   0x7   : > { %p4237_p7 = scmp.ne.s32.totalorder %s215_s27, %s4236_s28  ;;  %p4244_p11 = scmp.lt.s32.totalorder %s215_s27, %s215_s27 }
   0x8   : > { %p3866_p5 = pneg %p4336_p3  ;;  %p4245_p12 = scmp.lt.s32.totalorder %s4236_s28, %s4236_s28 }
   0xa   : > { %p3867_p6 = pnand %p4340_p4, %p3866_p5  ;;  %p4246_p13 = por %p4245_p12, %p4244_p11 }
   0xc   : > { %p4238_p8 = pneg %p3867_p6 }
   0xe   : > { %p4239_p9 = pnand %p4238_p8, %p4237_p7 }
  0x10   : > { %p4240_p10 = pneg %p4239_p9 }
  0x12   : > { %p4247_p0 = pnand %p4246_p13, %p4240_p10 }
  0x14   : > { %4250 = shalt.err (!%p4247_p0)
}
  0x15   : > { %s4279_s29 = smov [#allocation11]   ;;  %273 = sbr.rel (%p4336_p3) target bundleno = 1579 (0x62b), region = 40 }
  0x16   : > { %3869 = dma.vmem_to_smem (!%p3867_p6), %s215_s27, 16, %s4279_s29, [#allocation12]  }
  0x1a   : > { %4264 = dma.done.wait (%p4340_p4), [#allocation12], 16  }
  0x1b   : > { %4266 = vsyncadd (%p4340_p4), [#allocation12], 4294967280 }
  0x1c   : > { %279 = sfence }
  0x1d   : > { %p363_p1 = scmp.eq.s32.totalorder %s4269_s18, 0 }
  0x1e   : > { %v4361_v0 = vld [vmem:[%s5963_s1] sm:$0xff] (%p363_p1)  ;;  %v4366_v1 = vld [vmem:[%s5963_s1 + $0x10] sm:$0xff] (%p363_p1)  ;;  %v4371_v2 = vld [vmem:[%s5963_s1 + $0x8] sm:$0xff] (%p363_p1)  ;;  %vm772_vm0 = vcmask (%p363_p1), 7168   ;;  %s754_s16 = sld [smem:[#allocation11]] (%p363_p1) }
  0x1f   : > { %368 = sbr.rel (!%p363_p1) target bundleno = 427 (0x1ab), region = 48  ;;  %v385_v3 = vmul.f32 (%p363_p1), %v4361_v0, %v4361_v0  ;;  %v387_v4 = vmul.f32 (%p363_p1), %v4366_v1, %v4366_v1  ;;  %v4380_v5 = vld [vmem:[%s5963_s1 + $0x18] sm:$0xff] (%p363_p1)  ;;  %v386_v6 = vmul.f32 (%p363_p1), %v4371_v2, %v4371_v2  ;;  %v4389_v8 = vld [vmem:[%s5963_s1 + $0x20] sm:$0xff] (%p363_p1)  ;;  %v4394_v9 = vld [vmem:[%s5963_s1 + $0x28] sm:$0xff] (%p363_p1)  ;;  %s3236_s17 = sld [smem:[#allocation11 + $0x1]] (%p363_p1) }
  0x20   : > { %v388_v7 = vmul.f32 (%p363_p1), %v4380_v5, %v4380_v5  ;;  %v389_v10 = vmul.f32 (%p363_p1), %v4389_v8, %v4389_v8  ;;  %v390_v11 = vmul.f32 (%p363_p1), %v4394_v9, %v4394_v9  ;;  %v4403_v12 = vld [vmem:[%s5963_s1 + $0x30] sm:$0xff] (%p363_p1)  ;;  %v4408_v13 = vld [vmem:[%s5963_s1 + $0x38] sm:$0xff] (%p363_p1)  ;;  %v4417_v16 = vld [vmem:[%s5963_s1 + $0x40] sm:$0xff] (%p363_p1) }
  0x21   : > { %401 = vadd.xlane.f32.xlu0 (%p363_p1), %v385_v3  ;;  %405 = vadd.xlane.f32.xlu1 (%p363_p1), %v387_v4  ;;  %v391_v14 = vmul.f32 (%p363_p1), %v4403_v12, %v4403_v12  ;;  %v392_v15 = vmul.f32 (%p363_p1), %v4408_v13, %v4408_v13  ;;  %v4422_v17 = vld [vmem:[%s5963_s1 + $0x48] sm:$0xff] (%p363_p1)  ;;  %v393_v18 = vmul.f32 (%p363_p1), %v4417_v16, %v4417_v16  ;;  %v4431_v20 = vld [vmem:[%s5963_s1 + $0x50] sm:$0xff] (%p363_p1)  ;;  %v4436_v21 = vld [vmem:[%s5963_s1 + $0x58] sm:$0xff] (%p363_p1) }
  0x22   : > { %v394_v19 = vmul.f32 (%p363_p1), %v4422_v17, %v4422_v17  ;;  %v395_v22 = vmul.f32 (%p363_p1), %v4431_v20, %v4431_v20  ;;  %v396_v23 = vmul.f32 (%p363_p1), %v4436_v21, %v4436_v21  ;;  %v4445_v24 = vld [vmem:[%s5963_s1 + $0x60] sm:$0xff] (%p363_p1)  ;;  %v4450_v25 = vld [vmem:[%s5963_s1 + $0x68] sm:$0xff] (%p363_p1)  ;;  %v4459_v28 = vld [vmem:[%s5963_s1 + $0x70] sm:$0xff] (%p363_p1) }
  0x23   : > { %v397_v26 = vmul.f32 (%p363_p1), %v4445_v24, %v4445_v24  ;;  %v398_v27 = vmul.f32 (%p363_p1), %v4450_v25, %v4450_v25  ;;  %v4464_v29 = vld [vmem:[%s5963_s1 + $0x78] sm:$0xff] (%p363_p1)  ;;  %v399_v30 = vmul.f32 (%p363_p1), %v4459_v28, %v4459_v28 }
  0x24   : > { %v400_v31 = vmul.f32 %v4464_v29, %v4464_v29 }
  0x25   : > { %403 = vadd.xlane.f32.xlu0 %v386_v6  ;;  %407 = vadd.xlane.f32.xlu1 %v388_v7 }
  0x29   : > { %409 = vadd.xlane.f32.xlu0 %v389_v10  ;;  %411 = vadd.xlane.f32.xlu1 %v390_v11 }
  0x2d   : > { %413 = vadd.xlane.f32.xlu0 %v391_v14  ;;  %415 = vadd.xlane.f32.xlu1 %v392_v15 }
  0x31   : > { %417 = vadd.xlane.f32.xlu0 %v393_v18  ;;  %419 = vadd.xlane.f32.xlu1 %v394_v19 }
  0x35   : > { %421 = vadd.xlane.f32.xlu0 %v395_v22  ;;  %423 = vadd.xlane.f32.xlu1 %v396_v23 }
  0x39   : > { %425 = vadd.xlane.f32.xlu0 %v397_v26  ;;  %427 = vadd.xlane.f32.xlu1 %v398_v27 }
  0x3d   : > { %429 = vadd.xlane.f32.xlu0 %v399_v30  ;;  %431 = vadd.xlane.f32.xlu1 %v400_v31 }
  0xaa   : > { %v402_v32 = vpop.xlane.xlu0 %401  ;;  %v406_v33 = vpop.xlane.xlu1 %405 }
  0xab   : > { %v434_v34 = vmul.f32 0.0078125, %v402_v32  ;;  %v436_v35 = vmul.f32 0.0078125, %v406_v33 }
  0xad   : > { %v450_v36 = vadd.f32 1e-06, %v434_v34  ;;  %v452_v37 = vadd.f32 1e-06, %v436_v35 }
  0xae   : > { %v404_v38 = vpop.xlane.xlu0 %403  ;;  %v408_v39 = vpop.xlane.xlu1 %407 }
  0xaf   : > { %3902 = vrsqrt.f32 %v450_v36  ;;  %v435_v40 = vmul.f32 0.0078125, %v404_v38  ;;  %v437_v41 = vmul.f32 0.0078125, %v408_v39 }
  0xb0   : > { %3904 = vrsqrt.f32 %v452_v37 }
  0xb1   : > { %v451_v42 = vadd.f32 1e-06, %v435_v40  ;;  %v453_v43 = vadd.f32 1e-06, %v437_v41 }
  0xb2   : > { %v410_v44 = vpop.xlane.xlu0 %409  ;;  %v412_v45 = vpop.xlane.xlu1 %411 }
  0xb3   : > { %3906 = vrsqrt.f32 %v451_v42  ;;  %v438_v46 = vmul.f32 0.0078125, %v410_v44  ;;  %v439_v47 = vmul.f32 0.0078125, %v412_v45 }
  0xb4   : > { %3908 = vrsqrt.f32 %v453_v43 }
  0xb5   : > { %v454_v48 = vadd.f32 1e-06, %v438_v46  ;;  %v455_v49 = vadd.f32 1e-06, %v439_v47 }
  0xb6   : > { %v414_v50 = vpop.xlane.xlu0 %413  ;;  %v416_v51 = vpop.xlane.xlu1 %415 }
  0xb7   : > { %3910 = vrsqrt.f32 %v454_v48  ;;  %v440_v52 = vmul.f32 0.0078125, %v414_v50  ;;  %v441_v53 = vmul.f32 0.0078125, %v416_v51 }
  0xb8   : > { %3912 = vrsqrt.f32 %v455_v49 }
  0xb9   : > { %v456_v54 = vadd.f32 1e-06, %v440_v52  ;;  %v457_v55 = vadd.f32 1e-06, %v441_v53 }
  0xba   : > { %v418_v56 = vpop.xlane.xlu0 %417  ;;  %v420_v57 = vpop.xlane.xlu1 %419 }
  0xbb   : > { %3914 = vrsqrt.f32 %v456_v54  ;;  %v442_v58 = vmul.f32 0.0078125, %v418_v56  ;;  %v443_v59 = vmul.f32 0.0078125, %v420_v57 }
  0xbc   : > { %v3903_v60 = vpop.eup %3902  ;;  %3916 = vrsqrt.f32 %v457_v55 }
  0xbd   : > { %v3905_v61 = vpop.eup %3904  ;;  %v458_v62 = vadd.f32 1e-06, %v442_v58  ;;  %v459_v63 = vadd.f32 1e-06, %v443_v59  ;;  %v4471_v3 = vmul.f32 %v3903_v60, %v4361_v0 }
  0xbe   : > { %v422_v4 = vpop.xlane.xlu0 %421  ;;  %v424_v6 = vpop.xlane.xlu1 %423  ;;  %v4474_v7 = vmul.f32 %v3905_v61, %v4366_v1 }
  0xbf   : > { %3918 = vrsqrt.f32 %v458_v62  ;;  %v444_v10 = vmul.f32 0.0078125, %v422_v4  ;;  %v498_v11 = vand.u32 2147483647, %v4471_v3  ;;  %v445_v14 = vmul.f32 0.0078125, %v424_v6 }
  0xc0   : > { %v3907_v15 = vpop.eup %3906  ;;  %3920 = vrsqrt.f32 %v459_v63  ;;  %v500_v23 = vand.u32 2147483647, %v4474_v7 }
  0xc1   : > { %v3909_v18 = vpop.eup %3908  ;;  %v460_v19 = vadd.f32 1e-06, %v444_v10  ;;  %514 = vmax.xlane.f32.xlu0 %v498_v11  ;;  %v461_v22 = vadd.f32 1e-06, %v445_v14  ;;  %v4479_v0 = vmul.f32 %v3907_v15, %v4371_v2  ;;  %v4280_v10 = vmov 0.0  }
  0xc2   : > { %v426_v26 = vpop.xlane.xlu0 %425  ;;  %v428_v27 = vpop.xlane.xlu1 %427  ;;  %v4482_v1 = vmul.f32 %v3909_v18, %v4380_v5  ;;  %823 = vst.msk [vmem:[#allocation5] sm:$0xff] %vm772_vm0, %v4280_v10  ;;  %824 = vst.msk [vmem:[#allocation5 + $0x8] sm:$0xff] %vm772_vm0, %v4280_v10  ;;  %v4566_v11 = vstv %s754_s16  ;;  %v4568_v14 = vstv %s3236_s17 }
  0xc3   : > { %3922 = vrsqrt.f32 %v460_v19  ;;  %v446_v30 = vmul.f32 0.0078125, %v426_v26  ;;  %v499_v31 = vand.u32 2147483647, %v4479_v0  ;;  %v447_v32 = vmul.f32 0.0078125, %v428_v27  ;;  %825 = vst.msk [vmem:[#allocation5 + $0x10] sm:$0xff] %vm772_vm0, %v4280_v10  ;;  %826 = vst.msk [vmem:[#allocation5 + $0x18] sm:$0xff] %vm772_vm0, %v4280_v10 }
  0xc4   : > { %v3911_v33 = vpop.eup %3910  ;;  %3924 = vrsqrt.f32 %v461_v22  ;;  %v501_v2 = vand.u32 2147483647, %v4482_v1  ;;  %827 = vst.msk [vmem:[#allocation5 + $0x20] sm:$0xff] %vm772_vm0, %v4280_v10  ;;  %828 = vst.msk [vmem:[#allocation5 + $0x28] sm:$0xff] %vm772_vm0, %v4280_v10 }
  0xc5   : > { %v3913_v34 = vpop.eup %3912  ;;  %v462_v35 = vadd.f32 1e-06, %v446_v30  ;;  %518 = vmax.xlane.f32.xlu0 %v500_v23  ;;  %516 = vmax.xlane.f32.xlu1 %v499_v31  ;;  %v463_v36 = vadd.f32 1e-06, %v447_v32  ;;  %v4487_v37 = vmul.f32 %v3911_v33, %v4389_v8  ;;  %829 = vst.msk [vmem:[#allocation5 + $0x30] sm:$0xff] %vm772_vm0, %v4280_v10  ;;  %830 = vst.msk [vmem:[#allocation5 + $0x38] sm:$0xff] %vm772_vm0, %v4280_v10 }
  0xc6   : > { %v430_v38 = vpop.xlane.xlu0 %429  ;;  %v432_v5 = vpop.xlane.xlu1 %431  ;;  %v4490_v39 = vmul.f32 %v3913_v34, %v4394_v9  ;;  %831 = vst.msk [vmem:[#allocation5 + $0x40] sm:$0xff] %vm772_vm0, %v4280_v10  ;;  %832 = vst.msk [vmem:[#allocation5 + $0x48] sm:$0xff] %vm772_vm0, %v4280_v10 }
  0xc7   : > { %3926 = vrsqrt.f32 %v462_v35  ;;  %v448_v40 = vmul.f32 0.0078125, %v430_v38  ;;  %v502_v41 = vand.u32 2147483647, %v4487_v37  ;;  %v449_v42 = vmul.f32 0.0078125, %v432_v5  ;;  %833 = vst.msk [vmem:[#allocation5 + $0x50] sm:$0xff] %vm772_vm0, %v4280_v10  ;;  %834 = vst.msk [vmem:[#allocation5 + $0x58] sm:$0xff] %vm772_vm0, %v4280_v10 }
  0xc8   : > { %v3915_v43 = vpop.eup %3914  ;;  %3928 = vrsqrt.f32 %v463_v36  ;;  %v503_v8 = vand.u32 2147483647, %v4490_v39  ;;  %835 = vst.msk [vmem:[#allocation5 + $0x60] sm:$0xff] %vm772_vm0, %v4280_v10  ;;  %836 = vst.msk [vmem:[#allocation5 + $0x68] sm:$0xff] %vm772_vm0, %v4280_v10 }
  0xc9   : > { %v3917_v44 = vpop.eup %3916  ;;  %v464_v45 = vadd.f32 1e-06, %v448_v40  ;;  %520 = vmax.xlane.f32.xlu1 %v501_v2  ;;  %522 = vmax.xlane.f32.xlu0 %v502_v41  ;;  %v465_v46 = vadd.f32 1e-06, %v449_v42  ;;  %v4495_v47 = vmul.f32 %v3915_v43, %v4403_v12  ;;  %837 = vst.msk [vmem:[#allocation5 + $0x70] sm:$0xff] %vm772_vm0, %v4280_v10  ;;  %838 = vst.msk [vmem:[#allocation5 + $0x78] sm:$0xff] %vm772_vm0, %v4280_v10 }
  0xca   : > { %v4498_v9 = vmul.f32 %v3917_v44, %v4408_v13  ;;  %839 = vst.msk [vmem:[#allocation6] sm:$0xff] %vm772_vm0, %v4280_v10  ;;  %840 = vst.msk [vmem:[#allocation6 + $0x8] sm:$0xff] %vm772_vm0, %v4280_v10 }
  0xcb   : > { %3930 = vrsqrt.f32 %v464_v45  ;;  %v504_v48 = vand.u32 2147483647, %v4495_v47  ;;  %841 = vst.msk [vmem:[#allocation6 + $0x10] sm:$0xff] %vm772_vm0, %v4280_v10  ;;  %842 = vst.msk [vmem:[#allocation6 + $0x18] sm:$0xff] %vm772_vm0, %v4280_v10 }
  0xcc   : > { %v3919_v49 = vpop.eup %3918  ;;  %3932 = vrsqrt.f32 %v465_v46  ;;  %v505_v51 = vand.u32 2147483647, %v4498_v9  ;;  %843 = vst.msk [vmem:[#allocation6 + $0x20] sm:$0xff] %vm772_vm0, %v4280_v10  ;;  %844 = vst.msk [vmem:[#allocation6 + $0x28] sm:$0xff] %vm772_vm0, %v4280_v10 }
  0xcd   : > { %v3921_v50 = vpop.eup %3920  ;;  %524 = vmax.xlane.f32.xlu1 %v503_v8  ;;  %526 = vmax.xlane.f32.xlu0 %v504_v48  ;;  %v4503_v52 = vmul.f32 %v3919_v49, %v4417_v16  ;;  %845 = vst.msk [vmem:[#allocation6 + $0x30] sm:$0xff] %vm772_vm0, %v4280_v10  ;;  %846 = vst.msk [vmem:[#allocation6 + $0x38] sm:$0xff] %vm772_vm0, %v4280_v10 }
  0xce   : > { %v4506_v53 = vmul.f32 %v3921_v50, %v4422_v17  ;;  %847 = vst.msk [vmem:[#allocation6 + $0x40] sm:$0xff] %vm772_vm0, %v4280_v10  ;;  %848 = vst.msk [vmem:[#allocation6 + $0x48] sm:$0xff] %vm772_vm0, %v4280_v10 }
  0xcf   : > { %v506_v12 = vand.u32 2147483647, %v4503_v52  ;;  %849 = vst.msk [vmem:[#allocation6 + $0x50] sm:$0xff] %vm772_vm0, %v4280_v10  ;;  %850 = vst.msk [vmem:[#allocation6 + $0x58] sm:$0xff] %vm772_vm0, %v4280_v10 }
  0xd0   : > { %v3923_v13 = vpop.eup %3922  ;;  %v507_v55 = vand.u32 2147483647, %v4506_v53  ;;  %851 = vst.msk [vmem:[#allocation6 + $0x60] sm:$0xff] %vm772_vm0, %v4280_v10  ;;  %852 = vst.msk [vmem:[#allocation6 + $0x68] sm:$0xff] %vm772_vm0, %v4280_v10 }
  0xd1   : > { %v3925_v54 = vpop.eup %3924  ;;  %528 = vmax.xlane.f32.xlu1 %v505_v51  ;;  %530 = vmax.xlane.f32.xlu0 %v506_v12  ;;  %v4511_v56 = vmul.f32 %v3923_v13, %v4431_v20  ;;  %853 = vst.msk [vmem:[#allocation6 + $0x70] sm:$0xff] %vm772_vm0, %v4280_v10  ;;  %854 = vst.msk [vmem:[#allocation6 + $0x78] sm:$0xff] %vm772_vm0, %v4280_v10 }
  0xd2   : > { %v4514_v57 = vmul.f32 %v3925_v54, %v4436_v21 }
  0xd3   : > { %v508_v16 = vand.u32 2147483647, %v4511_v56 }
  0xd4   : > { %v3927_v58 = vpop.eup %3926  ;;  %v509_v17 = vand.u32 2147483647, %v4514_v57 }
  0xd5   : > { %v3929_v59 = vpop.eup %3928  ;;  %532 = vmax.xlane.f32.xlu1 %v507_v55  ;;  %534 = vmax.xlane.f32.xlu0 %v508_v16  ;;  %v4519_v60 = vmul.f32 %v3927_v58, %v4445_v24 }
  0xd6   : > { %v4522_v61 = vmul.f32 %v3929_v59, %v4450_v25 }
  0xd7   : > { %v510_v20 = vand.u32 2147483647, %v4519_v60 }
  0xd8   : > { %v3931_v62 = vpop.eup %3930  ;;  %v511_v21 = vand.u32 2147483647, %v4522_v61 }
  0xd9   : > { %v3933_v63 = vpop.eup %3932  ;;  %536 = vmax.xlane.f32.xlu1 %v509_v17  ;;  %538 = vmax.xlane.f32.xlu0 %v510_v20  ;;  %v4527_v4 = vmul.f32 %v3931_v62, %v4459_v28 }
  0xda   : > { %v4530_v6 = vmul.f32 %v3933_v63, %v4464_v29 }
  0xdb   : > { %v512_v24 = vand.u32 2147483647, %v4527_v4 }
  0xdc   : > { %v513_v25 = vand.u32 2147483647, %v4530_v6 }
  0xdd   : > { %540 = vmax.xlane.f32.xlu1 %v511_v21  ;;  %542 = vmax.xlane.f32.xlu0 %v512_v24 }
  0xe1   : > { %544 = vmax.xlane.f32.xlu1 %v513_v25 }
 0x14a   : > { %v515_v28 = vpop.xlane.xlu0 %514 }
 0x14b   : > { %v546_v29 = vmax.f32 %v515_v28, 1e-05 }
 0x14d   : > { %3934 = vrcp.f32 %v546_v29  ;;  %v738_v15 = vmul.f32 0.007874016, %v546_v29 }
 0x14e   : > { %v517_v18 = vpop.xlane.xlu1 %516  ;;  %v519_v19 = vpop.xlane.xlu0 %518 }
 0x14f   : > { %v756_v22 = vmul.f32 %v4566_v11, %v738_v15  ;;  %v791_v23 = vmul.f32 %v4568_v14, %v738_v15  ;;  %v547_v26 = vmax.f32 %v517_v18, 1e-05  ;;  %v548_v27 = vmax.f32 %v519_v19, 1e-05 }
 0x151   : > { %773 = vst.msk [vmem:[#allocation3] sm:$0xff] %vm772_vm0, %v756_v22  ;;  %807 = vst.msk [vmem:[#allocation4] sm:$0xff] %vm772_vm0, %v791_v23  ;;  %3936 = vrcp.f32 %v547_v26  ;;  %v739_v30 = vmul.f32 0.007874016, %v547_v26  ;;  %v740_v31 = vmul.f32 0.007874016, %v548_v27 }
 0x152   : > { %3938 = vrcp.f32 %v548_v27  ;;  %v521_v32 = vpop.xlane.xlu1 %520  ;;  %v523_v33 = vpop.xlane.xlu0 %522 }
 0x153   : > { %v757_v34 = vmul.f32 %v4566_v11, %v739_v30  ;;  %v792_v35 = vmul.f32 %v4568_v14, %v739_v30  ;;  %v758_v36 = vmul.f32 %v4566_v11, %v740_v31  ;;  %v793_v2 = vmul.f32 %v4568_v14, %v740_v31 }
 0x154   : > { %v549_v38 = vmax.f32 %v521_v32, 1e-05  ;;  %v550_v5 = vmax.f32 %v523_v33, 1e-05 }
 0x155   : > { %774 = vst.msk [vmem:[#allocation3 + $0x8] sm:$0xff] %vm772_vm0, %v757_v34  ;;  %808 = vst.msk [vmem:[#allocation4 + $0x8] sm:$0xff] %vm772_vm0, %v792_v35 }
 0x156   : > { %775 = vst.msk [vmem:[#allocation3 + $0x10] sm:$0xff] %vm772_vm0, %v758_v36  ;;  %809 = vst.msk [vmem:[#allocation4 + $0x10] sm:$0xff] %vm772_vm0, %v793_v2  ;;  %3940 = vrcp.f32 %v549_v38  ;;  %v741_v40 = vmul.f32 0.007874016, %v549_v38  ;;  %v742_v41 = vmul.f32 0.007874016, %v550_v5  ;;  %v525_v42 = vpop.xlane.xlu1 %524  ;;  %v527_v43 = vpop.xlane.xlu0 %526 }
 0x157   : > { %3942 = vrcp.f32 %v550_v5  ;;  %v551_v44 = vmax.f32 %v525_v42, 1e-05  ;;  %v552_v45 = vmax.f32 %v527_v43, 1e-05 }
 0x158   : > { %v759_v46 = vmul.f32 %v4566_v11, %v741_v40  ;;  %v794_v8 = vmul.f32 %v4568_v14, %v741_v40  ;;  %v760_v48 = vmul.f32 %v4566_v11, %v742_v41  ;;  %v795_v49 = vmul.f32 %v4568_v14, %v742_v41 }
 0x159   : > { %3944 = vrcp.f32 %v551_v44  ;;  %v743_v50 = vmul.f32 0.007874016, %v551_v44  ;;  %v744_v51 = vmul.f32 0.007874016, %v552_v45 }
 0x15a   : > { %v3935_v12 = vpop.eup %3934  ;;  %776 = vst.msk [vmem:[#allocation3 + $0x18] sm:$0xff] %vm772_vm0, %v759_v46  ;;  %810 = vst.msk [vmem:[#allocation4 + $0x18] sm:$0xff] %vm772_vm0, %v794_v8  ;;  %v529_v13 = vpop.xlane.xlu1 %528  ;;  %3946 = vrcp.f32 %v552_v45 }
 0x15b   : > { %777 = vst.msk [vmem:[#allocation3 + $0x20] sm:$0xff] %vm772_vm0, %v760_v48  ;;  %811 = vst.msk [vmem:[#allocation4 + $0x20] sm:$0xff] %vm772_vm0, %v795_v49  ;;  %v531_v54 = vpop.xlane.xlu0 %530  ;;  %v563_v55 = vmul.f32 127.0, %v3935_v12  ;;  %v761_v16 = vmul.f32 %v4566_v11, %v743_v50  ;;  %v796_v58 = vmul.f32 %v4568_v14, %v743_v50  ;;  %v762_v59 = vmul.f32 %v4566_v11, %v744_v51 }
 0x15c   : > { %v797_v17 = vmul.f32 %v4568_v14, %v744_v51  ;;  %v553_v20 = vmax.f32 %v529_v13, 1e-05  ;;  %v554_v62 = vmax.f32 %v531_v54, 1e-05 }
 0x15d   : > { %v594_v63 = vmul.f32 %v563_v55, %v4471_v3  ;;  %778 = vst.msk [vmem:[#allocation3 + $0x28] sm:$0xff] %vm772_vm0, %v761_v16  ;;  %812 = vst.msk [vmem:[#allocation4 + $0x28] sm:$0xff] %vm772_vm0, %v796_v58 }
 0x15e   : > { %779 = vst.msk [vmem:[#allocation3 + $0x30] sm:$0xff] %vm772_vm0, %v762_v59  ;;  %v3937_v21 = vpop.eup %3936  ;;  %813 = vst.msk [vmem:[#allocation4 + $0x30] sm:$0xff] %vm772_vm0, %v797_v17  ;;  %3948 = vrcp.f32 %v553_v20  ;;  %v745_v24 = vmul.f32 0.007874016, %v553_v20  ;;  %v746_v25 = vmul.f32 0.007874016, %v554_v62  ;;  %v4599_v19 = vpop.xlane.xlu1 %532 }
 0x15f   : > { %v3939_v10 = vpop.eup %3938  ;;  %v3478_v28 = vand.u32 2147483647, %v594_v63  ;;  %v3480_v29 = vcvt.f32.s32 %v594_v63  ;;  %v3483_v15 = vand.u32 2147483648, %v594_v63  ;;  %v565_v18 = vmul.f32 127.0, %v3937_v21  ;;  %v4601_v3 = vpop.xlane.xlu0 %534 }
 0x160   : > { %v567_v22 = vmul.f32 127.0, %v3939_v10  ;;  %v763_v23 = vmul.f32 %v4566_v11, %v745_v24  ;;  %v798_v26 = vmul.f32 %v4568_v14, %v745_v24  ;;  %3950 = vrcp.f32 %v554_v62 }
 0x161   : > { %vm4605_vm1 = vcmp.lt.f32.partialorder %v3478_v28, 8388608.0  ;;  %v3481_v30 = vcvt.s32.f32 %v3480_v29  ;;  %v595_v31 = vmul.f32 %v565_v18, %v4479_v0  ;;  %v764_v32 = vmul.f32 %v4566_v11, %v746_v25 }
 0x162   : > { %v596_v33 = vmul.f32 %v567_v22, %v4474_v7  ;;  %780 = vst.msk [vmem:[#allocation3 + $0x38] sm:$0xff] %vm772_vm0, %v763_v23  ;;  %814 = vst.msk [vmem:[#allocation4 + $0x38] sm:$0xff] %vm772_vm0, %v798_v26  ;;  %v799_v34 = vmul.f32 %v4568_v14, %v746_v25  ;;  %v555_v35 = vmax.f32 %v4599_v19, 1e-05  ;;  %v556_v36 = vmax.f32 %v4601_v3, 1e-05 }
 0x163   : > { %v3941_v2 = vpop.eup %3940  ;;  %v3482_v38 = vand.u32 2147483647, %v3481_v30  ;;  %v3486_v5 = vand.u32 2147483647, %v595_v31  ;;  %v3488_v40 = vcvt.f32.s32 %v595_v31  ;;  %v3491_v41 = vand.u32 2147483648, %v595_v31  ;;  %781 = vst.msk [vmem:[#allocation3 + $0x40] sm:$0xff] %vm772_vm0, %v764_v32 }
 0x164   : > { %v3943_v0 = vpop.eup %3942  ;;  %v3494_v42 = vand.u32 2147483647, %v596_v33  ;;  %v3496_v7 = vcvt.f32.s32 %v596_v33  ;;  %v3499_v43 = vand.u32 2147483648, %v596_v33  ;;  %v569_v44 = vmul.f32 127.0, %v3941_v2  ;;  %815 = vst.msk [vmem:[#allocation4 + $0x40] sm:$0xff] %vm772_vm0, %v799_v34 }
 0x165   : > { %v3484_v45 = vor.u32 %v3483_v15, %v3482_v38  ;;  %vm4619_vm2 = vcmp.lt.f32.partialorder %v3486_v5, 8388608.0  ;;  %v3489_v8 = vcvt.s32.f32 %v3488_v40  ;;  %v571_v48 = vmul.f32 127.0, %v3943_v0 }
 0x166   : > { %v3945_v49 = vpop.eup %3944  ;;  %vm4623_vm3 = vcmp.lt.f32.partialorder %v3494_v42, 8388608.0  ;;  %v3497_v51 = vcvt.s32.f32 %v3496_v7  ;;  %v597_v12 = vmul.f32 %v569_v44, %v4482_v1  ;;  %3952 = vrcp.f32 %v555_v35 }
 0x167   : > { %v3485_v13 = vsel %vm4605_vm1, %v3484_v45, %v594_v63  ;;  %v3490_v54 = vand.u32 2147483647, %v3489_v8  ;;  %v598_v55 = vmul.f32 %v571_v48, %v4487_v37  ;;  %v573_v16 = vmul.f32 127.0, %v3945_v49  ;;  %v3947_v10 = vpop.eup %3946 }
 0x168   : > { %v626_v58 = vmax.f32 %v3485_v13, -128.0  ;;  %v3498_v59 = vand.u32 2147483647, %v3497_v51  ;;  %v3502_v17 = vand.u32 2147483647, %v597_v12  ;;  %v3504_v20 = vcvt.f32.s32 %v597_v12 }
 0x169   : > { %v3492_v62 = vor.u32 %v3491_v41, %v3490_v54  ;;  %v3507_v21 = vand.u32 2147483648, %v597_v12  ;;  %v3510_v24 = vand.u32 2147483647, %v598_v55  ;;  %v3512_v25 = vcvt.f32.s32 %v598_v55 }
 0x16a   : > { %v642_v1 = vmin.f32 %v626_v58, 127.0  ;;  %v3500_v28 = vor.u32 %v3499_v43, %v3498_v59  ;;  %vm4633_vm4 = vcmp.lt.f32.partialorder %v3502_v17, 8388608.0  ;;  %v3505_v63 = vcvt.s32.f32 %v3504_v20 }
 0x16b   : > { %v3949_v15 = vpop.eup %3948  ;;  %v3493_v37 = vsel %vm4619_vm2, %v3492_v62, %v595_v31  ;;  %vm4639_vm5 = vcmp.lt.f32.partialorder %v3510_v24, 8388608.0  ;;  %v3513_v22 = vcvt.s32.f32 %v3512_v25  ;;  %v3515_v23 = vand.u32 2147483648, %v598_v55 }
 0x16c   : > { %v627_v26 = vmax.f32 %v3493_v37, -128.0  ;;  %v3501_v27 = vsel %vm4623_vm3, %v3500_v28, %v596_v33  ;;  %v3506_v30 = vand.u32 2147483647, %v3505_v63  ;;  %v599_v32 = vmul.f32 %v573_v16, %v4490_v39  ;;  %v537_v37 = vpop.xlane.xlu1 %536 }
 0x16d   : > { %v3951_v34 = vpop.eup %3950  ;;  %v628_v2 = vmax.f32 %v3501_v27, -128.0  ;;  %v3514_v38 = vand.u32 2147483647, %v3513_v22  ;;  %v575_v5 = vmul.f32 127.0, %v3947_v10  ;;  %v577_v40 = vmul.f32 127.0, %v3949_v15 }
 0x16e   : > { %v643_v41 = vmin.f32 %v627_v26, 127.0  ;;  %v3508_v31 = vor.u32 %v3507_v21, %v3506_v30  ;;  %v3518_v0 = vand.u32 2147483647, %v599_v32  ;;  %v3520_v42 = vcvt.f32.s32 %v599_v32 }
 0x16f   : > { %v644_v7 = vmin.f32 %v628_v2, 127.0  ;;  %v3516_v43 = vor.u32 %v3515_v23, %v3514_v38  ;;  %v3523_v44 = vand.u32 2147483648, %v599_v32  ;;  %v600_v45 = vmul.f32 %v575_v5, %v4495_v47 }
 0x170   : > { %v3354_v46 = vpack.c.bf16 %v643_v41, %v642_v1  ;;  %v3509_v33 = vsel %vm4633_vm4, %v3508_v31, %v597_v12  ;;  %vm4649_vm6 = vcmp.lt.f32.partialorder %v3518_v0, 8388608.0  ;;  %v3521_v8 = vcvt.s32.f32 %v3520_v42 }
 0x171   : > { %v629_v48 = vmax.f32 %v3509_v33, -128.0  ;;  %v3517_v49 = vsel %vm4639_vm5, %v3516_v43, %v598_v55  ;;  %v3526_v50 = vand.u32 2147483647, %v600_v45  ;;  %v3528_v51 = vcvt.f32.s32 %v600_v45  ;;  %v541_v33 = vpop.xlane.xlu1 %540 }
 0x172   : > { %3355 = vst [vmem:[#allocation2] sm:$0xff] %v3354_v46   ;;  %v630_v13 = vmax.f32 %v3517_v49, -128.0  ;;  %v3522_v54 = vand.u32 2147483647, %v3521_v8  ;;  %v3531_v16 = vand.u32 2147483648, %v600_v45  ;;  %v601_v47 = vmul.f32 %v577_v40, %v4498_v9  ;;  %v539_v46 = vpop.xlane.xlu0 %538 }
 0x173   : > { %v3953_v58 = vpop.eup %3952  ;;  %v645_v59 = vmin.f32 %v629_v48, 127.0  ;;  %vm4656_vm7 = vcmp.lt.f32.partialorder %v3526_v50, 8388608.0  ;;  %v3529_v17 = vcvt.s32.f32 %v3528_v51  ;;  %v579_v20 = vmul.f32 127.0, %v3951_v34 }
 0x174   : > { %v646_v62 = vmin.f32 %v630_v13, 127.0  ;;  %v3524_v21 = vor.u32 %v3523_v44, %v3522_v54  ;;  %v3534_v24 = vand.u32 2147483647, %v601_v47  ;;  %v3536_v55 = vcvt.f32.s32 %v601_v47 }
 0x175   : > { %v3359_v25 = vpack.c.bf16 %v645_v59, %v644_v7  ;;  %v3530_v10 = vand.u32 2147483647, %v3529_v17  ;;  %v3539_v1 = vand.u32 2147483648, %v601_v47  ;;  %v602_v28 = vmul.f32 %v579_v20, %v4503_v52 }
 0x176   : > { %v3525_v9 = vsel %vm4649_vm6, %v3524_v21, %v599_v32  ;;  %vm4663_vm8 = vcmp.lt.f32.partialorder %v3534_v24, 8388608.0  ;;  %v3537_v63 = vcvt.s32.f32 %v3536_v55  ;;  %v581_v15 = vmul.f32 127.0, %v3953_v58  ;;  %v543_v24 = vpop.xlane.xlu0 %542  ;;  %v545_v55 = vpop.xlane.xlu1 %544 }
 0x177   : > { %3391 = vst [vmem:[#allocation2 + $0x8] sm:$0xff] %v3359_v25   ;;  %v631_v18 = vmax.f32 %v3525_v9, -128.0  ;;  %v3532_v22 = vor.u32 %v3531_v16, %v3530_v10  ;;  %v3542_v23 = vand.u32 2147483647, %v602_v28  ;;  %v3544_v26 = vcvt.f32.s32 %v602_v28 }
 0x178   : > { %v3538_v27 = vand.u32 2147483647, %v3537_v63  ;;  %v3547_v30 = vand.u32 2147483648, %v602_v28  ;;  %v603_v34 = vmul.f32 %v581_v15, %v4506_v53  ;;  %v747_v52 = vmul.f32 0.007874016, %v555_v35 }
 0x179   : > { %v647_v32 = vmin.f32 %v631_v18, 127.0  ;;  %v3533_v2 = vsel %vm4656_vm7, %v3532_v22, %v600_v45  ;;  %vm4672_vm9 = vcmp.lt.f32.partialorder %v3542_v23, 8388608.0  ;;  %v3545_v5 = vcvt.s32.f32 %v3544_v26 }
 0x17a   : > { %v632_v40 = vmax.f32 %v3533_v2, -128.0  ;;  %v3540_v41 = vor.u32 %v3539_v1, %v3538_v27  ;;  %v3550_v31 = vand.u32 2147483647, %v603_v34  ;;  %v3552_v0 = vcvt.f32.s32 %v603_v34 }
 0x17b   : > { %v3364_v42 = vpack.c.bf16 %v647_v32, %v646_v62  ;;  %v3546_v7 = vand.u32 2147483647, %v3545_v5  ;;  %v3555_v43 = vand.u32 2147483648, %v603_v34  ;;  %v765_v53 = vmul.f32 %v4566_v11, %v747_v52 }
 0x17c   : > { %v648_v19 = vmin.f32 %v632_v40, 127.0  ;;  %v3541_v35 = vsel %vm4663_vm8, %v3540_v41, %v601_v47  ;;  %vm4679_vm10 = vcmp.lt.f32.partialorder %v3550_v31, 8388608.0  ;;  %v3553_v45 = vcvt.s32.f32 %v3552_v0 }
 0x17d   : > { %3392 = vst [vmem:[#allocation2 + $0x10] sm:$0xff] %v3364_v42   ;;  %v633_v39 = vmax.f32 %v3541_v35, -128.0  ;;  %v3548_v8 = vor.u32 %v3547_v30, %v3546_v7  ;;  %782 = vst.msk [vmem:[#allocation3 + $0x48] sm:$0xff] %vm772_vm0, %v765_v53  ;;  %v800_v48 = vmul.f32 %v4568_v14, %v747_v52  ;;  %3954 = vrcp.f32 %v556_v36 }
 0x17e   : > { %v3554_v49 = vand.u32 2147483647, %v3553_v45  ;;  %v748_v50 = vmul.f32 0.007874016, %v556_v36  ;;  %v557_v51 = vmax.f32 %v537_v37, 1e-05 }
 0x17f   : > { %v649_v13 = vmin.f32 %v633_v39, 127.0  ;;  %v3549_v54 = vsel %vm4672_vm9, %v3548_v8, %v602_v28  ;;  %816 = vst.msk [vmem:[#allocation4 + $0x48] sm:$0xff] %vm772_vm0, %v800_v48  ;;  %v558_v16 = vmax.f32 %v539_v46, 1e-05  ;;  %v559_v47 = vmax.f32 %v541_v33, 1e-05 }
 0x180   : > { %v634_v58 = vmax.f32 %v3549_v54, -128.0  ;;  %v3556_v59 = vor.u32 %v3555_v43, %v3554_v49  ;;  %v766_v12 = vmul.f32 %v4566_v11, %v748_v50  ;;  %v801_v17 = vmul.f32 %v4568_v14, %v748_v50 }
 0x181   : > { %v3369_v20 = vpack.c.bf16 %v649_v13, %v648_v19  ;;  %3956 = vrcp.f32 %v557_v51  ;;  %v749_v62 = vmul.f32 0.007874016, %v557_v51  ;;  %v750_v3 = vmul.f32 0.007874016, %v558_v16 }
 0x182   : > { %v3557_v36 = vsel %vm4679_vm10, %v3556_v59, %v603_v34  ;;  %783 = vst.msk [vmem:[#allocation3 + $0x50] sm:$0xff] %vm772_vm0, %v766_v12  ;;  %817 = vst.msk [vmem:[#allocation4 + $0x50] sm:$0xff] %vm772_vm0, %v801_v17  ;;  %3958 = vrcp.f32 %v558_v16  ;;  %v751_v21 = vmul.f32 0.007874016, %v559_v47  ;;  %v650_v15 = vmin.f32 %v634_v58, 127.0 }
 0x183   : > { %3393 = vst [vmem:[#allocation2 + $0x18] sm:$0xff] %v3369_v20   ;;  %v635_v25 = vmax.f32 %v3557_v36, -128.0  ;;  %v767_v10 = vmul.f32 %v4566_v11, %v749_v62  ;;  %v802_v1 = vmul.f32 %v4568_v14, %v749_v62  ;;  %v768_v28 = vmul.f32 %v4566_v11, %v750_v3 }
 0x184   : > { %v803_v9 = vmul.f32 %v4568_v14, %v750_v3  ;;  %3960 = vrcp.f32 %v559_v47  ;;  %v769_v29 = vmul.f32 %v4566_v11, %v751_v21  ;;  %v804_v63 = vmul.f32 %v4568_v14, %v751_v21 }
 0x185   : > { %v651_v37 = vmin.f32 %v635_v25, 127.0  ;;  %784 = vst.msk [vmem:[#allocation3 + $0x58] sm:$0xff] %vm772_vm0, %v767_v10  ;;  %818 = vst.msk [vmem:[#allocation4 + $0x58] sm:$0xff] %vm772_vm0, %v802_v1  ;;  %v560_v18 = vmax.f32 %v543_v24, 1e-05 }
 0x186   : > { %785 = vst.msk [vmem:[#allocation3 + $0x60] sm:$0xff] %vm772_vm0, %v768_v28  ;;  %v561_v22 = vmax.f32 %v545_v55, 1e-05  ;;  %819 = vst.msk [vmem:[#allocation4 + $0x60] sm:$0xff] %vm772_vm0, %v803_v9 }
 0x187   : > { %786 = vst.msk [vmem:[#allocation3 + $0x68] sm:$0xff] %vm772_vm0, %v769_v29  ;;  %820 = vst.msk [vmem:[#allocation4 + $0x68] sm:$0xff] %vm772_vm0, %v804_v63  ;;  %v3374_v23 = vpack.c.bf16 %v651_v37, %v650_v15  ;;  %3962 = vrcp.f32 %v560_v18  ;;  %v752_v26 = vmul.f32 0.007874016, %v560_v18 }
 0x188   : > { %v753_v27 = vmul.f32 0.007874016, %v561_v22  ;;  %3964 = vrcp.f32 %v561_v22 }
 0x189   : > { %3394 = vst [vmem:[#allocation2 + $0x20] sm:$0xff] %v3374_v23   ;;  %v770_v30 = vmul.f32 %v4566_v11, %v752_v26  ;;  %v805_v34 = vmul.f32 %v4568_v14, %v752_v26 }
 0x18a   : > { %v771_v52 = vmul.f32 %v4566_v11, %v753_v27  ;;  %v806_v32 = vmul.f32 %v4568_v14, %v753_v27  ;;  %v3955_v2 = vpop.eup %3954 }
 0x18b   : > { %v583_v38 = vmul.f32 127.0, %v3955_v2  ;;  %787 = vst.msk [vmem:[#allocation3 + $0x70] sm:$0xff] %vm772_vm0, %v770_v30  ;;  %821 = vst.msk [vmem:[#allocation4 + $0x70] sm:$0xff] %vm772_vm0, %v805_v34 }
 0x18c   : > { %788 = vst.msk [vmem:[#allocation3 + $0x78] sm:$0xff] %vm772_vm0, %v771_v52  ;;  %822 = vst.msk [vmem:[#allocation4 + $0x78] sm:$0xff] %vm772_vm0, %v806_v32 }
 0x18d   : > { %v604_v5 = vmul.f32 %v583_v38, %v4511_v56 }
 0x18e   : > { %v3957_v40 = vpop.eup %3956 }
 0x18f   : > { %v3959_v41 = vpop.eup %3958  ;;  %v3560_v31 = vcvt.f32.s32 %v604_v5  ;;  %v585_v0 = vmul.f32 127.0, %v3957_v40  ;;  %v3558_v11 = vand.u32 2147483647, %v604_v5  ;;  %v3563_v44 = vand.u32 2147483648, %v604_v5 }
 0x190   : > { %v587_v42 = vmul.f32 127.0, %v3959_v41 }
 0x191   : > { %v3961_v14 = vpop.eup %3960  ;;  %v3561_v7 = vcvt.s32.f32 %v3560_v31  ;;  %v605_v43 = vmul.f32 %v585_v0, %v4514_v57  ;;  %vm4721_vm11 = vcmp.lt.f32.partialorder %v3558_v11, 8388608.0 }
 0x192   : > { %v606_v53 = vmul.f32 %v587_v42, %v4519_v60  ;;  %v589_v19 = vmul.f32 127.0, %v3961_v14 }
 0x193   : > { %v3562_v35 = vand.u32 2147483647, %v3561_v7  ;;  %v3568_v45 = vcvt.f32.s32 %v605_v43  ;;  %v3566_v48 = vand.u32 2147483647, %v605_v43  ;;  %v3571_v51 = vand.u32 2147483648, %v605_v43 }
 0x194   : > { %v3963_v46 = vpop.eup %3962  ;;  %v3576_v56 = vcvt.f32.s32 %v606_v53  ;;  %v607_v39 = vmul.f32 %v589_v19, %v4522_v61  ;;  %v3574_v57 = vand.u32 2147483647, %v606_v53  ;;  %v3579_v17 = vand.u32 2147483648, %v606_v53 }
 0x195   : > { %v3564_v8 = vor.u32 %v3563_v44, %v3562_v35  ;;  %v3569_v49 = vcvt.s32.f32 %v3568_v45  ;;  %v591_v50 = vmul.f32 127.0, %v3963_v46  ;;  %v3965_v54 = vpop.eup %3964  ;;  %vm3567_vm12 = vcmp.lt.f32.partialorder %v3566_v48, 8388608.0 }
 0x196   : > { %v3577_v13 = vcvt.s32.f32 %v3576_v56  ;;  %v3584_v60 = vcvt.f32.s32 %v607_v39  ;;  %v3582_v58 = vand.u32 2147483647, %v607_v39  ;;  %v3587_v62 = vand.u32 2147483648, %v607_v39 }
 0x197   : > { %v3565_v16 = vsel %vm4721_vm11, %v3564_v8, %v604_v5  ;;  %v3570_v47 = vand.u32 2147483647, %v3569_v49  ;;  %v608_v59 = vmul.f32 %v591_v50, %v4527_v4  ;;  %v593_v55 = vmul.f32 127.0, %v3965_v54 }
 0x198   : > { %v3578_v12 = vand.u32 2147483647, %v3577_v13  ;;  %v3585_v20 = vcvt.s32.f32 %v3584_v60  ;;  %v636_v36 = vmax.f32 %v3565_v16, -128.0  ;;  %vm3575_vm13 = vcmp.lt.f32.partialorder %v3574_v57, 8388608.0 }
 0x199   : > { %v3572_v61 = vor.u32 %v3571_v51, %v3570_v47  ;;  %v3592_v3 = vcvt.f32.s32 %v608_v59  ;;  %vm3583_vm14 = vcmp.lt.f32.partialorder %v3582_v58, 8388608.0  ;;  %v609_v4 = vmul.f32 %v593_v55, %v4530_v6 }
 0x19a   : > { %v3580_v21 = vor.u32 %v3579_v17, %v3578_v12  ;;  %v3586_v24 = vand.u32 2147483647, %v3585_v20  ;;  %v3590_v63 = vand.u32 2147483647, %v608_v59  ;;  %v3595_v37 = vand.u32 2147483648, %v608_v59 }
 0x19b   : > { %v3573_v25 = vsel %vm3567_vm12, %v3572_v61, %v605_v43  ;;  %v3593_v10 = vcvt.s32.f32 %v3592_v3  ;;  %v652_v18 = vmin.f32 %v636_v36, 127.0  ;;  %v3600_v26 = vcvt.f32.s32 %v609_v4 }
 0x19c   : > { %v637_v1 = vmax.f32 %v3573_v25, -128.0  ;;  %v3581_v28 = vsel %vm3575_vm13, %v3580_v21, %v606_v53  ;;  %v3588_v9 = vor.u32 %v3587_v62, %v3586_v24  ;;  %vm3591_vm15 = vcmp.lt.f32.partialorder %v3590_v63, 8388608.0 }
 0x19d   : > { %v638_v29 = vmax.f32 %v3581_v28, -128.0  ;;  %v3594_v15 = vand.u32 2147483647, %v3593_v10  ;;  %v3601_v52 = vcvt.s32.f32 %v3600_v26  ;;  %v3598_v38 = vand.u32 2147483647, %v609_v4 }
 0x19e   : > { %v653_v22 = vmin.f32 %v637_v1, 127.0  ;;  %v3589_v23 = vsel %vm3583_vm14, %v3588_v9, %v607_v39  ;;  %v3603_v6 = vand.u32 2147483648, %v609_v4 }
 0x19f   : > { %v639_v27 = vmax.f32 %v3589_v23, -128.0  ;;  %v3596_v30 = vor.u32 %v3595_v37, %v3594_v15  ;;  %v654_v32 = vmin.f32 %v638_v29, 127.0  ;;  %v3602_v40 = vand.u32 2147483647, %v3601_v52 }
 0x1a0   : > { %v3379_v34 = vpack.c.bf16 %v653_v22, %v652_v18  ;;  %vm3599_vm0 = vcmp.lt.f32.partialorder %v3598_v38, 8388608.0 }
 0x1a1   : > { %v655_v2 = vmin.f32 %v639_v27, 127.0  ;;  %v3597_v5 = vsel %vm3591_vm15, %v3596_v30, %v608_v59  ;;  %v3604_v31 = vor.u32 %v3603_v6, %v3602_v40 }
 0x1a2   : > { %3395 = vst [vmem:[#allocation2 + $0x28] sm:$0xff] %v3379_v34   ;;  %v640_v0 = vmax.f32 %v3597_v5, -128.0 }
 0x1a3   : > { %v3384_v41 = vpack.c.bf16 %v655_v2, %v654_v32  ;;  %v3605_v11 = vsel %vm3599_vm0, %v3604_v31, %v609_v4 }
 0x1a4   : > { %v641_v42 = vmax.f32 %v3605_v11, -128.0  ;;  %v656_v14 = vmin.f32 %v640_v0, 127.0 }
 0x1a5   : > { %3396 = vst [vmem:[#allocation2 + $0x30] sm:$0xff] %v3384_v41  }
 0x1a6   : > { %v657_v7 = vmin.f32 %v641_v42, 127.0 }
 0x1a8   : > { %v3389_v43 = vpack.c.bf16 %v657_v7, %v656_v14 }
 0x1aa   : > { %3397 = vst [vmem:[#allocation2 + $0x38] sm:$0xff] %v3389_v43  }
 0x1ab PF: > { %p3237_p2 = scmp.ne.s32.totalorder %s4269_s18, 0 }
 0x1ad   : > { %857 = sbr.rel (%p3237_p2) target bundleno = 926 (0x39e), region = 52 }
 0x1b2   : > { %v3968_v53 = vld [vmem:[%s5964_s2 + $0x74] ss:$8 sps:$4 sm:$0xff]   ;;  %v4281_v35 = vmov 0   ;;  %v3972_v44 = vld [vmem:[%s5964_s2 + $0x70] ss:$8 sps:$4 sm:$0xff]   ;;  %v1131_v36 = vld [vmem:[#allocation3] sm:$0xff] }
 0x1b3   : > { %v3970_v19 = vld [vmem:[%s5965_s3 + $0x74] ss:$8 sps:$4 sm:$0xff]   ;;  %1050 = vmatprep.mubr.bf16.mxu0 %v4281_v35  ;;  %1387 = vmatprep.mubr.bf16.mxu1 %v4281_v35  ;;  %v3973_v45 = vld [vmem:[%s5965_s3 + $0x70] ss:$8 sps:$4 sm:$0xff]   ;;  %v3974_v46 = vld [vmem:[%s5964_s2 + $0x64] ss:$8 sps:$4 sm:$0xff]  }
 0x1b4   : > { %1018 = vmatprep.subr.bf16.mxu0 %v3968_v53  ;;  %3966 = vset.pattern.permute.xlu0 %v4281_v35  ;;  %v3976_v33 = vld [vmem:[%s5965_s3 + $0x64] ss:$8 sps:$4 sm:$0xff]   ;;  %v3978_v56 = vld [vmem:[%s5964_s2 + $0x60] ss:$8 sps:$4 sm:$0xff]   ;;  %v3980_v8 = vld [vmem:[%s5964_s2 + $0x54] ss:$8 sps:$4 sm:$0xff]  }
 0x1b5   : > { %1355 = vmatprep.subr.bf16.mxu1 %v3970_v19  ;;  %3967 = vset.pattern.permute.xlu1 %v4281_v35  ;;  %v3979_v39 = vld [vmem:[%s5965_s3 + $0x60] ss:$8 sps:$4 sm:$0xff]   ;;  %v3982_v48 = vld [vmem:[%s5965_s3 + $0x54] ss:$8 sps:$4 sm:$0xff]   ;;  %v3984_v49 = vld [vmem:[%s5964_s2 + $0x50] ss:$8 sps:$4 sm:$0xff]  }
 0x1b6   : > { %1019 = vmatpush1.bf16.msra.mxu0 %v3972_v44  ;;  %1356 = vmatpush1.bf16.msra.mxu1 %v3973_v45  ;;  %v3985_v50 = vld [vmem:[%s5965_s3 + $0x50] ss:$8 sps:$4 sm:$0xff]   ;;  %v3986_v51 = vld [vmem:[%s5964_s2 + $0x44] ss:$8 sps:$4 sm:$0xff]   ;;  %v3990_v13 = vld [vmem:[%s5964_s2 + $0x40] ss:$8 sps:$4 sm:$0xff]  }
 0x1b7   : > { %1020 = vmatprep.subr.bf16.mxu0 %v3974_v46  ;;  %1357 = vmatprep.subr.bf16.mxu1 %v3976_v33  ;;  %v3988_v57 = vld [vmem:[%s5965_s3 + $0x44] ss:$8 sps:$4 sm:$0xff]   ;;  %v3991_v60 = vld [vmem:[%s5965_s3 + $0x40] ss:$8 sps:$4 sm:$0xff]   ;;  %v3992_v54 = vld [vmem:[%s5964_s2 + $0x34] ss:$8 sps:$4 sm:$0xff]  }
 0x1b8   : > { %v3994_v16 = vld [vmem:[%s5965_s3 + $0x34] ss:$8 sps:$4 sm:$0xff]   ;;  %v3996_v47 = vld [vmem:[%s5964_s2 + $0x30] ss:$8 sps:$4 sm:$0xff]   ;;  %v3998_v59 = vld [vmem:[%s5964_s2 + $0x24] ss:$8 sps:$4 sm:$0xff]   ;;  %1149 = vperm.xlu0 %3966, %v1131_v36  }
 0x1b9   : > { %v3997_v58 = vld [vmem:[%s5965_s3 + $0x30] ss:$8 sps:$4 sm:$0xff]   ;;  %v4000_v12 = vld [vmem:[%s5965_s3 + $0x24] ss:$8 sps:$4 sm:$0xff]   ;;  %v4002_v17 = vld [vmem:[%s5964_s2 + $0x20] ss:$8 sps:$4 sm:$0xff]  }
 0x1ba   : > { %1021 = vmatpush1.bf16.msra.mxu0 %v3978_v56  ;;  %1358 = vmatpush1.bf16.msra.mxu1 %v3979_v39  ;;  %v4003_v20 = vld [vmem:[%s5965_s3 + $0x20] ss:$8 sps:$4 sm:$0xff]   ;;  %v4004_v61 = vld [vmem:[%s5964_s2 + $0x14] ss:$8 sps:$4 sm:$0xff]   ;;  %v4008_v3 = vld [vmem:[%s5964_s2 + $0x10] ss:$8 sps:$4 sm:$0xff]  }
 0x1bb   : > { %1022 = vmatprep.subr.bf16.mxu0 %v3980_v8  ;;  %1359 = vmatprep.subr.bf16.mxu1 %v3982_v48  ;;  %v4006_v62 = vld [vmem:[%s5965_s3 + $0x14] ss:$8 sps:$4 sm:$0xff]   ;;  %v4009_v21 = vld [vmem:[%s5965_s3 + $0x10] ss:$8 sps:$4 sm:$0xff]   ;;  %v4010_v24 = vld [vmem:[%s5964_s2 + $0x4] ss:$8 sps:$4 sm:$0xff]  }
 0x1bc   : > { %v4012_v55 = vld [vmem:[%s5965_s3 + $0x4] ss:$8 sps:$4 sm:$0xff]   ;;  %v1133_v25 = vld [vmem:[#allocation3 + $0x10] sm:$0xff]  ;;  %v1134_v1 = vld [vmem:[#allocation3 + $0x18] sm:$0xff]  ;;  %vm1999_vm1 = vcmask 7168  }
 0x1bd   : > { %1159 = vperm.xlu1 %3967, %v1133_v25   ;;  %v1132_v10 = vld [vmem:[#allocation3 + $0x8] sm:$0xff]  ;;  %v4016_v4 = vld [vmem:[#allocation2] sm:$0xff]   ;;  %v1137_v15 = vld [vmem:[#allocation3 + $0x30] sm:$0xff] }
 0x1be   : > { %1023 = vmatpush1.bf16.msra.mxu0 %v3984_v49  ;;  %1360 = vmatpush1.bf16.msra.mxu1 %v3985_v50  ;;  %v4014_v28 = vld [vmem:[%s5964_s2] ss:$8 sps:$4 sm:$0xff]   ;;  %v1138_v37 = vld [vmem:[#allocation3 + $0x38] sm:$0xff]  ;;  %v1141_v26 = vld [vmem:[#allocation3 + $0x50] sm:$0xff] }
 0x1bf   : > { %1024 = vmatprep.subr.bf16.mxu0 %v3986_v51  ;;  %1361 = vmatprep.subr.bf16.mxu1 %v3988_v57  ;;  %v4015_v9 = vld [vmem:[%s5965_s3] ss:$8 sps:$4 sm:$0xff]   ;;  %v1142_v27 = vld [vmem:[#allocation3 + $0x58] sm:$0xff]  ;;  %v4018_v30 = vld [vmem:[#allocation2 + $0x10] sm:$0xff]  }
 0x1c0   : > { %1154 = vperm.xlu0 %3966, %v1132_v10   ;;  %v1135_v29 = vld [vmem:[#allocation3 + $0x20] sm:$0xff]  ;;  %v1136_v63 = vld [vmem:[#allocation3 + $0x28] sm:$0xff]  ;;  %v1145_v32 = vld [vmem:[#allocation3 + $0x70] sm:$0xff] }
 0x1c1   : > { %1164 = vperm.xlu1 %3967, %v1134_v1   ;;  %v4017_v18 = vld [vmem:[#allocation2 + $0x8] sm:$0xff]   ;;  %v1139_v22 = vld [vmem:[#allocation3 + $0x40] sm:$0xff]  ;;  %v1146_v2 = vld [vmem:[#allocation3 + $0x78] sm:$0xff] }
 0x1c2   : > { %1025 = vmatpush1.bf16.msra.mxu0 %v3990_v13  ;;  %1362 = vmatpush1.bf16.msra.mxu1 %v3991_v60  ;;  %v1140_v23 = vld [vmem:[#allocation3 + $0x48] sm:$0xff]  ;;  %v1143_v34 = vld [vmem:[#allocation3 + $0x60] sm:$0xff]  ;;  %v4019_v38 = vld [vmem:[#allocation2 + $0x18] sm:$0xff]  }
 0x1c3   : > { %1026 = vmatprep.subr.bf16.mxu0 %v3992_v54  ;;  %1363 = vmatprep.subr.bf16.mxu1 %v3994_v16  ;;  %v1144_v52 = vld [vmem:[#allocation3 + $0x68] sm:$0xff]  ;;  %v1468_v5 = vld [vmem:[#allocation4] sm:$0xff]  ;;  %v1470_v6 = vld [vmem:[#allocation4 + $0x10] sm:$0xff] }
 0x1c4   : > { %1169 = vperm.xlu0 %3966, %v1135_v29   ;;  %v1469_v40 = vld [vmem:[#allocation4 + $0x8] sm:$0xff]  ;;  %v1471_v41 = vld [vmem:[#allocation4 + $0x18] sm:$0xff]  ;;  %v4020_v31 = vld [vmem:[#allocation2 + $0x20] sm:$0xff]  }
 0x1c5   : > { %1174 = vperm.xlu1 %3967, %v1136_v63   ;;  %v1472_v0 = vld [vmem:[#allocation4 + $0x20] sm:$0xff]  ;;  %v1473_v11 = vld [vmem:[#allocation4 + $0x28] sm:$0xff]  ;;  %v1474_v42 = vld [vmem:[#allocation4 + $0x30] sm:$0xff] }
 0x1c6   : > { %1027 = vmatpush1.bf16.msra.mxu0 %v3996_v47  ;;  %1364 = vmatpush1.bf16.msra.mxu1 %v3997_v58  ;;  %v1475_v14 = vld [vmem:[#allocation4 + $0x38] sm:$0xff]  ;;  %v4021_v7 = vld [vmem:[#allocation2 + $0x28] sm:$0xff]   ;;  %v1476_v43 = vld [vmem:[#allocation4 + $0x40] sm:$0xff] }
 0x1c7   : > { %1028 = vmatprep.subr.bf16.mxu0 %v3998_v59  ;;  %1365 = vmatprep.subr.bf16.mxu1 %v4000_v12  ;;  %v1477_v53 = vld [vmem:[#allocation4 + $0x48] sm:$0xff]  ;;  %v1478_v19 = vld [vmem:[#allocation4 + $0x50] sm:$0xff]  ;;  %v1479_v44 = vld [vmem:[#allocation4 + $0x58] sm:$0xff] }
 0x1c8   : > { %1179 = vperm.xlu0 %3966, %v1137_v15   ;;  %v4022_v45 = vld [vmem:[#allocation2 + $0x30] sm:$0xff]   ;;  %v1480_v46 = vld [vmem:[#allocation4 + $0x60] sm:$0xff]  ;;  %v1481_v33 = vld [vmem:[#allocation4 + $0x68] sm:$0xff] }
 0x1c9   : > { %1184 = vperm.xlu1 %3967, %v1138_v37   ;;  %v1482_v56 = vld [vmem:[#allocation4 + $0x70] sm:$0xff]  ;;  %v1483_v39 = vld [vmem:[#allocation4 + $0x78] sm:$0xff] }
 0x1ca   : > { %1029 = vmatpush1.bf16.msra.mxu0 %v4002_v17  ;;  %1366 = vmatpush1.bf16.msra.mxu1 %v4003_v20  ;;  %v4023_v8 = vld [vmem:[#allocation2 + $0x38] sm:$0xff]  }
 0x1cb   : > { %1030 = vmatprep.subr.bf16.mxu0 %v4004_v61  ;;  %1367 = vmatprep.subr.bf16.mxu1 %v4006_v62 }
 0x1cc   : > { %1189 = vperm.xlu0 %3966, %v1139_v22  }
 0x1cd   : > { %1194 = vperm.xlu1 %3967, %v1140_v23  }
 0x1ce   : > { %1031 = vmatpush1.bf16.msra.mxu0 %v4008_v3  ;;  %1368 = vmatpush1.bf16.msra.mxu1 %v4009_v21 }
 0x1cf   : > { %1032 = vmatprep.subr.bf16.mxu0 %v4010_v24  ;;  %1369 = vmatprep.subr.bf16.mxu1 %v4012_v55 }
 0x1d0   : > { %1199 = vperm.xlu0 %3966, %v1141_v26  }
 0x1d1   : > { %1204 = vperm.xlu1 %3967, %v1142_v27  }
 0x1d2   : > { %1033 = vmatpush1.bf16.msra.mxu0 %v4014_v28  ;;  %1370 = vmatpush1.bf16.msra.mxu1 %v4015_v9 }
 0x1d4   : > { %1209 = vperm.xlu0 %3966, %v1143_v34  }
 0x1d5   : > { %1051 = vmatmul.mubr.bf16.vlgmr.msra.gmra.mxu0 %v4016_v4  ;;  %1388 = vmatmul.mubr.bf16.vlgmr.msra.gmra.mxu1 %v4016_v4 }
 0x1d6   : > { %1060 = vmatprep.mubr.bf16.mxu0 %v4281_v35  ;;  %1397 = vmatprep.mubr.bf16.mxu1 %v4281_v35 }
 0x1d7   : > { %1214 = vperm.xlu1 %3967, %v1144_v52  }
 0x1d8   : > { %1219 = vperm.xlu0 %3966, %v1145_v32  }
 0x1db   : > { %1224 = vperm.xlu1 %3967, %v1146_v2  }
 0x1dc   : > { %1486 = vperm.xlu0 %3966, %v1468_v5  }
 0x1dd   : > { %1061 = vmatmul.mubr.bf16.gmra.mxu0 %v4017_v18  ;;  %1398 = vmatmul.mubr.bf16.gmra.mxu1 %v4017_v18 }
 0x1de   : > { %1070 = vmatprep.mubr.bf16.mxu0 %v4281_v35  ;;  %1407 = vmatprep.mubr.bf16.mxu1 %v4281_v35 }
 0x1df   : > { %1491 = vperm.xlu1 %3967, %v1469_v40  }
 0x1e0   : > { %1496 = vperm.xlu0 %3966, %v1470_v6  }
 0x1e3   : > { %1501 = vperm.xlu1 %3967, %v1471_v41  }
 0x1e4   : > { %1506 = vperm.xlu0 %3966, %v1472_v0  }
 0x1e5   : > { %1071 = vmatmul.mubr.bf16.gmra.mxu0 %v4018_v30  ;;  %1408 = vmatmul.mubr.bf16.gmra.mxu1 %v4018_v30 }
 0x1e6   : > { %1080 = vmatprep.mubr.bf16.mxu0 %v4281_v35  ;;  %1417 = vmatprep.mubr.bf16.mxu1 %v4281_v35 }
 0x1e7   : > { %1511 = vperm.xlu1 %3967, %v1473_v11  }
 0x1e8   : > { %1516 = vperm.xlu0 %3966, %v1474_v42  }
 0x1eb   : > { %1521 = vperm.xlu1 %3967, %v1475_v14  }
 0x1ec   : > { %1526 = vperm.xlu0 %3966, %v1476_v43  }
 0x1ed   : > { %1081 = vmatmul.mubr.bf16.gmra.mxu0 %v4019_v38  ;;  %1418 = vmatmul.mubr.bf16.gmra.mxu1 %v4019_v38 }
 0x1ee   : > { %1090 = vmatprep.mubr.bf16.mxu0 %v4281_v35  ;;  %1427 = vmatprep.mubr.bf16.mxu1 %v4281_v35 }
 0x1ef   : > { %1531 = vperm.xlu1 %3967, %v1477_v53  }
 0x1f0   : > { %1536 = vperm.xlu0 %3966, %v1478_v19  }
 0x1f3   : > { %1541 = vperm.xlu1 %3967, %v1479_v44  }
 0x1f4   : > { %1546 = vperm.xlu0 %3966, %v1480_v46  }
 0x1f5   : > { %1091 = vmatmul.mubr.bf16.gmra.mxu0 %v4020_v31  ;;  %1428 = vmatmul.mubr.bf16.gmra.mxu1 %v4020_v31 }
 0x1f6   : > { %1100 = vmatprep.mubr.bf16.mxu0 %v4281_v35  ;;  %1437 = vmatprep.mubr.bf16.mxu1 %v4281_v35 }
 0x1f7   : > { %1551 = vperm.xlu1 %3967, %v1481_v33  }
 0x1f8   : > { %1556 = vperm.xlu0 %3966, %v1482_v56  }
 0x1fb   : > { %1561 = vperm.xlu1 %3967, %v1483_v39  }
 0x1fd   : > { %1101 = vmatmul.mubr.bf16.gmra.mxu0 %v4021_v7  ;;  %1438 = vmatmul.mubr.bf16.gmra.mxu1 %v4021_v7 }
 0x1fe   : > { %1110 = vmatprep.mubr.bf16.mxu0 %v4281_v35  ;;  %1447 = vmatprep.mubr.bf16.mxu1 %v4281_v35 }
 0x205   : > { %1111 = vmatmul.mubr.bf16.gmra.mxu0 %v4022_v45  ;;  %1448 = vmatmul.mubr.bf16.gmra.mxu1 %v4022_v45 }
 0x206   : > { %1120 = vmatprep.mubr.bf16.mxu0 %v4281_v35  ;;  %1457 = vmatprep.mubr.bf16.mxu1 %v4281_v35 }
 0x20d   : > { %1121 = vmatmul.mubr.bf16.gmra.mxu0 %v4023_v8  ;;  %1458 = vmatmul.mubr.bf16.gmra.mxu1 %v4023_v8 }
 0x233   : > { %v1150_v48 = vpop.permute.xlu0 %1149 }
 0x238   : > { %v1160_v49 = vpop.permute.xlu1 %1159 }
 0x23b   : > { %v1155_v50 = vpop.permute.xlu0 %1154 }
 0x23c   : > { %v1165_v51 = vpop.permute.xlu1 %1164 }
 0x23f   : > { %v1170_v57 = vpop.permute.xlu0 %1169 }
 0x240   : > { %v4845_v13 = vpop.permute.xlu1 %1174 }
 0x243   : > { %v4847_v60 = vpop.permute.xlu0 %1179 }
 0x244   : > { %v4849_v54 = vpop.permute.xlu1 %1184 }
 0x247   : > { %v4857_v12 = vpop.permute.xlu0 %1189 }
 0x248   : > { %v4864_v3 = vpop.permute.xlu1 %1194 }
 0x24b   : > { %v4876_v9 = vpop.permute.xlu0 %1199 }
 0x24c   : > { %v4883_v37 = vpop.permute.xlu1 %1204 }
 0x24f   : > { %v4895_v32 = vpop.permute.xlu0 %1209 }
 0x252   : > { %v4902_v6 = vpop.permute.xlu1 %1214 }
 0x253   : > { %v4912_v44 = vpop.permute.xlu0 %1219 }
 0x295   : > { %v1052_v16 = vpop.f32.mrf.mxu0  ;;  %v4851_v47 = vpop.f32.mrf.mxu1 }
 0x296   : > { %v4853_v35 = vmul.f32 %v1150_v48, %v1052_v16 }
 0x297   : > { %v1054_v58 = vpop.f32.mrf.mxu0  ;;  %v4855_v59 = vpop.f32.mrf.mxu1 }
 0x298   : > { %v3278_v17 = vmul.f32 -1.442695, %v4853_v35  ;;  %v4860_v20 = vmul.f32 %v1150_v48, %v1054_v58  ;;  %v4920_v48 = vpop.permute.xlu1 %1224 }
 0x299   : > { %v1056_v61 = vpop.f32.mrf.mxu0  ;;  %v4862_v62 = vpop.f32.mrf.mxu1 }
 0x29a   : > { %4024 = vpow2.f32 %v3278_v17  ;;  %v3279_v36 = vmul.f32 -1.442695, %v4860_v20  ;;  %v4867_v21 = vmul.f32 %v1155_v50, %v1056_v61 }
 0x29b   : > { %v1058_v24 = vpop.f32.mrf.mxu0  ;;  %v4869_v55 = vpop.f32.mrf.mxu1 }
 0x29c   : > { %4026 = vpow2.f32 %v3279_v36  ;;  %v3280_v25 = vmul.f32 -1.442695, %v4867_v21  ;;  %v4872_v10 = vmul.f32 %v1155_v50, %v1058_v24 }
 0x29d   : > { %v1062_v1 = vpop.f32.mrf.mxu0  ;;  %v4874_v28 = vpop.f32.mrf.mxu1 }
 0x29e   : > { %4028 = vpow2.f32 %v3280_v25  ;;  %v3281_v4 = vmul.f32 -1.442695, %v4872_v10  ;;  %v4879_v29 = vmul.f32 %v1160_v49, %v1062_v1  ;;  %v1487_v1 = vpop.permute.xlu0 %1486 }
 0x29f   : > { %v1064_v63 = vpop.f32.mrf.mxu0  ;;  %v4881_v15 = vpop.f32.mrf.mxu1 }
 0x2a0   : > { %4030 = vpow2.f32 %v3281_v4  ;;  %v3282_v18 = vmul.f32 -1.442695, %v4879_v29  ;;  %v4886_v22 = vmul.f32 %v1160_v49, %v1064_v63 }
 0x2a1   : > { %v1066_v23 = vpop.f32.mrf.mxu0  ;;  %v4888_v26 = vpop.f32.mrf.mxu1 }
 0x2a2   : > { %4032 = vpow2.f32 %v3282_v18  ;;  %v3283_v27 = vmul.f32 -1.442695, %v4886_v22  ;;  %v4891_v30 = vmul.f32 %v1165_v51, %v1066_v23 }
 0x2a3   : > { %v1068_v34 = vpop.f32.mrf.mxu0  ;;  %v4893_v52 = vpop.f32.mrf.mxu1 }
 0x2a4   : > { %4034 = vpow2.f32 %v3283_v27  ;;  %v3284_v2 = vmul.f32 -1.442695, %v4891_v30  ;;  %v4898_v38 = vmul.f32 %v1165_v51, %v1068_v34  ;;  %v1492_v27 = vpop.permute.xlu1 %1491 }
 0x2a5   : > { %v1072_v5 = vpop.f32.mrf.mxu0  ;;  %v4900_v40 = vpop.f32.mrf.mxu1 }
 0x2a6   : > { %4036 = vpow2.f32 %v3284_v2  ;;  %v3285_v41 = vmul.f32 -1.442695, %v4898_v38  ;;  %v4905_v31 = vmul.f32 %v1170_v57, %v1072_v5 }
 0x2a7   : > { %v4025_v0 = vpop.eup %4024  ;;  %v1074_v11 = vpop.f32.mrf.mxu0 }
 0x2a8   : > { %v4907_v42 = vpop.f32.mrf.mxu1  ;;  %v1692_v14 = vadd.f32 1.0, %v4025_v0  ;;  %4038 = vpow2.f32 %v3285_v41  ;;  %v3286_v7 = vmul.f32 -1.442695, %v4905_v31  ;;  %v4910_v43 = vmul.f32 %v1170_v57, %v1074_v11 }
 0x2a9   : > { %v4027_v53 = vpop.eup %4026  ;;  %v1076_v19 = vpop.f32.mrf.mxu0 }
 0x2aa   : > { %4040 = vrcp.f32 %v1692_v14  ;;  %v1693_v45 = vadd.f32 1.0, %v4027_v53  ;;  %v3287_v46 = vmul.f32 -1.442695, %v4910_v43  ;;  %v4916_v33 = vmul.f32 %v4845_v13, %v1076_v19  ;;  %v4918_v56 = vpop.f32.mrf.mxu1 }
 0x2ab   : > { %v4029_v39 = vpop.eup %4028  ;;  %4042 = vpow2.f32 %v3286_v7  ;;  %v1078_v8 = vpop.f32.mrf.mxu0  ;;  %v1564_v19 = vmul.f32 %v1487_v1, %v4851_v47 }
 0x2ac   : > { %4044 = vrcp.f32 %v1693_v45  ;;  %v1694_v49 = vadd.f32 1.0, %v4029_v39  ;;  %v3288_v50 = vmul.f32 -1.442695, %v4916_v33  ;;  %v4924_v51 = vmul.f32 %v4845_v13, %v1078_v8  ;;  %v4927_v61 = vpop.f32.mrf.mxu1  ;;  %v1497_v39 = vpop.permute.xlu0 %1496 }
 0x2ad   : > { %v4031_v57 = vpop.eup %4030  ;;  %4046 = vpow2.f32 %v3287_v46  ;;  %v1082_v16 = vpop.f32.mrf.mxu0  ;;  %v1565_v45 = vmul.f32 %v1487_v1, %v4855_v59  ;;  %v4957_v47 = vmul.f32 %v1497_v39, %v4874_v28 }
 0x2ae   : > { %4048 = vrcp.f32 %v1694_v49  ;;  %v1695_v58 = vadd.f32 1.0, %v4031_v57  ;;  %v3289_v17 = vmul.f32 -1.442695, %v4924_v51  ;;  %v4930_v36 = vmul.f32 %v4847_v60, %v1082_v16  ;;  %v4936_v2 = vpop.f32.mrf.mxu1 }
 0x2af   : > { %v4033_v24 = vpop.eup %4032  ;;  %4050 = vpow2.f32 %v3288_v50  ;;  %v1084_v25 = vpop.f32.mrf.mxu0 }
 0x2b0   : > { %4052 = vrcp.f32 %v1695_v58  ;;  %v1696_v4 = vadd.f32 1.0, %v4033_v24  ;;  %v3290_v13 = vmul.f32 -1.442695, %v4930_v36  ;;  %v4934_v63 = vmul.f32 %v4847_v60, %v1084_v25  ;;  %v4948_v49 = vpop.f32.mrf.mxu1  ;;  %v1502_v24 = vpop.permute.xlu1 %1501 }
 0x2b1   : > { %v4035_v18 = vpop.eup %4034  ;;  %4054 = vpow2.f32 %v3289_v17  ;;  %v1086_v23 = vpop.f32.mrf.mxu0  ;;  %v1567_v58 = vmul.f32 %v1492_v27, %v4869_v55  ;;  %v4968_v55 = vmul.f32 %v1502_v24, %v4888_v26 }
 0x2b2   : > { %4056 = vrcp.f32 %v1696_v4  ;;  %v1697_v34 = vadd.f32 1.0, %v4035_v18  ;;  %v3291_v5 = vmul.f32 -1.442695, %v4934_v63  ;;  %v4940_v41 = vmul.f32 %v4849_v54, %v1086_v23 }
 0x2b3   : > { %v4037_v0 = vpop.eup %4036  ;;  %4058 = vpow2.f32 %v3290_v13  ;;  %v1088_v11 = vpop.f32.mrf.mxu0 }
 0x2b4   : > { %4060 = vrcp.f32 %v1697_v34  ;;  %v1698_v14 = vadd.f32 1.0, %v4037_v0  ;;  %v3292_v60 = vmul.f32 -1.442695, %v4940_v41  ;;  %v4944_v7 = vmul.f32 %v4849_v54, %v1088_v11  ;;  %v4973_v34 = vpop.f32.mrf.mxu1 }
 0x2b5   : > { %v4039_v53 = vpop.eup %4038  ;;  %4062 = vpow2.f32 %v3291_v5  ;;  %v1092_v46 = vpop.f32.mrf.mxu0  ;;  %v1566_v54 = vmul.f32 %v1492_v27, %v4862_v62  ;;  %v4965_v62 = vmul.f32 %v1497_v39, %v4881_v15  ;;  %v4977_v15 = vmul.f32 %v1502_v24, %v4893_v52 }
 0x2b6   : > { %4064 = vrcp.f32 %v1698_v14  ;;  %v1699_v8 = vadd.f32 1.0, %v4039_v53  ;;  %v3293_v50 = vmul.f32 -1.442695, %v4944_v7  ;;  %v4952_v57 = vmul.f32 %v4857_v12, %v1092_v46 }
 0x2b7   : > { %v4041_v16 = vpop.eup %4040  ;;  %4066 = vpow2.f32 %v3292_v60  ;;  %v1094_v59 = vpop.f32.mrf.mxu0 }
 0x2b8   : > { %v4043_v17 = vpop.eup %4042  ;;  %v1788_v25 = vmul.f32 %v4041_v16, %v4853_v35  ;;  %4068 = vrcp.f32 %v1699_v8  ;;  %v3294_v1 = vmul.f32 -1.442695, %v4952_v57  ;;  %v4962_v4 = vmul.f32 %v4857_v12, %v1094_v59  ;;  %v1507_v60 = vpop.permute.xlu0 %1506 }
 0x2b9   : > { %v4045_v13 = vpop.eup %4044  ;;  %v1700_v28 = vadd.f32 1.0, %v4043_v17  ;;  %4070 = vpow2.f32 %v3293_v50  ;;  %v1096_v18 = vpop.f32.mrf.mxu0  ;;  %v4990_v46 = vmul.f32 %v1507_v60, %v4900_v40 }
 0x2ba   : > { %v4047_v23 = vpop.eup %4046  ;;  %v4970_v27 = vmul.f32 %v1788_v25, %v1564_v19  ;;  %v1789_v35 = vmul.f32 %v4045_v13, %v4860_v20  ;;  %4072 = vpow2.f32 %v3294_v1  ;;  %v3295_v12 = vmul.f32 -1.442695, %v4962_v4  ;;  %v1512_v59 = vpop.permute.xlu1 %1511 }
 0x2bb   : > { %v4049_v5 = vpop.eup %4048  ;;  %4074 = vrcp.f32 %v1700_v28  ;;  %v1701_v26 = vadd.f32 1.0, %v4047_v23  ;;  %v4980_v0 = vmul.f32 %v4864_v3, %v1096_v18  ;;  %v1098_v11 = vpop.f32.mrf.mxu0  ;;  %v5004_v25 = vmul.f32 %v1507_v60, %v4907_v42 }
 0x2bc   : > { %v4051_v14 = vpop.eup %4050  ;;  %1855 = vst [vmem:[#allocation9 + $0xb0] sm:$0xff] %v4970_v27  ;;  %v4983_v20 = vmul.f32 %v1789_v35, %v1565_v45  ;;  %v1790_v53 = vmul.f32 %v4049_v5, %v4867_v21  ;;  %4076 = vpow2.f32 %v3295_v12  ;;  %v4987_v19 = vmul.f32 %v4864_v3, %v1098_v11  ;;  %v4997_v17 = vpop.f32.mrf.mxu1 }
 0x2bd   : > { %v4053_v52 = vpop.eup %4052  ;;  %4078 = vrcp.f32 %v1701_v26  ;;  %v1702_v39 = vadd.f32 1.0, %v4051_v14  ;;  %v3296_v8 = vmul.f32 -1.442695, %v4980_v0  ;;  %v1102_v50 = vpop.f32.mrf.mxu0  ;;  %v5007_v1 = vmul.f32 %v1512_v59, %v4918_v56 }
 0x2be   : > { %v4055_v16 = vpop.eup %4054  ;;  %1856 = vst [vmem:[#allocation9] sm:$0xff] %v4983_v20  ;;  %v4994_v45 = vmul.f32 %v1790_v53, %v1566_v54  ;;  %v1791_v21 = vmul.f32 %v4053_v52, %v4872_v10  ;;  %v3297_v3 = vmul.f32 -1.442695, %v4987_v19  ;;  %v5001_v40 = vmul.f32 %v4876_v9, %v1102_v50  ;;  %v5025_v11 = vpop.f32.mrf.mxu1 }
 0x2bf   : > { %v4057_v24 = vpop.eup %4056  ;;  %4080 = vrcp.f32 %v1702_v39  ;;  %v1703_v13 = vadd.f32 1.0, %v4055_v16  ;;  %v1104_v54 = vpop.f32.mrf.mxu0  ;;  %v5015_v42 = vmul.f32 %v1512_v59, %v4927_v61  ;;  %v2032_v53 = vand.u32 2147483647, %v4970_v27 }
 0x2c0   : > { %v4059_v28 = vpop.eup %4058  ;;  %1857 = vst [vmem:[#allocation9 + $0xd8] sm:$0xff] %v4994_v45  ;;  %v5010_v10 = vmul.f32 %v1791_v21, %v1567_v58  ;;  %v1792_v18 = vmul.f32 %v4057_v24, %v4879_v29  ;;  %4082 = vpow2.f32 %v3296_v8  ;;  %v3298_v23 = vmul.f32 -1.442695, %v5001_v40 }
 0x2c1   : > { %v4061_v35 = vpop.eup %4060  ;;  %4084 = vrcp.f32 %v1703_v13  ;;  %v1704_v12 = vadd.f32 1.0, %v4059_v28  ;;  %v5018_v56 = vmul.f32 %v4876_v9, %v1104_v54  ;;  %v1106_v5 = vpop.f32.mrf.mxu0  ;;  %v2033_v59 = vand.u32 2147483647, %v4983_v20 }
 0x2c2   : > { %v4063_v26 = vpop.eup %4062  ;;  %1858 = vst [vmem:[#allocation9 + $0x18] sm:$0xff] %v5010_v10  ;;  %v5022_v58 = vmul.f32 %v1792_v18, %v4957_v47  ;;  %v1793_v29 = vmul.f32 %v4061_v35, %v4886_v22  ;;  %4086 = vpow2.f32 %v3297_v3  ;;  %v5028_v14 = vmul.f32 %v4883_v37, %v1106_v5  ;;  %v5046_v13 = vpop.f32.mrf.mxu1 }
 0x2c3   : > { %v4065_v61 = vpop.eup %4064  ;;  %4088 = vrcp.f32 %v1704_v12  ;;  %v1705_v60 = vadd.f32 1.0, %v4063_v26  ;;  %v3299_v9 = vmul.f32 -1.442695, %v5018_v56  ;;  %v1108_v52 = vpop.f32.mrf.mxu0  ;;  %v1903_v21 = vmul.f32 %v4970_v27, %v4970_v27 }
 0x2c4   : > { %v4067_v39 = vpop.eup %4066  ;;  %1859 = vst [vmem:[#allocation9 + $0x50] sm:$0xff] %v5022_v58  ;;  %v5034_v47 = vmul.f32 %v1793_v29, %v4965_v62  ;;  %v1794_v22 = vmul.f32 %v4065_v61, %v4891_v30  ;;  %4090 = vpow2.f32 %v3298_v23  ;;  %v3300_v8 = vmul.f32 -1.442695, %v5028_v14  ;;  %v1517_v5 = vpop.permute.xlu0 %1516 }
 0x2c5   : > { %v4069_v50 = vpop.eup %4068  ;;  %4092 = vrcp.f32 %v1705_v60  ;;  %v1706_v16 = vadd.f32 1.0, %v4067_v39  ;;  %v1112_v3 = vpop.f32.mrf.mxu0  ;;  %v1904_v54 = vmul.f32 %v4983_v20, %v4983_v20  ;;  %v2064_v23 = vmax.f32.f32 %v2032_v53, %v2033_v59 }
 0x2c6   : > { %v4071_v24 = vpop.eup %4070  ;;  %1860 = vst [vmem:[#allocation9 + $0x68] sm:$0xff] %v5034_v47  ;;  %v5043_v62 = vmul.f32 %v1794_v22, %v4968_v55  ;;  %v1795_v30 = vmul.f32 %v4069_v50, %v4898_v38  ;;  %4094 = vpow2.f32 %v3299_v9  ;;  %v5051_v27 = vmul.f32 %v4883_v37, %v1108_v52  ;;  %v5066_v52 = vpop.f32.mrf.mxu1 }
 0x2c7   : > { %v4073_v28 = vpop.eup %4072  ;;  %4096 = vrcp.f32 %v1706_v16  ;;  %v1707_v18 = vadd.f32 1.0, %v4071_v24  ;;  %v1114_v35 = vpop.f32.mrf.mxu0  ;;  %v1935_v26 = vadd.f32 %v1904_v54, %v1903_v21  ;;  %v5059_v61 = vmul.f32 %v1517_v5, %v4936_v2  ;;  %2065 = vmax.xlane.f32.xlu1 %v2064_v23 }
 0x2c8   : > { %v4075_v12 = vpop.eup %4074  ;;  %1861 = vst [vmem:[#allocation9 + $0x30] sm:$0xff] %v5043_v62  ;;  %v5055_v38 = vmul.f32 %v1795_v30, %v4977_v15  ;;  %v1708_v55 = vadd.f32 1.0, %v4073_v28  ;;  %4098 = vpow2.f32 %v3300_v8  ;;  %v3301_v37 = vmul.f32 -1.442695, %v5051_v27 }
 0x2c9   : > { %v4077_v29 = vpop.eup %4076  ;;  %v1796_v20 = vmul.f32 %v4075_v12, %v4905_v31  ;;  %4100 = vrcp.f32 %v1707_v18  ;;  %v1116_v60 = vpop.f32.mrf.mxu0  ;;  %v5064_v15 = vmul.f32 %v1517_v5, %v4948_v49  ;;  %1936 = vadd.xlane.f32.xlu0 %v1935_v26  ;;  %v5069_v31 = vmul.f32 %v4895_v32, %v1112_v3 }
 0x2ca   : > { %v4079_v9 = vpop.eup %4078  ;;  %1862 = vst [vmem:[#allocation9 + $0x48] sm:$0xff] %v5055_v38  ;;  %4102 = vrcp.f32 %v1708_v55  ;;  %v1709_v53 = vadd.f32 1.0, %v4077_v29  ;;  %v2034_v22 = vand.u32 2147483647, %v4994_v45  ;;  %v2035_v16 = vand.u32 2147483647, %v5010_v10  ;;  %v1522_v3 = vpop.permute.xlu1 %1521 }
 0x2cb   : > { %v5072_v2 = vmul.f32 %v1796_v20, %v4990_v46  ;;  %v1797_v39 = vmul.f32 %v4079_v9, %v4910_v43  ;;  %4104 = vpow2.f32 %v3301_v37  ;;  %v1118_v8 = vpop.f32.mrf.mxu0  ;;  %v3302_v49 = vmul.f32 -1.442695, %v5069_v31 }
 0x2cc   : > { %v4081_v50 = vpop.eup %4080  ;;  %4106 = vrcp.f32 %v1709_v53  ;;  %v1905_v59 = vmul.f32 %v4994_v45, %v4994_v45  ;;  %v1906_v24 = vmul.f32 %v5010_v10, %v5010_v10  ;;  %v5088_v30 = vmul.f32 %v4895_v32, %v1114_v35  ;;  %v5091_v45 = vpop.f32.mrf.mxu1 }
 0x2cd   : > { %v4083_v21 = vpop.eup %4082  ;;  %1863 = vst [vmem:[#allocation9 + $0x80] sm:$0xff] %v5072_v2  ;;  %v5082_v46 = vmul.f32 %v1797_v39, %v5004_v25  ;;  %v1798_v43 = vmul.f32 %v4081_v50, %v4916_v33  ;;  %v1578_v28 = vmul.f32 %v1522_v3, %v4973_v34  ;;  %4108 = vpow2.f32 %v3302_v49  ;;  %v1122_v35 = vpop.f32.mrf.mxu0 }
 0x2ce   : > { %v4085_v54 = vpop.eup %4084  ;;  %v1710_v18 = vadd.f32 1.0, %v4083_v21  ;;  %v2067_v23 = vmax.f32.f32 %v2034_v22, %v2035_v16  ;;  %v1938_v10 = vadd.f32 %v1906_v24, %v1905_v59  ;;  %v3303_v32 = vmul.f32 -1.442695, %v5088_v30  ;;  %v5109_v9 = vpop.f32.mrf.mxu1 }
 0x2cf   : > { %v4087_v12 = vpop.eup %4086  ;;  %1864 = vst [vmem:[#allocation9 + $0x88] sm:$0xff] %v5082_v46  ;;  %v5095_v25 = vmul.f32 %v1798_v43, %v5007_v1  ;;  %v1799_v33 = vmul.f32 %v4085_v54, %v4924_v51  ;;  %v1579_v34 = vmul.f32 %v1522_v3, %v4997_v17  ;;  %v5101_v26 = vmul.f32 %v4902_v6, %v1116_v60  ;;  %v1124_v49 = vpop.f32.mrf.mxu0 }
 0x2d0   : > { %v4089_v5 = vpop.eup %4088  ;;  %4110 = vrcp.f32 %v1710_v18  ;;  %v1711_v55 = vadd.f32 1.0, %v4087_v12  ;;  %2068 = vmax.xlane.f32.xlu0 %v2067_v23  ;;  %1939 = vadd.xlane.f32.xlu1 %v1938_v10  ;;  %v2036_v20 = vand.u32 2147483647, %v5022_v58  ;;  %v2037_v53 = vand.u32 2147483647, %v5034_v47  ;;  %v1527_v24 = vpop.permute.xlu0 %1526 }
 0x2d1   : > { %v4091_v29 = vpop.eup %4090  ;;  %1865 = vst [vmem:[#allocation9 + $0xe8] sm:$0xff] %v5095_v25  ;;  %v5105_v1 = vmul.f32 %v1799_v33, %v5015_v42  ;;  %v1800_v51 = vmul.f32 %v4089_v5, %v4930_v36  ;;  %4112 = vpow2.f32 %v3303_v32  ;;  %v3304_v60 = vmul.f32 -1.442695, %v5101_v26  ;;  %v5131_v18 = vpop.f32.mrf.mxu1 }
 0x2d2   : > { %v4093_v37 = vpop.eup %4092  ;;  %4114 = vrcp.f32 %v1711_v55  ;;  %v1712_v17 = vadd.f32 1.0, %v4091_v29  ;;  %v1907_v22 = vmul.f32 %v5022_v58, %v5022_v58  ;;  %v1908_v50 = vmul.f32 %v5034_v47, %v5034_v47  ;;  %v1532_v29 = vpop.permute.xlu1 %1531 }
 0x2d3   : > { %v4095_v39 = vpop.eup %4094  ;;  %1866 = vst [vmem:[#allocation9 + $0xb8] sm:$0xff] %v5105_v1  ;;  %v5115_v42 = vmul.f32 %v1800_v51, %v5059_v61  ;;  %v1801_v36 = vmul.f32 %v4093_v37, %v4934_v63  ;;  %v2070_v21 = vmax.f32.f32 %v2036_v20, %v2037_v53  ;;  %v5123_v3 = vmul.f32 %v4902_v6, %v1118_v8  ;;  %v5154_v20 = vpop.f32.mrf.mxu1 }
 0x2d4   : > { %v4097_v16 = vpop.eup %4096  ;;  %4116 = vrcp.f32 %v1712_v17  ;;  %v1713_v59 = vadd.f32 1.0, %v4095_v39  ;;  %v1941_v61 = vadd.f32 %v1908_v50, %v1907_v22  ;;  %v1580_v54 = vmul.f32 %v1527_v24, %v5025_v11  ;;  %v1126_v11 = vpop.f32.mrf.mxu0 }
 0x2d5   : > { %v4099_v43 = vpop.eup %4098  ;;  %1867 = vst [vmem:[#allocation9 + $0x60] sm:$0xff] %v5115_v42  ;;  %v5127_v63 = vmul.f32 %v1801_v36, %v5064_v15  ;;  %v1802_v58 = vmul.f32 %v4097_v16, %v4940_v41  ;;  %4118 = vpow2.f32 %v3304_v60  ;;  %2071 = vmax.xlane.f32.xlu1 %v2070_v21  ;;  %v3305_v6 = vmul.f32 -1.442695, %v5123_v3  ;;  %v1537_v21 = vpop.permute.xlu0 %1536 }
 0x2d6   : > { %v4101_v47 = vpop.eup %4100  ;;  %4120 = vrcp.f32 %v1713_v59  ;;  %v1714_v23 = vadd.f32 1.0, %v4099_v43  ;;  %v1581_v41 = vmul.f32 %v1527_v24, %v5046_v13  ;;  %1942 = vadd.xlane.f32.xlu0 %v1941_v61  ;;  %v5140_v33 = vmul.f32 %v4912_v44, %v1122_v35  ;;  %v1128_v36 = vpop.f32.mrf.mxu0 }
 0x2d7   : > { %v4103_v8 = vpop.eup %4102  ;;  %1868 = vst [vmem:[#allocation9 + $0xf0] sm:$0xff] %v5127_v63  ;;  %v5135_v12 = vmul.f32 %v1802_v58, %v1578_v28  ;;  %v1803_v15 = vmul.f32 %v4101_v47, %v4944_v7  ;;  %v1909_v5 = vmul.f32 %v5043_v62, %v5043_v62  ;;  %v1910_v28 = vmul.f32 %v5055_v38, %v5055_v38  ;;  %v1445_v24 = vpop.f32.mrf.mxu1 }
 0x2d8   : > { %v4105_v10 = vpop.eup %4104  ;;  %v1804_v32 = vmul.f32 %v4103_v8, %v4952_v57  ;;  %4122 = vrcp.f32 %v1714_v23  ;;  %v3306_v35 = vmul.f32 -1.442695, %v5140_v33  ;;  %v5157_v17 = vmul.f32 %v4912_v44, %v1124_v49 }
 0x2d9   : > { %v4107_v55 = vpop.eup %4106  ;;  %1869 = vst [vmem:[#allocation9 + $0x8] sm:$0xff] %v5135_v12  ;;  %v5148_v7 = vmul.f32 %v1803_v15, %v1579_v34  ;;  %v1715_v13 = vadd.f32 1.0, %v4105_v10  ;;  %4124 = vpow2.f32 %v3305_v6  ;;  %v1944_v37 = vadd.f32 %v1910_v28, %v1909_v5 }
 0x2da   : > { %v5151_v51 = vmul.f32 %v1804_v32, %v1580_v54  ;;  %v1805_v57 = vmul.f32 %v4107_v55, %v4962_v4  ;;  %v4109_v60 = vpop.eup %4108  ;;  %v1582_v34 = vmul.f32 %v1532_v29, %v5066_v52  ;;  %v1583_v53 = vmul.f32 %v1532_v29, %v5091_v45  ;;  %v1449_v32 = vpop.f32.mrf.mxu1 }
 0x2db   : > { %1870 = vst [vmem:[#allocation9 + $0x78] sm:$0xff] %v5148_v7  ;;  %4126 = vrcp.f32 %v1715_v13  ;;  %v5163_v39 = vmul.f32 %v4920_v48, %v1126_v11  ;;  %v1716_v22 = vadd.f32 1.0, %v4109_v60  ;;  %1945 = vadd.xlane.f32.xlu0 %v1944_v37  ;;  %v3307_v44 = vmul.f32 -1.442695, %v5157_v17  ;;  %v1542_v37 = vpop.permute.xlu1 %1541 }
 0x2dc   : > { %1871 = vst [vmem:[#allocation9 + $0x38] sm:$0xff] %v5151_v51  ;;  %v5166_v4 = vmul.f32 %v1805_v57, %v1581_v41  ;;  %4128 = vpow2.f32 %v3306_v35  ;;  %v2038_v52 = vand.u32 2147483647, %v5043_v62  ;;  %v2039_v45 = vand.u32 2147483647, %v5055_v38 }
 0x2dd   : > { %v4111_v50 = vpop.eup %4110  ;;  %v3308_v49 = vmul.f32 -1.442695, %v5163_v39  ;;  %v1911_v16 = vmul.f32 %v5072_v2, %v5072_v2  ;;  %4130 = vrcp.f32 %v1716_v22  ;;  %v1912_v58 = vmul.f32 %v5082_v46, %v5082_v46  ;;  %v1451_v22 = vpop.f32.mrf.mxu1 }
 0x2de   : > { %v4113_v59 = vpop.eup %4112  ;;  %1872 = vst [vmem:[#allocation9 + $0x58] sm:$0xff] %v5166_v4  ;;  %v1806_v43 = vmul.f32 %v4111_v50, %v4980_v0  ;;  %v5179_v61 = vmul.f32 %v4920_v48, %v1128_v36  ;;  %v1584_v38 = vmul.f32 %v1537_v21, %v5109_v9  ;;  %4132 = vpow2.f32 %v3307_v44 }
 0x2df   : > { %v4115_v62 = vpop.eup %4114  ;;  %v1717_v47 = vadd.f32 1.0, %v4113_v59  ;;  %v2073_v54 = vmax.f32.f32 %v2038_v52, %v2039_v45  ;;  %4134 = vpow2.f32 %v3308_v49  ;;  %v1947_v0 = vadd.f32 %v1912_v58, %v1911_v16  ;;  %v1453_v58 = vpop.f32.mrf.mxu1 }
 0x2e0   : > { %v5182_v23 = vmul.f32 %v1806_v43, %v1582_v34  ;;  %v1807_v6 = vmul.f32 %v4115_v62, %v4987_v19  ;;  %v3309_v15 = vmul.f32 -1.442695, %v5179_v61  ;;  %v2040_v48 = vand.u32 2147483647, %v5072_v2 }
 0x2e1   : > { %v4117_v8 = vpop.eup %4116  ;;  %4136 = vrcp.f32 %v1717_v47  ;;  %2074 = vmax.xlane.f32.xlu0 %v2073_v54  ;;  %v2041_v41 = vand.u32 2147483647, %v5082_v46  ;;  %1948 = vadd.xlane.f32.xlu1 %v1947_v0  ;;  %v1913_v19 = vmul.f32 %v5095_v25, %v5095_v25  ;;  %v1914_v5 = vmul.f32 %v5105_v1, %v5105_v1 }
 0x2e2   : > { %v4119_v11 = vpop.eup %4118  ;;  %1873 = vst [vmem:[#allocation9 + $0x40] sm:$0xff] %v5182_v23  ;;  %v5189_v9 = vmul.f32 %v1807_v6, %v1583_v53  ;;  %v1808_v10 = vmul.f32 %v4117_v8, %v5001_v40  ;;  %v1585_v2 = vmul.f32 %v1537_v21, %v5131_v18  ;;  %4138 = vpow2.f32 %v3309_v15 }
 0x2e3   : > { %v4121_v28 = vpop.eup %4120  ;;  %v1718_v55 = vadd.f32 1.0, %v4119_v11  ;;  %v2076_v46 = vmax.f32.f32 %v2040_v48, %v2041_v41  ;;  %v1950_v35 = vadd.f32 %v1914_v5, %v1913_v19  ;;  %v2043_v29 = vand.u32 2147483647, %v5105_v1 }
 0x2e4   : > { %1874 = vst [vmem:[#allocation9 + $0xc8] sm:$0xff] %v5189_v9  ;;  %v5198_v13 = vmul.f32 %v1808_v10, %v1584_v38  ;;  %v1809_v40 = vmul.f32 %v4121_v28, %v5018_v56  ;;  %v1915_v60 = vmul.f32 %v5115_v42, %v5115_v42  ;;  %v1916_v18 = vmul.f32 %v5127_v63, %v5127_v63 }
 0x2e5   : > { %v4123_v57 = vpop.eup %4122  ;;  %4140 = vrcp.f32 %v1718_v55  ;;  %v1586_v56 = vmul.f32 %v1542_v37, %v5154_v20  ;;  %2077 = vmax.xlane.f32.xlu1 %v2076_v46  ;;  %1951 = vadd.xlane.f32.xlu0 %v1950_v35  ;;  %v2042_v1 = vand.u32 2147483647, %v5095_v25  ;;  %v2045_v49 = vand.u32 2147483647, %v5127_v63  ;;  %v1547_v63 = vpop.permute.xlu0 %1546 }
 0x2e6   : > { %v4125_v34 = vpop.eup %4124  ;;  %1875 = vst [vmem:[#allocation9 + $0xe0] sm:$0xff] %v5198_v13  ;;  %v5207_v53 = vmul.f32 %v1809_v40, %v1585_v2  ;;  %v1810_v36 = vmul.f32 %v4123_v57, %v5028_v14  ;;  %v1953_v50 = vadd.f32 %v1916_v18, %v1915_v60  ;;  %v1918_v52 = vmul.f32 %v5148_v7, %v5148_v7 }
 0x2e7   : > { %v1719_v44 = vadd.f32 1.0, %v4125_v34  ;;  %v2079_v14 = vmax.f32.f32 %v2042_v1, %v2043_v29  ;;  %v1917_v20 = vmul.f32 %v5135_v12, %v5135_v12  ;;  %v1587_v25 = vmul.f32 %v1542_v37, %v1445_v24  ;;  %v1552_v37 = vpop.permute.xlu1 %1551 }
 0x2e8   : > { %v4127_v45 = vpop.eup %4126  ;;  %1876 = vst [vmem:[#allocation9 + $0x90] sm:$0xff] %v5207_v53  ;;  %v5216_v16 = vmul.f32 %v1810_v36, %v1586_v56  ;;  %v2044_v43 = vand.u32 2147483647, %v5115_v42  ;;  %v1920_v47 = vmul.f32 %v5166_v4, %v5166_v4  ;;  %v1588_v0 = vmul.f32 %v1547_v63, %v1449_v32  ;;  %v1455_v32 = vpop.f32.mrf.mxu1 }
 0x2e9   : > { %v4129_v59 = vpop.eup %4128  ;;  %v1811_v21 = vmul.f32 %v4127_v45, %v5051_v27  ;;  %4142 = vrcp.f32 %v1719_v44  ;;  %2080 = vmax.xlane.f32.xlu0 %v2079_v14  ;;  %1954 = vadd.xlane.f32.xlu1 %v1953_v50  ;;  %v1956_v38 = vadd.f32 %v1918_v52, %v1917_v20  ;;  %v2047_v42 = vand.u32 2147483647, %v5148_v7  ;;  %v1557_v14 = vpop.permute.xlu0 %1556 }
 0x2ea   : > { %1877 = vst [vmem:[#allocation9 + $0x70] sm:$0xff] %v5216_v16  ;;  %v1720_v62 = vadd.f32 1.0, %v4129_v59  ;;  %v4131_v54 = vpop.eup %4130  ;;  %v2082_v27 = vmax.f32.f32 %v2044_v43, %v2045_v49  ;;  %v1919_v15 = vmul.f32 %v5151_v51, %v5151_v51  ;;  %v2046_v11 = vand.u32 2147483647, %v5135_v12  ;;  %v1459_v60 = vpop.f32.mrf.mxu1 }
 0x2eb   : > { %v5225_v6 = vmul.f32 %v1811_v21, %v1587_v25  ;;  %v4133_v24 = vpop.eup %4132  ;;  %v1812_v8 = vmul.f32 %v4131_v54, %v5069_v31  ;;  %v1922_v7 = vmul.f32 %v5189_v9, %v5189_v9  ;;  %v1589_v2 = vmul.f32 %v1547_v63, %v1451_v22 }
 0x2ec   : > { %4144 = vrcp.f32 %v1720_v62  ;;  %v4135_v48 = vpop.eup %4134  ;;  %v1721_v41 = vadd.f32 1.0, %v4133_v24  ;;  %v1959_v31 = vadd.f32 %v1920_v47, %v1919_v15  ;;  %v2085_v12 = vmax.f32.f32 %v2046_v11, %v2047_v42 }
 0x2ed   : > { %1878 = vst [vmem:[#allocation9 + $0xc0] sm:$0xff] %v5225_v6  ;;  %v5233_v19 = vmul.f32 %v1812_v8, %v1588_v0  ;;  %v1722_v5 = vadd.f32 1.0, %v4135_v48  ;;  %2083 = vmax.xlane.f32.xlu1 %v2082_v27  ;;  %1957 = vadd.xlane.f32.xlu0 %v1956_v38  ;;  %v2049_v46 = vand.u32 2147483647, %v5166_v4  ;;  %v1921_v40 = vmul.f32 %v5182_v23, %v5182_v23 }
 0x2ee   : > { %v4137_v10 = vpop.eup %4136  ;;  %4146 = vrcp.f32 %v1721_v41  ;;  %v1924_v34 = vmul.f32 %v5207_v53, %v5207_v53  ;;  %v1590_v36 = vmul.f32 %v1552_v37, %v1453_v58  ;;  %v2051_v22 = vand.u32 2147483647, %v5189_v9 }
 0x2ef   : > { %v1813_v28 = vmul.f32 %v4137_v10, %v5088_v30  ;;  %v4139_v55 = vpop.eup %4138  ;;  %1879 = vst [vmem:[#allocation9 + $0xa8] sm:$0xff] %v5233_v19  ;;  %4148 = vrcp.f32 %v1722_v5  ;;  %v2048_v30 = vand.u32 2147483647, %v5151_v51  ;;  %v1962_v18 = vadd.f32 %v1922_v7, %v1921_v40  ;;  %v1461_v51 = vpop.f32.mrf.mxu1 }
 0x2f0   : > { %v1723_v29 = vadd.f32 1.0, %v4139_v55  ;;  %v1923_v1 = vmul.f32 %v5198_v13, %v5198_v13  ;;  %v2050_v49 = vand.u32 2147483647, %v5182_v23  ;;  %v1591_v9 = vmul.f32 %v1552_v37, %v1455_v32 }
 0x2f1   : > { %v5242_v35 = vmul.f32 %v1813_v28, %v1589_v2  ;;  %2086 = vmax.xlane.f32.xlu0 %v2085_v12  ;;  %1960 = vadd.xlane.f32.xlu1 %v1959_v31  ;;  %v2088_v56 = vmax.f32.f32 %v2048_v30, %v2049_v46  ;;  %v2053_v59 = vand.u32 2147483647, %v5207_v53  ;;  %v1925_v21 = vmul.f32 %v5216_v16, %v5216_v16  ;;  %v1463_v58 = vpop.f32.mrf.mxu1  ;;  %v1562_v53 = vpop.permute.xlu1 %1561 }
 0x2f2   : > { %v4141_v57 = vpop.eup %4140  ;;  %4150 = vrcp.f32 %v1723_v29  ;;  %v1965_v52 = vadd.f32 %v1924_v34, %v1923_v1  ;;  %v2091_v20 = vmax.f32.f32 %v2050_v49, %v2051_v22  ;;  %v1592_v63 = vmul.f32 %v1557_v14, %v1459_v60  ;;  %v2016_v22 = vld [vmem:[#allocation6] sm:$0xff] }
 0x2f3   : > { %1880 = vst [vmem:[#allocation9 + $0xd0] sm:$0xff] %v5242_v35  ;;  %v1814_v4 = vmul.f32 %v4141_v57, %v5101_v26  ;;  %v1926_v26 = vmul.f32 %v5225_v6, %v5225_v6  ;;  %v2052_v62 = vand.u32 2147483647, %v5198_v13  ;;  %v2055_v27 = vand.u32 2147483647, %v5225_v6  ;;  %v1465_v48 = vpop.f32.mrf.mxu1  ;;  %v1887_v1 = vld [vmem:[#allocation5] sm:$0xff] }
 0x2f4   : > { %v1927_v24 = vmul.f32 %v5233_v19, %v5233_v19  ;;  %v1593_v42 = vmul.f32 %v1557_v14, %v1461_v51  ;;  %v1594_v15 = vmul.f32 %v1562_v53, %v1463_v58  ;;  %v2054_v41 = vand.u32 2147483647, %v5216_v16  ;;  %v1890_v58 = vld [vmem:[#allocation5 + $0x18] sm:$0xff] }
 0x2f5   : > { %v5252_v44 = vmul.f32 %v1814_v4, %v1590_v36  ;;  %2089 = vmax.xlane.f32.xlu1 %v2088_v56  ;;  %1963 = vadd.xlane.f32.xlu0 %v1962_v18  ;;  %v1968_v38 = vadd.f32 %v1926_v26, %v1925_v21  ;;  %v2094_v0 = vmax.f32.f32 %v2052_v62, %v2053_v59  ;;  %v2057_v7 = vand.u32 2147483647, %v5242_v35  ;;  %v1888_v26 = vld [vmem:[#allocation5 + $0x8] sm:$0xff]  ;;  %v2018_v59 = vld [vmem:[#allocation6 + $0x10] sm:$0xff] }
 0x2f6   : > { %v4143_v50 = vpop.eup %4142  ;;  %v2097_v31 = vmax.f32.f32 %v2054_v41, %v2055_v27  ;;  %v2056_v16 = vand.u32 2147483647, %v5233_v19  ;;  %v1889_v21 = vld [vmem:[#allocation5 + $0x10] sm:$0xff] }
 0x2f7   : > { %1881 = vst [vmem:[#allocation9 + $0x10] sm:$0xff] %v5252_v44  ;;  %v1815_v45 = vmul.f32 %v4143_v50, %v5123_v3  ;;  %v1928_v3 = vmul.f32 %v5242_v35, %v5242_v35  ;;  %v2058_v35 = vand.u32 2147483647, %v5252_v44  ;;  %v1893_v41 = vld [vmem:[#allocation5 + $0x30] sm:$0xff] }
 0x2f8   : > { %v2100_v46 = vmax.f32.f32 %v2056_v16, %v2057_v7  ;;  %v2023_v16 = vld [vmem:[#allocation6 + $0x38] sm:$0xff] }
 0x2f9   : > { %v4145_v25 = vpop.eup %4144  ;;  %v1847_v43 = vmul.f32 %v1815_v45, %v1591_v9  ;;  %2092 = vmax.xlane.f32.xlu0 %v2091_v20  ;;  %1966 = vadd.xlane.f32.xlu1 %v1965_v52  ;;  %v1971_v11 = vadd.f32 %v1928_v3, %v1927_v24  ;;  %v2017_v52 = vld [vmem:[#allocation6 + $0x8] sm:$0xff]  ;;  %v2019_v3 = vld [vmem:[#allocation6 + $0x18] sm:$0xff]  ;;  %v2020_v24 = vld [vmem:[#allocation6 + $0x20] sm:$0xff] }
 0x2fa   : > { %v1816_v23 = vmul.f32 %v4145_v25, %v5140_v33 }
 0x2fb   : > { %1882 = vst [vmem:[#allocation9 + $0x28] sm:$0xff] %v1847_v43  ;;  %v4147_v47 = vpop.eup %4146  ;;  %v1930_v10 = vmul.f32 %v1847_v43, %v1847_v43  ;;  %v2059_v40 = vand.u32 2147483647, %v1847_v43 }
 0x2fc   : > { %v1848_v54 = vmul.f32 %v1816_v23, %v1592_v63  ;;  %v4149_v33 = vpop.eup %4148  ;;  %v1817_v8 = vmul.f32 %v4147_v47, %v5157_v17  ;;  %v1929_v17 = vmul.f32 %v5252_v44, %v5252_v44  ;;  %v1891_v47 = vld [vmem:[#allocation5 + $0x20] sm:$0xff] }
 0x2fd   : > { %v1818_v13 = vmul.f32 %v4149_v33, %v5163_v39  ;;  %2095 = vmax.xlane.f32.xlu1 %v2094_v0  ;;  %1969 = vadd.xlane.f32.xlu0 %v1968_v38  ;;  %v1595_v39 = vmul.f32 %v1562_v53, %v1465_v48  ;;  %v1892_v33 = vld [vmem:[#allocation5 + $0x28] sm:$0xff] }
 0x2fe   : > { %1883 = vst [vmem:[#allocation9 + $0xa0] sm:$0xff] %v1848_v54  ;;  %v1849_v32 = vmul.f32 %v1817_v8, %v1593_v42  ;;  %v1974_v2 = vadd.f32 %v1930_v10, %v1929_v17  ;;  %v1931_v29 = vmul.f32 %v1848_v54, %v1848_v54  ;;  %v2060_v18 = vand.u32 2147483647, %v1848_v54  ;;  %v2021_v48 = vld [vmem:[#allocation6 + $0x28] sm:$0xff] }
 0x2ff   : > { %v4151_v6 = vpop.eup %4150  ;;  %v1850_v5 = vmul.f32 %v1818_v13, %v1594_v15 }
 0x300   : > { %1884 = vst [vmem:[#allocation9 + $0xf8] sm:$0xff] %v1849_v32  ;;  %v1819_v28 = vmul.f32 %v4151_v6, %v5179_v61  ;;  %v1932_v55 = vmul.f32 %v1849_v32, %v1849_v32  ;;  %v2103_v61 = vmax.f32.f32 %v2058_v35, %v2059_v40  ;;  %v2061_v60 = vand.u32 2147483647, %v1849_v32  ;;  %v1896_v35 = vld [vmem:[#allocation5 + $0x48] sm:$0xff] }
 0x301   : > { %1885 = vst [vmem:[#allocation9 + $0x20] sm:$0xff] %v1850_v5  ;;  %2098 = vmax.xlane.f32.xlu0 %v2097_v31  ;;  %1972 = vadd.xlane.f32.xlu1 %v1971_v11  ;;  %v1933_v30 = vmul.f32 %v1850_v5, %v1850_v5  ;;  %v2062_v36 = vand.u32 2147483647, %v1850_v5  ;;  %v2022_v5 = vld [vmem:[#allocation6 + $0x30] sm:$0xff]  ;;  %v1894_v31 = vld [vmem:[#allocation5 + $0x38] sm:$0xff] }
 0x302   : > { %v1851_v12 = vmul.f32 %v1819_v28, %v1595_v39  ;;  %v1977_v57 = vadd.f32 %v1932_v55, %v1931_v29  ;;  %v2106_v34 = vmax.f32.f32 %v2060_v18, %v2061_v60  ;;  %v2024_v29 = vld [vmem:[#allocation6 + $0x40] sm:$0xff]  ;;  %v1897_v18 = vld [vmem:[#allocation5 + $0x50] sm:$0xff] }
 0x304   : > { %1886 = vst [vmem:[#allocation9 + $0x98] sm:$0xff] %v1851_v12  ;;  %v1934_v37 = vmul.f32 %v1851_v12, %v1851_v12  ;;  %v2063_v4 = vand.u32 2147483647, %v1851_v12 }
 0x305   : > { %2101 = vmax.xlane.f32.xlu1 %v2100_v46  ;;  %1975 = vadd.xlane.f32.xlu0 %v1974_v2  ;;  %v1895_v2 = vld [vmem:[#allocation5 + $0x40] sm:$0xff] }
 0x306   : > { %v1980_v19 = vadd.f32 %v1934_v37, %v1933_v30  ;;  %v2109_v56 = vmax.f32.f32 %v2062_v36, %v2063_v4  ;;  %v2025_v30 = vld [vmem:[#allocation6 + $0x48] sm:$0xff] }
 0x309   : > { %2104 = vmax.xlane.f32.xlu0 %v2103_v61  ;;  %1978 = vadd.xlane.f32.xlu1 %v1977_v57 }
 0x30d   : > { %2107 = vmax.xlane.f32.xlu1 %v2106_v34  ;;  %1981 = vadd.xlane.f32.xlu0 %v1980_v19 }
 0x311   : > { %2110 = vmax.xlane.f32.xlu0 %v2109_v56  ;;  %v2026_v56 = vld [vmem:[#allocation6 + $0x50] sm:$0xff] }
 0x350   : > { %v2066_v44 = vpop.xlane.xlu1 %2065 }
 0x351   : > { %v2112_v50 = vmax.f32 %v2016_v22, %v2066_v44  ;;  %v1898_v22 = vld [vmem:[#allocation5 + $0x58] sm:$0xff] }
 0x352   : > { %v1937_v51 = vpop.xlane.xlu0 %1936 }
 0x353   : > { %v1983_v49 = vadd.f32 %v1937_v51, %v1887_v1  ;;  %2128 = vst.msk [vmem:[#allocation6] sm:$0xff] %vm1999_vm1, %v2112_v50 }
 0x355   : > { %2000 = vst.msk [vmem:[#allocation5] sm:$0xff] %vm1999_vm1, %v1983_v49  ;;  %v2027_v49 = vld [vmem:[#allocation6 + $0x58] sm:$0xff] }
 0x359   : > { %v2069_v45 = vpop.xlane.xlu0 %2068  ;;  %v1940_v14 = vpop.xlane.xlu1 %1939 }
 0x35a   : > { %v2113_v9 = vmax.f32 %v2017_v52, %v2069_v45  ;;  %v1984_v20 = vadd.f32 %v1940_v14, %v1888_v26  ;;  %v1899_v52 = vld [vmem:[#allocation5 + $0x60] sm:$0xff] }
 0x35c   : > { %2129 = vst.msk [vmem:[#allocation6 + $0x8] sm:$0xff] %vm1999_vm1, %v2113_v9  ;;  %2001 = vst.msk [vmem:[#allocation5 + $0x8] sm:$0xff] %vm1999_vm1, %v1984_v20  ;;  %v2028_v20 = vld [vmem:[#allocation6 + $0x60] sm:$0xff] }
 0x35e   : > { %v2072_v25 = vpop.xlane.xlu1 %2071 }
 0x35f   : > { %v2114_v43 = vmax.f32 %v2018_v59, %v2072_v25  ;;  %v1943_v63 = vpop.xlane.xlu0 %1942  ;;  %v1900_v59 = vld [vmem:[#allocation5 + $0x68] sm:$0xff] }
 0x360   : > { %v1985_v23 = vadd.f32 %v1943_v63, %v1889_v21 }
 0x361   : > { %2130 = vst.msk [vmem:[#allocation6 + $0x10] sm:$0xff] %vm1999_vm1, %v2114_v43 }
 0x362   : > { %2002 = vst.msk [vmem:[#allocation5 + $0x10] sm:$0xff] %vm1999_vm1, %v1985_v23  ;;  %v2029_v23 = vld [vmem:[#allocation6 + $0x68] sm:$0xff] }
 0x364   : > { %v1946_v62 = vpop.xlane.xlu0 %1945 }
 0x365   : > { %v1986_v38 = vadd.f32 %v1946_v62, %v1890_v58  ;;  %v1901_v58 = vld [vmem:[#allocation5 + $0x70] sm:$0xff] }
 0x367   : > { %2003 = vst.msk [vmem:[#allocation5 + $0x18] sm:$0xff] %vm1999_vm1, %v1986_v38 }
 0x36a   : > { %v2075_v53 = vpop.xlane.xlu0 %2074  ;;  %v1949_v0 = vpop.xlane.xlu1 %1948 }
 0x36b   : > { %v2115_v54 = vmax.f32 %v2019_v3, %v2075_v53  ;;  %v1987_v27 = vadd.f32 %v1949_v0, %v1891_v47  ;;  %v2030_v53 = vld [vmem:[#allocation6 + $0x70] sm:$0xff] }
 0x36d   : > { %2131 = vst.msk [vmem:[#allocation6 + $0x18] sm:$0xff] %vm1999_vm1, %v2115_v54  ;;  %2004 = vst.msk [vmem:[#allocation5 + $0x20] sm:$0xff] %vm1999_vm1, %v1987_v27  ;;  %v1902_v54 = vld [vmem:[#allocation5 + $0x78] sm:$0xff] }
 0x36e   : > { %v2078_v8 = vpop.xlane.xlu1 %2077  ;;  %v1952_v42 = vpop.xlane.xlu0 %1951 }
 0x36f   : > { %v2116_v15 = vmax.f32 %v2020_v24, %v2078_v8  ;;  %v1988_v13 = vadd.f32 %v1952_v42, %v1892_v33  ;;  %v2031_v8 = vld [vmem:[#allocation6 + $0x78] sm:$0xff] }
 0x371   : > { %2132 = vst.msk [vmem:[#allocation6 + $0x20] sm:$0xff] %vm1999_vm1, %v2116_v15  ;;  %2005 = vst.msk [vmem:[#allocation5 + $0x28] sm:$0xff] %vm1999_vm1, %v1988_v13 }
 0x372   : > { %v2081_v11 = vpop.xlane.xlu0 %2080  ;;  %v1955_v10 = vpop.xlane.xlu1 %1954 }
 0x373   : > { %v2117_v32 = vmax.f32 %v2021_v48, %v2081_v11  ;;  %v1989_v6 = vadd.f32 %v1955_v10, %v1893_v41 }
 0x375   : > { %2133 = vst.msk [vmem:[#allocation6 + $0x28] sm:$0xff] %vm1999_vm1, %v2117_v32  ;;  %2006 = vst.msk [vmem:[#allocation5 + $0x30] sm:$0xff] %vm1999_vm1, %v1989_v6 }
 0x376   : > { %v2084_v7 = vpop.xlane.xlu1 %2083  ;;  %v1958_v17 = vpop.xlane.xlu0 %1957 }
 0x377   : > { %v2118_v28 = vmax.f32 %v2022_v5, %v2084_v7  ;;  %v1990_v39 = vadd.f32 %v1958_v17, %v1894_v31 }
 0x379   : > { %2134 = vst.msk [vmem:[#allocation6 + $0x30] sm:$0xff] %vm1999_vm1, %v2118_v28  ;;  %2007 = vst.msk [vmem:[#allocation5 + $0x38] sm:$0xff] %vm1999_vm1, %v1990_v39 }
 0x37a   : > { %v2087_v55 = vpop.xlane.xlu0 %2086  ;;  %v1961_v12 = vpop.xlane.xlu1 %1960 }
 0x37b   : > { %v2119_v46 = vmax.f32 %v2023_v16, %v2087_v55  ;;  %v1991_v40 = vadd.f32 %v1961_v12, %v1895_v2 }
 0x37d   : > { %2135 = vst.msk [vmem:[#allocation6 + $0x38] sm:$0xff] %vm1999_vm1, %v2119_v46  ;;  %2008 = vst.msk [vmem:[#allocation5 + $0x40] sm:$0xff] %vm1999_vm1, %v1991_v40 }
 0x37e   : > { %v2090_v57 = vpop.xlane.xlu1 %2089  ;;  %v1964_v37 = vpop.xlane.xlu0 %1963 }
 0x37f   : > { %v2120_v61 = vmax.f32 %v2024_v29, %v2090_v57  ;;  %v1992_v60 = vadd.f32 %v1964_v37, %v1896_v35 }
 0x381   : > { %2136 = vst.msk [vmem:[#allocation6 + $0x40] sm:$0xff] %vm1999_vm1, %v2120_v61  ;;  %2009 = vst.msk [vmem:[#allocation5 + $0x48] sm:$0xff] %vm1999_vm1, %v1992_v60 }
 0x382   : > { %v2093_v19 = vpop.xlane.xlu0 %2092  ;;  %v1967_v34 = vpop.xlane.xlu1 %1966 }
 0x383   : > { %v2121_v4 = vmax.f32 %v2025_v30, %v2093_v19  ;;  %v1993_v36 = vadd.f32 %v1967_v34, %v1897_v18 }
 0x385   : > { %2137 = vst.msk [vmem:[#allocation6 + $0x48] sm:$0xff] %vm1999_vm1, %v2121_v4  ;;  %2010 = vst.msk [vmem:[#allocation5 + $0x50] sm:$0xff] %vm1999_vm1, %v1993_v36 }
 0x386   : > { %v2096_v1 = vpop.xlane.xlu1 %2095  ;;  %v1970_v44 = vpop.xlane.xlu0 %1969 }
 0x387   : > { %v2122_v50 = vmax.f32 %v2026_v56, %v2096_v1  ;;  %v1994_v51 = vadd.f32 %v1970_v44, %v1898_v22 }
 0x389   : > { %2138 = vst.msk [vmem:[#allocation6 + $0x50] sm:$0xff] %vm1999_vm1, %v2122_v50  ;;  %2011 = vst.msk [vmem:[#allocation5 + $0x58] sm:$0xff] %vm1999_vm1, %v1994_v51 }
 0x38a   : > { %v2099_v26 = vpop.xlane.xlu0 %2098  ;;  %v1973_v45 = vpop.xlane.xlu1 %1972 }
 0x38b   : > { %v2123_v9 = vmax.f32 %v2027_v49, %v2099_v26  ;;  %v1995_v14 = vadd.f32 %v1973_v45, %v1899_v52 }
 0x38d   : > { %2139 = vst.msk [vmem:[#allocation6 + $0x58] sm:$0xff] %vm1999_vm1, %v2123_v9  ;;  %2012 = vst.msk [vmem:[#allocation5 + $0x60] sm:$0xff] %vm1999_vm1, %v1995_v14 }
 0x38e   : > { %v2102_v21 = vpop.xlane.xlu1 %2101  ;;  %v1976_v25 = vpop.xlane.xlu0 %1975 }
 0x38f   : > { %v2124_v43 = vmax.f32 %v2028_v20, %v2102_v21  ;;  %v1996_v63 = vadd.f32 %v1976_v25, %v1900_v59 }
 0x391   : > { %2140 = vst.msk [vmem:[#allocation6 + $0x60] sm:$0xff] %vm1999_vm1, %v2124_v43  ;;  %2013 = vst.msk [vmem:[#allocation5 + $0x68] sm:$0xff] %vm1999_vm1, %v1996_v63 }
 0x392   : > { %v2105_v62 = vpop.xlane.xlu0 %2104  ;;  %v1979_v38 = vpop.xlane.xlu1 %1978 }
 0x393   : > { %v2125_v3 = vmax.f32 %v2029_v23, %v2105_v62  ;;  %v1997_v47 = vadd.f32 %v1979_v38, %v1901_v58 }
 0x395   : > { %2141 = vst.msk [vmem:[#allocation6 + $0x68] sm:$0xff] %vm1999_vm1, %v2125_v3  ;;  %2014 = vst.msk [vmem:[#allocation5 + $0x70] sm:$0xff] %vm1999_vm1, %v1997_v47 }
 0x396   : > { %v2108_v0 = vpop.xlane.xlu1 %2107  ;;  %v1982_v27 = vpop.xlane.xlu0 %1981 }
 0x397   : > { %v2126_v24 = vmax.f32 %v2030_v53, %v2108_v0  ;;  %v1998_v33 = vadd.f32 %v1982_v27, %v1902_v54 }
 0x399   : > { %2142 = vst.msk [vmem:[#allocation6 + $0x70] sm:$0xff] %vm1999_vm1, %v2126_v24  ;;  %2015 = vst.msk [vmem:[#allocation5 + $0x78] sm:$0xff] %vm1999_vm1, %v1998_v33 }
 0x39a   : > { %v2111_v42 = vpop.xlane.xlu0 %2110 }
 0x39b   : > { %v2127_v15 = vmax.f32 %v2031_v8, %v2111_v42 }
 0x39d   : > { %2143 = vst.msk [vmem:[#allocation6 + $0x78] sm:$0xff] %vm1999_vm1, %v2127_v15 }
 0x39e PF: > { %p2144_p3 = scmp.eq.s32.totalorder %s4269_s18, 1 }
 0x39f   : > { %v2149_v13 = vld [vmem:[#allocation5] sm:$0xff] (%p2144_p3)  ;;  %v2150_v48 = vld [vmem:[#allocation5 + $0x8] sm:$0xff] (%p2144_p3)  ;;  %v2151_v10 = vld [vmem:[#allocation5 + $0x10] sm:$0xff] (%p2144_p3)  ;;  %v4282_v31 = vmov (%p2144_p3), 0.0   ;;  %s3311_s23 = sld [smem:[#allocation11 + $0x2]] (%p2144_p3)  ;;  %vm2309_vm2 = vcmask (%p2144_p3), 7168  }
 0x3a0   : > { %2148 = sbr.rel (!%p2144_p3) target bundleno = 984 (0x3d8), region = 56  ;;  %v2165_v41 = vmul.f32 (%p2144_p3), 0.00390625, %v2149_v13  ;;  %v2166_v11 = vmul.f32 (%p2144_p3), 0.00390625, %v2150_v48  ;;  %v2167_v32 = vmul.f32 (%p2144_p3), 0.00390625, %v2151_v10  ;;  %v2152_v6 = vld [vmem:[#allocation5 + $0x18] sm:$0xff] (%p2144_p3)  ;;  %v2153_v5 = vld [vmem:[#allocation5 + $0x20] sm:$0xff] (%p2144_p3) }
 0x3a1   : > { %2376 = vst [vmem:[#allocation10] sm:$0xff] (%p2144_p3), %v4282_v31  ;;  %2377 = vst [vmem:[#allocation10 + $0x48] sm:$0xff] (%p2144_p3), %v4282_v31  ;;  %v2168_v28 = vmul.f32 (%p2144_p3), 0.00390625, %v2152_v6  ;;  %v2169_v39 = vmul.f32 (%p2144_p3), 0.00390625, %v2153_v5  ;;  %v2154_v2 = vld [vmem:[#allocation5 + $0x28] sm:$0xff] (%p2144_p3)  ;;  %v2155_v40 = vld [vmem:[#allocation5 + $0x30] sm:$0xff] (%p2144_p3) }
 0x3a2   : > { %2378 = vst [vmem:[#allocation10 + $0x68] sm:$0xff] (%p2144_p3), %v4282_v31  ;;  %2379 = vst [vmem:[#allocation10 + $0x78] sm:$0xff] (%p2144_p3), %v4282_v31  ;;  %v2181_v7 = vadd.f32 (%p2144_p3), 1e-06, %v2165_v41  ;;  %v2182_v17 = vadd.f32 (%p2144_p3), 1e-06, %v2166_v11 }
 0x3a3   : > { %2380 = vst [vmem:[#allocation10 + $0x8] sm:$0xff] (%p2144_p3), %v4282_v31  ;;  %2381 = vst [vmem:[#allocation10 + $0x50] sm:$0xff] (%p2144_p3), %v4282_v31  ;;  %v2183_v16 = vadd.f32 (%p2144_p3), 1e-06, %v2167_v32  ;;  %v2184_v55 = vadd.f32 (%p2144_p3), 1e-06, %v2168_v28 }
 0x3a4   : > { %2382 = vst [vmem:[#allocation10 + $0x40] sm:$0xff] (%p2144_p3), %v4282_v31  ;;  %2383 = vst [vmem:[#allocation10 + $0x38] sm:$0xff] (%p2144_p3), %v4282_v31  ;;  %4152 = vrsqrt.f32 (%p2144_p3), %v2181_v7  ;;  %v2185_v12 = vadd.f32 (%p2144_p3), 1e-06, %v2169_v39  ;;  %v2170_v46 = vmul.f32 (%p2144_p3), 0.00390625, %v2154_v2  ;;  %v2171_v29 = vmul.f32 (%p2144_p3), 0.00390625, %v2155_v40 }
 0x3a5   : > { %2384 = vst [vmem:[#allocation10 + $0x70] sm:$0xff] %v4282_v31  ;;  %2385 = vst [vmem:[#allocation10 + $0x60] sm:$0xff] %v4282_v31  ;;  %4154 = vrsqrt.f32 %v2182_v17  ;;  %v2156_v35 = vld [vmem:[#allocation5 + $0x38] sm:$0xff]  ;;  %v2157_v61 = vld [vmem:[#allocation5 + $0x40] sm:$0xff]  ;;  %v5327_v11 = vstv %s3311_s23 }
 0x3a6   : > { %2386 = vst [vmem:[#allocation10 + $0x18] sm:$0xff] %v4282_v31  ;;  %2387 = vst [vmem:[#allocation10 + $0x20] sm:$0xff] %v4282_v31  ;;  %4156 = vrsqrt.f32 %v2183_v16  ;;  %v2186_v57 = vadd.f32 1e-06, %v2170_v46  ;;  %v2172_v37 = vmul.f32 0.00390625, %v2156_v35  ;;  %v2158_v60 = vld [vmem:[#allocation5 + $0x48] sm:$0xff] }
 0x3a7   : > { %2388 = vst [vmem:[#allocation10 + $0x10] sm:$0xff] %v4282_v31  ;;  %2389 = vst [vmem:[#allocation10 + $0x30] sm:$0xff] %v4282_v31  ;;  %4158 = vrsqrt.f32 %v2184_v55  ;;  %v2187_v30 = vadd.f32 1e-06, %v2171_v29  ;;  %v2173_v18 = vmul.f32 0.00390625, %v2157_v61  ;;  %v2174_v19 = vmul.f32 0.00390625, %v2158_v60 }
 0x3a8   : > { %2390 = vst [vmem:[#allocation10 + $0x28] sm:$0xff] %v4282_v31  ;;  %2391 = vst [vmem:[#allocation10 + $0x58] sm:$0xff] %v4282_v31  ;;  %v2159_v34 = vld [vmem:[#allocation5 + $0x50] sm:$0xff]  ;;  %4160 = vrsqrt.f32 %v2185_v12  ;;  %v2188_v4 = vadd.f32 1e-06, %v2172_v37  ;;  %v2160_v56 = vld [vmem:[#allocation5 + $0x58] sm:$0xff] }
 0x3a9   : > { %v2175_v36 = vmul.f32 0.00390625, %v2159_v34  ;;  %4162 = vrsqrt.f32 %v2186_v57  ;;  %v2189_v22 = vadd.f32 1e-06, %v2173_v18  ;;  %v2190_v1 = vadd.f32 1e-06, %v2174_v19  ;;  %v2161_v50 = vld [vmem:[#allocation5 + $0x60] sm:$0xff] }
 0x3aa   : > { %v2176_v44 = vmul.f32 0.00390625, %v2160_v56  ;;  %4164 = vrsqrt.f32 %v2187_v30  ;;  %v2177_v49 = vmul.f32 0.00390625, %v2161_v50  ;;  %v2162_v52 = vld [vmem:[#allocation5 + $0x68] sm:$0xff]  ;;  %v2163_v9 = vld [vmem:[#allocation5 + $0x70] sm:$0xff]  ;;  %v2164_v14 = vld [vmem:[#allocation5 + $0x78] sm:$0xff] }
 0x3ab   : > { %v2191_v51 = vadd.f32 1e-06, %v2175_v36  ;;  %4166 = vrsqrt.f32 %v2188_v4  ;;  %v2178_v45 = vmul.f32 0.00390625, %v2162_v52  ;;  %v2179_v59 = vmul.f32 0.00390625, %v2163_v9  ;;  %v2213_v63 = vld [vmem:[#allocation6] sm:$0xff]  ;;  %v2214_v58 = vld [vmem:[#allocation6 + $0x8] sm:$0xff] }
 0x3ac   : > { %v2192_v26 = vadd.f32 1e-06, %v2176_v44  ;;  %4168 = vrsqrt.f32 %v2189_v22  ;;  %v2193_v20 = vadd.f32 1e-06, %v2177_v49  ;;  %v2180_v21 = vmul.f32 0.00390625, %v2164_v14  ;;  %v2215_v38 = vld [vmem:[#allocation6 + $0x10] sm:$0xff] }
 0x3ad   : > { %4170 = vrsqrt.f32 %v2190_v1  ;;  %v2194_v25 = vadd.f32 1e-06, %v2178_v45  ;;  %v2195_v43 = vadd.f32 1e-06, %v2179_v59  ;;  %v2216_v53 = vld [vmem:[#allocation6 + $0x18] sm:$0xff]  ;;  %v2217_v27 = vld [vmem:[#allocation6 + $0x20] sm:$0xff] }
 0x3ae   : > { %4172 = vrsqrt.f32 %v2191_v51  ;;  %v2196_v23 = vadd.f32 1e-06, %v2180_v21  ;;  %v2218_v42 = vld [vmem:[#allocation6 + $0x28] sm:$0xff]  ;;  %v2219_v41 = vld [vmem:[#allocation6 + $0x30] sm:$0xff]  ;;  %v2220_v5 = vld [vmem:[#allocation6 + $0x38] sm:$0xff] }
 0x3af   : > { %4174 = vrsqrt.f32 %v2192_v26  ;;  %v2221_v39 = vld [vmem:[#allocation6 + $0x40] sm:$0xff]  ;;  %v2222_v46 = vld [vmem:[#allocation6 + $0x48] sm:$0xff]  ;;  %v2223_v37 = vld [vmem:[#allocation6 + $0x50] sm:$0xff] }
 0x3b0   : > { %4176 = vrsqrt.f32 %v2193_v20  ;;  %v2224_v19 = vld [vmem:[#allocation6 + $0x58] sm:$0xff]  ;;  %v2225_v22 = vld [vmem:[#allocation6 + $0x60] sm:$0xff]  ;;  %v2226_v49 = vld [vmem:[#allocation6 + $0x68] sm:$0xff] }
 0x3b1   : > { %v5313_v62 = vpop.eup %4152  ;;  %4178 = vrsqrt.f32 %v2194_v25  ;;  %v2227_v14 = vld [vmem:[#allocation6 + $0x70] sm:$0xff] }
 0x3b2   : > { %v5315_v3 = vpop.eup %4154  ;;  %v2229_v47 = vmul.f32 %v5313_v62, %v2213_v63  ;;  %4180 = vrsqrt.f32 %v2195_v43  ;;  %v2228_v43 = vld [vmem:[#allocation6 + $0x78] sm:$0xff] }
 0x3b3   : > { %v5318_v54 = vpop.eup %4156  ;;  %v2230_v0 = vmul.f32 %v5315_v3, %v2214_v58  ;;  %4182 = vrsqrt.f32 %v2196_v23 }
 0x3b4   : > { %v5321_v24 = vpop.eup %4158  ;;  %v2245_v33 = vmax.f32 %v2229_v47, 1e-05  ;;  %v2231_v8 = vmul.f32 %v5318_v54, %v2215_v38 }
 0x3b5   : > { %v5324_v15 = vpop.eup %4160  ;;  %v2246_v13 = vmax.f32 %v2230_v0, 1e-05  ;;  %v2232_v48 = vmul.f32 %v5321_v24, %v2216_v53 }
 0x3b6   : > { %v5329_v10 = vpop.eup %4162  ;;  %4184 = vrcp.f32 %v2245_v33  ;;  %v2247_v32 = vmax.f32 %v2231_v8, 1e-05  ;;  %v2233_v6 = vmul.f32 %v5324_v15, %v2217_v27  ;;  %v2326_v31 = vmul.f32 0.007874016, %v2245_v33 }
 0x3b7   : > { %v5332_v7 = vpop.eup %4164  ;;  %4186 = vrcp.f32 %v2246_v13  ;;  %v2248_v17 = vmax.f32 %v2232_v48, 1e-05  ;;  %v2234_v28 = vmul.f32 %v5329_v10, %v2218_v42  ;;  %v2327_v16 = vmul.f32 0.007874016, %v2246_v13 }
 0x3b8   : > { %v5335_v2 = vpop.eup %4166  ;;  %4188 = vrcp.f32 %v2247_v32  ;;  %v2249_v55 = vmax.f32 %v2233_v6, 1e-05  ;;  %v2235_v12 = vmul.f32 %v5332_v7, %v2219_v41  ;;  %v2344_v40 = vmul.f32 %v5327_v11, %v2326_v31 }
 0x3b9   : > { %v5339_v29 = vpop.eup %4168  ;;  %4190 = vrcp.f32 %v2248_v17  ;;  %v2250_v35 = vmax.f32 %v2234_v28, 1e-05  ;;  %v2236_v57 = vmul.f32 %v5335_v2, %v2220_v5  ;;  %v2345_v61 = vmul.f32 %v5327_v11, %v2327_v16 }
 0x3ba   : > { %v5343_v60 = vpop.eup %4170  ;;  %4192 = vrcp.f32 %v2249_v55  ;;  %v2251_v30 = vmax.f32 %v2235_v12, 1e-05  ;;  %v2237_v18 = vmul.f32 %v5339_v29, %v2221_v39  ;;  %2360 = vst.msk [vmem:[#allocation8] sm:$0xff] %vm2309_vm2, %v2344_v40  ;;  %v2328_v34 = vmul.f32 0.007874016, %v2247_v32 }
 0x3bb   : > { %v5347_v4 = vpop.eup %4172  ;;  %4194 = vrcp.f32 %v2250_v35  ;;  %v2252_v36 = vmax.f32 %v2236_v57, 1e-05  ;;  %v2238_v56 = vmul.f32 %v5343_v60, %v2222_v46  ;;  %2361 = vst.msk [vmem:[#allocation8 + $0x8] sm:$0xff] %vm2309_vm2, %v2345_v61  ;;  %v2329_v1 = vmul.f32 0.007874016, %v2248_v17 }
 0x3bc   : > { %v5351_v44 = vpop.eup %4174  ;;  %4196 = vrcp.f32 %v2251_v30  ;;  %v2253_v50 = vmax.f32 %v2237_v18, 1e-05  ;;  %v2239_v51 = vmul.f32 %v5347_v4, %v2223_v37  ;;  %v2346_v52 = vmul.f32 %v5327_v11, %v2328_v34 }
 0x3bd   : > { %v5355_v26 = vpop.eup %4176  ;;  %4198 = vrcp.f32 %v2252_v36  ;;  %v2254_v45 = vmax.f32 %v2238_v56, 1e-05  ;;  %v2240_v9 = vmul.f32 %v5351_v44, %v2224_v19  ;;  %v2347_v20 = vmul.f32 %v5327_v11, %v2329_v1 }
 0x3be   : > { %v5359_v59 = vpop.eup %4178  ;;  %4200 = vrcp.f32 %v2253_v50  ;;  %v2255_v21 = vmax.f32 %v2239_v51, 1e-05  ;;  %v2241_v25 = vmul.f32 %v5355_v26, %v2225_v22  ;;  %2362 = vst.msk [vmem:[#allocation8 + $0x10] sm:$0xff] %vm2309_vm2, %v2346_v52  ;;  %v2330_v63 = vmul.f32 0.007874016, %v2249_v55 }
 0x3bf   : > { %v5363_v23 = vpop.eup %4180  ;;  %4202 = vrcp.f32 %v2254_v45  ;;  %v2256_v58 = vmax.f32 %v2240_v9, 1e-05  ;;  %v2242_v38 = vmul.f32 %v5359_v59, %v2226_v49  ;;  %2363 = vst.msk [vmem:[#allocation8 + $0x18] sm:$0xff] %vm2309_vm2, %v2347_v20  ;;  %v2331_v47 = vmul.f32 0.007874016, %v2250_v35 }
 0x3c0   : > { %v5367_v53 = vpop.eup %4182  ;;  %4204 = vrcp.f32 %v2255_v21  ;;  %v2257_v0 = vmax.f32 %v2241_v25, 1e-05  ;;  %v2243_v27 = vmul.f32 %v5363_v23, %v2227_v14  ;;  %v2348_v33 = vmul.f32 %v5327_v11, %v2330_v63 }
 0x3c1   : > { %4206 = vrcp.f32 %v2256_v58  ;;  %v2258_v8 = vmax.f32 %v2242_v38, 1e-05  ;;  %v2244_v42 = vmul.f32 %v5367_v53, %v2228_v43  ;;  %v2349_v13 = vmul.f32 %v5327_v11, %v2331_v47 }
 0x3c2   : > { %4208 = vrcp.f32 %v2257_v0  ;;  %v2259_v48 = vmax.f32 %v2243_v27, 1e-05  ;;  %2364 = vst.msk [vmem:[#allocation8 + $0x20] sm:$0xff] %vm2309_vm2, %v2348_v33  ;;  %v2332_v41 = vmul.f32 0.007874016, %v2251_v30 }
 0x3c3   : > { %v2333_v32 = vmul.f32 0.007874016, %v2252_v36  ;;  %v4185_v6 = vpop.eup %4184  ;;  %4210 = vrcp.f32 %v2258_v8  ;;  %v2260_v5 = vmax.f32 %v2244_v42, 1e-05  ;;  %2365 = vst.msk [vmem:[#allocation8 + $0x28] sm:$0xff] %vm2309_vm2, %v2349_v13 }
 0x3c4   : > { %v2334_v31 = vmul.f32 0.007874016, %v2253_v50  ;;  %v2335_v17 = vmul.f32 0.007874016, %v2254_v45  ;;  %v4187_v28 = vpop.eup %4186  ;;  %v2262_v39 = vmul.f32 127.0, %v4185_v6  ;;  %4212 = vrcp.f32 %v2259_v48 }
 0x3c5   : > { %v2350_v16 = vmul.f32 %v5327_v11, %v2332_v41  ;;  %v2351_v55 = vmul.f32 %v5327_v11, %v2333_v32  ;;  %v4189_v12 = vpop.eup %4188  ;;  %v2264_v46 = vmul.f32 127.0, %v4187_v28  ;;  %4214 = vrcp.f32 %v2260_v5 }
 0x3c6   : > { %v2352_v40 = vmul.f32 %v5327_v11, %v2334_v31  ;;  %v2353_v35 = vmul.f32 %v5327_v11, %v2335_v17  ;;  %v4191_v57 = vpop.eup %4190  ;;  %v2293_v37 = vmul.f32 %v5313_v62, %v2262_v39  ;;  %v2266_v61 = vmul.f32 127.0, %v4189_v12 }
 0x3c7   : > { %2366 = vst.msk [vmem:[#allocation8 + $0x30] sm:$0xff] %vm2309_vm2, %v2350_v16  ;;  %2367 = vst.msk [vmem:[#allocation8 + $0x38] sm:$0xff] %vm2309_vm2, %v2351_v55  ;;  %v2336_v30 = vmul.f32 0.007874016, %v2255_v21  ;;  %v2337_v18 = vmul.f32 0.007874016, %v2256_v58  ;;  %v4193_v19 = vpop.eup %4192  ;;  %v2294_v34 = vmul.f32 %v5315_v3, %v2264_v46 }
 0x3c8   : > { %v2268_v36 = vmul.f32 127.0, %v4191_v57  ;;  %2368 = vst.msk [vmem:[#allocation8 + $0x40] sm:$0xff] %vm2309_vm2, %v2352_v40  ;;  %2369 = vst.msk [vmem:[#allocation8 + $0x48] sm:$0xff] %vm2309_vm2, %v2353_v35  ;;  %v2338_v56 = vmul.f32 0.007874016, %v2257_v0  ;;  %v4195_v1 = vpop.eup %4194  ;;  %v2295_v62 = vmul.f32 %v5318_v54, %v2266_v61  ;;  %v2270_v50 = vmul.f32 127.0, %v4193_v19 }
 0x3c9   : > { %v2339_v22 = vmul.f32 0.007874016, %v2258_v8  ;;  %2310 = vst.msk [vmem:[#allocation7] sm:$0xff] %vm2309_vm2, %v2293_v37  ;;  %v2354_v51 = vmul.f32 %v5327_v11, %v2336_v30  ;;  %v2355_v49 = vmul.f32 %v5327_v11, %v2337_v18  ;;  %v4197_v52 = vpop.eup %4196  ;;  %2311 = vst.msk [vmem:[#allocation7 + $0x8] sm:$0xff] %vm2309_vm2, %v2294_v34  ;;  %v2272_v45 = vmul.f32 127.0, %v4195_v1 }
 0x3ca   : > { %v2296_v3 = vmul.f32 %v5321_v24, %v2268_v36  ;;  %v2356_v9 = vmul.f32 %v5327_v11, %v2338_v56  ;;  %v4199_v20 = vpop.eup %4198  ;;  %2312 = vst.msk [vmem:[#allocation7 + $0x10] sm:$0xff] %vm2309_vm2, %v2295_v62  ;;  %v2297_v54 = vmul.f32 %v5324_v15, %v2270_v50  ;;  %v2274_v21 = vmul.f32 127.0, %v4197_v52 }
 0x3cb   : > { %v2357_v14 = vmul.f32 %v5327_v11, %v2339_v22  ;;  %2370 = vst.msk [vmem:[#allocation8 + $0x50] sm:$0xff] %vm2309_vm2, %v2354_v51  ;;  %2371 = vst.msk [vmem:[#allocation8 + $0x58] sm:$0xff] %vm2309_vm2, %v2355_v49  ;;  %v2340_v25 = vmul.f32 0.007874016, %v2259_v48  ;;  %v2341_v43 = vmul.f32 0.007874016, %v2260_v5  ;;  %v4201_v63 = vpop.eup %4200  ;;  %v2298_v24 = vmul.f32 %v5329_v10, %v2272_v45 }
 0x3cc   : > { %2313 = vst.msk [vmem:[#allocation7 + $0x18] sm:$0xff] %vm2309_vm2, %v2296_v3  ;;  %v2276_v58 = vmul.f32 127.0, %v4199_v20  ;;  %2372 = vst.msk [vmem:[#allocation8 + $0x60] sm:$0xff] %vm2309_vm2, %v2356_v9  ;;  %v4203_v38 = vpop.eup %4202  ;;  %v2299_v15 = vmul.f32 %v5332_v7, %v2274_v21  ;;  %v2278_v47 = vmul.f32 127.0, %v4201_v63 }
 0x3cd   : > { %2373 = vst.msk [vmem:[#allocation8 + $0x68] sm:$0xff] %vm2309_vm2, %v2357_v14  ;;  %2314 = vst.msk [vmem:[#allocation7 + $0x20] sm:$0xff] %vm2309_vm2, %v2297_v54  ;;  %v2358_v0 = vmul.f32 %v5327_v11, %v2340_v25  ;;  %v2359_v27 = vmul.f32 %v5327_v11, %v2341_v43  ;;  %v4205_v33 = vpop.eup %4204  ;;  %v2280_v8 = vmul.f32 127.0, %v4203_v38 }
 0x3ce   : > { %2315 = vst.msk [vmem:[#allocation7 + $0x28] sm:$0xff] %vm2309_vm2, %v2298_v24  ;;  %v2300_v10 = vmul.f32 %v5335_v2, %v2276_v58  ;;  %v4207_v42 = vpop.eup %4206  ;;  %2316 = vst.msk [vmem:[#allocation7 + $0x30] sm:$0xff] %vm2309_vm2, %v2299_v15  ;;  %v2301_v13 = vmul.f32 %v5339_v29, %v2278_v47  ;;  %v2282_v48 = vmul.f32 127.0, %v4205_v33 }
 0x3cf   : > { %2374 = vst.msk [vmem:[#allocation8 + $0x70] sm:$0xff] %vm2309_vm2, %v2358_v0  ;;  %2375 = vst.msk [vmem:[#allocation8 + $0x78] sm:$0xff] %vm2309_vm2, %v2359_v27  ;;  %v4209_v7 = vpop.eup %4208  ;;  %v2302_v11 = vmul.f32 %v5343_v60, %v2280_v8  ;;  %v2284_v41 = vmul.f32 127.0, %v4207_v42 }
 0x3d0   : > { %2317 = vst.msk [vmem:[#allocation7 + $0x38] sm:$0xff] %vm2309_vm2, %v2300_v10  ;;  %v4211_v32 = vpop.eup %4210  ;;  %2318 = vst.msk [vmem:[#allocation7 + $0x40] sm:$0xff] %vm2309_vm2, %v2301_v13  ;;  %v2303_v2 = vmul.f32 %v5347_v4, %v2282_v48  ;;  %v2286_v6 = vmul.f32 127.0, %v4209_v7 }
 0x3d1   : > { %v4213_v5 = vpop.eup %4212  ;;  %2319 = vst.msk [vmem:[#allocation7 + $0x48] sm:$0xff] %vm2309_vm2, %v2302_v11  ;;  %v2304_v29 = vmul.f32 %v5351_v44, %v2284_v41  ;;  %v2288_v31 = vmul.f32 127.0, %v4211_v32 }
 0x3d2   : > { %v4215_v17 = vpop.eup %4214  ;;  %2320 = vst.msk [vmem:[#allocation7 + $0x50] sm:$0xff] %vm2309_vm2, %v2303_v2  ;;  %v2305_v28 = vmul.f32 %v5355_v26, %v2286_v6  ;;  %v2290_v39 = vmul.f32 127.0, %v4213_v5 }
 0x3d3   : > { %2321 = vst.msk [vmem:[#allocation7 + $0x58] sm:$0xff] %vm2309_vm2, %v2304_v29  ;;  %v2306_v60 = vmul.f32 %v5359_v59, %v2288_v31  ;;  %v2292_v16 = vmul.f32 127.0, %v4215_v17 }
 0x3d4   : > { %2322 = vst.msk [vmem:[#allocation7 + $0x60] sm:$0xff] %vm2309_vm2, %v2305_v28  ;;  %v2307_v4 = vmul.f32 %v5363_v23, %v2290_v39 }
 0x3d5   : > { %2323 = vst.msk [vmem:[#allocation7 + $0x68] sm:$0xff] %vm2309_vm2, %v2306_v60  ;;  %v2308_v44 = vmul.f32 %v5367_v53, %v2292_v16 }
 0x3d6   : > { %2324 = vst.msk [vmem:[#allocation7 + $0x70] sm:$0xff] %vm2309_vm2, %v2307_v4 }
 0x3d7   : > { %2325 = vst.msk [vmem:[#allocation7 + $0x78] sm:$0xff] %vm2309_vm2, %v2308_v44 }
 0x3d8 PF: > { %p3312_p4 = scmp.ne.s32.totalorder %s4269_s18, 1 }
 0x3da   : > { %2394 = sbr.rel (%p3312_p4) target bundleno = 1422 (0x58e), region = 60 }
 0x3df   : > { %v2438_v26 = vld [vmem:[#allocation7 + $0x40] sm:$0xff]  ;;  %v4283_v59 = vmov 0   ;;  %v2439_v23 = vld [vmem:[#allocation7 + $0x48] sm:$0xff]  ;;  %v2433_v46 = vld [vmem:[#allocation7 + $0x18] sm:$0xff] }
 0x3e0   : > { %v2430_v55 = vld [vmem:[#allocation7] sm:$0xff]  ;;  %4217 = vset.pattern.permute.xlu1 %v4283_v59  ;;  %4216 = vset.pattern.permute.xlu0 %v4283_v59  ;;  %v2431_v12 = vld [vmem:[#allocation7 + $0x8] sm:$0xff]  ;;  %v2432_v40 = vld [vmem:[#allocation7 + $0x10] sm:$0xff] }
 0x3e1   : > { %2488 = vperm.xlu1 %4217, %v2438_v26   ;;  %2448 = vperm.xlu0 %4216, %v2430_v55   ;;  %v4218_v53 = vld [vmem:[%s5966_s4 + $0x78] sm:$0xff]   ;;  %v4220_v57 = vld [vmem:[%s5966_s4 + $0x70] sm:$0xff]   ;;  %v4222_v18 = vld [vmem:[%s5966_s4 + $0x68] sm:$0xff]  }
 0x3e2   : > { %v4219_v35 = vld [vmem:[%s5966_s4 + $0x38] sm:$0xff]   ;;  %3398 = vmatprep.subr.bf16.mxu0 %v4218_v53  ;;  %3462 = vmatprep.subr.bf16.mxu1 %v4218_v53  ;;  %v4221_v37 = vld [vmem:[%s5966_s4 + $0x30] sm:$0xff]   ;;  %v4223_v19 = vld [vmem:[%s5966_s4 + $0x28] sm:$0xff]  }
 0x3e3   : > { %3399 = vmatpush3.bf16.msra.mxu0 %v4219_v35  ;;  %3470 = vmatpush3.bf16.msra.mxu1 %v4219_v35  ;;  %v2441_v61 = vld [vmem:[#allocation7 + $0x58] sm:$0xff]  ;;  %v2440_v30 = vld [vmem:[#allocation7 + $0x50] sm:$0xff]  ;;  %v2435_v34 = vld [vmem:[#allocation7 + $0x28] sm:$0xff] }
 0x3e4   : > { %3400 = vmatprep.subr.bf16.mxu0 %v4220_v57  ;;  %3463 = vmatprep.subr.bf16.mxu1 %v4220_v57  ;;  %v2434_v36 = vld [vmem:[#allocation7 + $0x20] sm:$0xff]  ;;  %v2443_v1 = vld [vmem:[#allocation7 + $0x68] sm:$0xff]  ;;  %v4226_v50 = vld [vmem:[%s5966_s4 + $0x58] sm:$0xff]  }
 0x3e5   : > { %2493 = vperm.xlu1 %4217, %v2439_v23   ;;  %2453 = vperm.xlu0 %4216, %v2431_v12   ;;  %v4224_v56 = vld [vmem:[%s5966_s4 + $0x60] sm:$0xff]   ;;  %v4227_v51 = vld [vmem:[%s5966_s4 + $0x18] sm:$0xff]   ;;  %v2436_v52 = vld [vmem:[#allocation7 + $0x30] sm:$0xff] }
 0x3e6   : > { %v4225_v22 = vld [vmem:[%s5966_s4 + $0x20] sm:$0xff]   ;;  %v2437_v49 = vld [vmem:[#allocation7 + $0x38] sm:$0xff]  ;;  %v4228_v3 = vld [vmem:[%s5966_s4 + $0x50] sm:$0xff]  }
 0x3e7   : > { %3401 = vmatpush3.bf16.msra.mxu0 %v4221_v37  ;;  %3471 = vmatpush3.bf16.msra.mxu1 %v4221_v37  ;;  %v2442_v62 = vld [vmem:[#allocation7 + $0x60] sm:$0xff]  ;;  %v2445_v45 = vld [vmem:[#allocation7 + $0x78] sm:$0xff]  ;;  %v4229_v9 = vld [vmem:[%s5966_s4 + $0x10] sm:$0xff]  }
 0x3e8   : > { %3402 = vmatprep.subr.bf16.mxu0 %v4222_v18  ;;  %3464 = vmatprep.subr.bf16.mxu1 %v4222_v18  ;;  %v2444_v14 = vld [vmem:[#allocation7 + $0x70] sm:$0xff]  ;;  %v4230_v20 = vld [vmem:[%s5966_s4 + $0x48] sm:$0xff]   ;;  %v4232_v21 = vld [vmem:[%s5966_s4 + $0x40] sm:$0xff]  }
 0x3e9   : > { %2463 = vperm.xlu1 %4217, %v2433_v46   ;;  %2458 = vperm.xlu0 %4216, %v2432_v40   ;;  %v4231_v54 = vld [vmem:[%s5966_s4 + $0x8] sm:$0xff]   ;;  %v4233_v25 = vld [vmem:[%s5966_s4] sm:$0xff]   ;;  %v2414_v43 = vld [vmem:[#allocation9 + $0x38] sm:$0xff] }
 0x3ea   : > { %v2415_v63 = vld [vmem:[#allocation9 + $0x58] sm:$0xff]  ;;  %v2398_v24 = vld [vmem:[#allocation9 + $0xb0] sm:$0xff]  ;;  %v2399_v58 = vld [vmem:[#allocation9] sm:$0xff] }
 0x3eb   : > { %3403 = vmatpush3.bf16.msra.mxu0 %v4223_v19  ;;  %3472 = vmatpush3.bf16.msra.mxu1 %v4223_v19  ;;  %v2416_v10 = vld [vmem:[#allocation9 + $0x40] sm:$0xff]  ;;  %v2417_v8 = vld [vmem:[#allocation9 + $0xc8] sm:$0xff]  ;;  %v2400_v7 = vld [vmem:[#allocation9 + $0xd8] sm:$0xff] }
 0x3ec   : > { %3404 = vmatprep.subr.bf16.mxu0 %v4224_v56  ;;  %3465 = vmatprep.subr.bf16.mxu1 %v4224_v56  ;;  %v2401_v11 = vld [vmem:[#allocation9 + $0x18] sm:$0xff]  ;;  %v2404_v4 = vld [vmem:[#allocation9 + $0x30] sm:$0xff]  ;;  %v2405_v44 = vld [vmem:[#allocation9 + $0x48] sm:$0xff] }
 0x3ed   : > { %2503 = vperm.xlu1 %4217, %v2441_v61   ;;  %2498 = vperm.xlu0 %4216, %v2440_v30   ;;  %v2402_v26 = vld [vmem:[#allocation9 + $0x50] sm:$0xff]  ;;  %v2403_v53 = vld [vmem:[#allocation9 + $0x68] sm:$0xff] }
 0x3ef   : > { %3405 = vmatpush3.bf16.msra.mxu0 %v4225_v22  ;;  %3473 = vmatpush3.bf16.msra.mxu1 %v4225_v22 }
 0x3f0   : > { %3406 = vmatprep.subr.bf16.mxu0 %v4226_v50  ;;  %3466 = vmatprep.subr.bf16.mxu1 %v4226_v50 }
 0x3f1   : > { %2473 = vperm.xlu1 %4217, %v2435_v34   ;;  %2468 = vperm.xlu0 %4216, %v2434_v36  }
 0x3f3   : > { %3407 = vmatpush3.bf16.msra.mxu0 %v4227_v51  ;;  %3474 = vmatpush3.bf16.msra.mxu1 %v4227_v51 }
 0x3f4   : > { %3408 = vmatprep.subr.bf16.mxu0 %v4228_v3  ;;  %3467 = vmatprep.subr.bf16.mxu1 %v4228_v3 }
 0x3f5   : > { %2513 = vperm.xlu1 %4217, %v2443_v1   ;;  %2508 = vperm.xlu0 %4216, %v2442_v62  }
 0x3f7   : > { %3409 = vmatpush3.bf16.msra.mxu0 %v4229_v9  ;;  %3475 = vmatpush3.bf16.msra.mxu1 %v4229_v9  ;;  %v2421_v9 = vld [vmem:[#allocation9 + $0xc0] sm:$0xff] }
 0x3f8   : > { %3410 = vmatprep.subr.bf16.mxu0 %v4230_v20  ;;  %3468 = vmatprep.subr.bf16.mxu1 %v4230_v20 }
 0x3f9   : > { %2483 = vperm.xlu1 %4217, %v2437_v49   ;;  %2478 = vperm.xlu0 %4216, %v2436_v52  }
 0x3fb   : > { %3411 = vmatpush3.bf16.msra.mxu0 %v4231_v54  ;;  %3476 = vmatpush3.bf16.msra.mxu1 %v4231_v54 }
 0x3fc   : > { %3412 = vmatprep.subr.bf16.mxu0 %v4232_v21  ;;  %3469 = vmatprep.subr.bf16.mxu1 %v4232_v21 }
 0x3fd   : > { %2523 = vperm.xlu1 %4217, %v2445_v45   ;;  %2518 = vperm.xlu0 %4216, %v2444_v14   ;;  %v2420_v45 = vld [vmem:[#allocation9 + $0x70] sm:$0xff]  ;;  %v2418_v14 = vld [vmem:[#allocation9 + $0xe0] sm:$0xff] }
 0x3ff   : > { %3413 = vmatpush3.bf16.msra.mxu0 %v4233_v25  ;;  %3477 = vmatpush3.bf16.msra.mxu1 %v4233_v25 }
 0x45c   : > { %v2489_v38 = vpop.permute.xlu1 %2488  ;;  %v2449_v15 = vpop.permute.xlu0 %2448 }
 0x45d   : > { %v5476_v47 = vmul.f32 %v2489_v38, %v2414_v43  ;;  %v5478_v0 = vmul.f32 %v2489_v38, %v2415_v63  ;;  %v5480_v27 = vmul.f32 %v2449_v15, %v2398_v24  ;;  %v5482_v33 = vmul.f32 %v2449_v15, %v2399_v58  ;;  %v2419_v24 = vld [vmem:[#allocation9 + $0x90] sm:$0xff] }
 0x45f   : > { %v3736_v42 = vcvt.f32.s32 %v5476_v47  ;;  %v3608_v48 = vcvt.f32.s32 %v5480_v27  ;;  %v3744_v41 = vcvt.f32.s32 %v5478_v0  ;;  %v3611_v32 = vand.u32 2147483648, %v5480_v27 }
 0x460   : > { %v3616_v2 = vcvt.f32.s32 %v5482_v33  ;;  %v2494_v6 = vpop.permute.xlu1 %2493  ;;  %v2454_v5 = vpop.permute.xlu0 %2453  ;;  %v3614_v29 = vand.u32 2147483647, %v5482_v33  ;;  %v3619_v59 = vand.u32 2147483648, %v5482_v33 }
 0x461   : > { %v5491_v31 = vcvt.s32.f32 %v3736_v42  ;;  %v5493_v17 = vcvt.s32.f32 %v3608_v48  ;;  %v5495_v28 = vmul.f32 %v2494_v6, %v2416_v10  ;;  %v5497_v39 = vmul.f32 %v2494_v6, %v2417_v8 }
 0x462   : > { %v5499_v60 = vmul.f32 %v2454_v5, %v2400_v7  ;;  %v5501_v16 = vmul.f32 %v2454_v5, %v2401_v11  ;;  %v5503_v55 = vcvt.s32.f32 %v3616_v2  ;;  %v2422_v2 = vld [vmem:[#allocation9 + $0xa8] sm:$0xff]  ;;  %vm5594_vm3 = vcmp.lt.f32.partialorder %v3614_v29, 8388608.0 }
 0x463   : > { %v3610_v12 = vand.u32 2147483647, %v5493_v17  ;;  %v3752_v46 = vcvt.f32.s32 %v5495_v28  ;;  %v3760_v35 = vcvt.f32.s32 %v5497_v39  ;;  %v3758_v23 = vand.u32 2147483647, %v5497_v39 }
 0x464   : > { %v3624_v57 = vcvt.f32.s32 %v5499_v60  ;;  %v3632_v61 = vcvt.f32.s32 %v5501_v16  ;;  %v2464_v30 = vpop.permute.xlu1 %2463  ;;  %v2459_v18 = vpop.permute.xlu0 %2458  ;;  %v3618_v62 = vand.u32 2147483647, %v5503_v55  ;;  %v3630_v50 = vand.u32 2147483647, %v5501_v16 }
 0x465   : > { %v5514_v19 = vcvt.s32.f32 %v3752_v46  ;;  %v5516_v34 = vmul.f32 %v2464_v30, %v2404_v4  ;;  %v5518_v36 = vmul.f32 %v2464_v30, %v2405_v44  ;;  %v5520_v56 = vmul.f32 %v2459_v18, %v2402_v26  ;;  %v2409_v30 = vld [vmem:[#allocation9 + $0xb8] sm:$0xff] }
 0x466   : > { %v5522_v22 = vcvt.s32.f32 %v3624_v57  ;;  %v5524_v1 = vmul.f32 %v2459_v18, %v2403_v53  ;;  %v2408_v57 = vld [vmem:[#allocation9 + $0xe8] sm:$0xff]  ;;  %vm5640_vm4 = vcmp.lt.f32.partialorder %v3630_v50, 8388608.0  ;;  %v3635_v55 = vand.u32 2147483648, %v5501_v16 }
 0x467   : > { %v3656_v49 = vcvt.f32.s32 %v5516_v34  ;;  %v3664_v3 = vcvt.f32.s32 %v5518_v36  ;;  %v3640_v21 = vcvt.f32.s32 %v5520_v56  ;;  %v3742_v50 = vand.u32 2147483647, %v5478_v0 }
 0x468   : > { %v2504_v43 = vpop.permute.xlu1 %2503  ;;  %v2499_v63 = vpop.permute.xlu0 %2498  ;;  %v3648_v15 = vcvt.f32.s32 %v5524_v1  ;;  %vm5672_vm6 = vcmp.lt.f32.partialorder %v3758_v23, 8388608.0  ;;  %v6001_v23 = vand.u32 2147483648, %v5499_v60 }
 0x469   : > { %v5536_v58 = vcvt.s32.f32 %v3656_v49  ;;  %v5538_v38 = vcvt.s32.f32 %v3664_v3  ;;  %v5542_v8 = vcvt.s32.f32 %v3640_v21  ;;  %v5544_v42 = vmul.f32 %v2504_v43, %v2420_v45  ;;  %v2406_v49 = vld [vmem:[#allocation9 + $0x80] sm:$0xff]  ;;  %v2407_v21 = vld [vmem:[#allocation9 + $0x88] sm:$0xff]  ;;  %v2423_v45 = vld [vmem:[#allocation9 + $0xd0] sm:$0xff] }
 0x46a   : > { %v5546_v48 = vmul.f32 %v2504_v43, %v2421_v9  ;;  %v5548_v7 = vmul.f32 %v2499_v63, %v2418_v14  ;;  %v5552_v6 = vcvt.s32.f32 %v3648_v15  ;;  %v5554_v5 = vmul.f32 %v2499_v63, %v2419_v24 }
 0x46b   : > { %v3784_v44 = vcvt.f32.s32 %v5544_v42  ;;  %vm5660_vm5 = vcmp.lt.f32.partialorder %v3742_v50, 8388608.0 }
 0x46c   : > { %v3792_v46 = vcvt.f32.s32 %v5546_v48  ;;  %v2474_v53 = vpop.permute.xlu1 %2473  ;;  %v2469_v18 = vpop.permute.xlu0 %2468  ;;  %v3768_v9 = vcvt.f32.s32 %v5548_v7  ;;  %v3776_v24 = vcvt.f32.s32 %v5554_v5 }
 0x46d   : > { %v5564_v43 = vcvt.s32.f32 %v3784_v44  ;;  %v5572_v52 = vmul.f32 %v2474_v53, %v2408_v57  ;;  %v5574_v11 = vmul.f32 %v2474_v53, %v2409_v30  ;;  %v5576_v25 = vmul.f32 %v2469_v18, %v2406_v49  ;;  %v2424_v30 = vld [vmem:[#allocation9 + $0x10] sm:$0xff]  ;;  %v2425_v49 = vld [vmem:[#allocation9 + $0x28] sm:$0xff] }
 0x46e   : > { %v5566_v63 = vcvt.s32.f32 %v3792_v46  ;;  %v5570_v26 = vcvt.s32.f32 %v3768_v9  ;;  %v5580_v44 = vcvt.s32.f32 %v3776_v24  ;;  %v5582_v46 = vmul.f32 %v2469_v18, %v2407_v21 }
 0x46f   : > { %v3688_v15 = vcvt.f32.s32 %v5572_v52  ;;  %v3696_v57 = vcvt.f32.s32 %v5574_v11  ;;  %v3672_v18 = vcvt.f32.s32 %v5576_v25 }
 0x470   : > { %v2514_v53 = vpop.permute.xlu1 %2513  ;;  %v2509_v54 = vpop.permute.xlu0 %2508  ;;  %v3680_v3 = vcvt.f32.s32 %v5582_v46 }
 0x471   : > { %v5598_v14 = vcvt.s32.f32 %v3688_v15  ;;  %v5600_v10 = vcvt.s32.f32 %v3696_v57  ;;  %v5604_v24 = vcvt.s32.f32 %v3672_v18  ;;  %v5606_v40 = vmul.f32 %v2514_v53, %v2424_v30 }
 0x472   : > { %v5608_v21 = vmul.f32 %v2514_v53, %v2425_v49  ;;  %v5610_v51 = vmul.f32 %v2509_v54, %v2422_v2  ;;  %v5614_v15 = vcvt.s32.f32 %v3680_v3  ;;  %v5616_v57 = vmul.f32 %v2509_v54, %v2423_v45 }
 0x473   : > { %v3816_v4 = vcvt.f32.s32 %v5606_v40  ;;  %v3620_v18 = vor.u32 %v3619_v59, %v3618_v62  ;;  %v3734_v2 = vand.u32 2147483647, %v5476_v47 }
 0x474   : > { %v3824_v30 = vcvt.f32.s32 %v5608_v21  ;;  %v3800_v49 = vcvt.f32.s32 %v5610_v51  ;;  %v3808_v45 = vcvt.f32.s32 %v5616_v57 }
 0x475   : > { %v5626_v3 = vcvt.s32.f32 %v3816_v4  ;;  %v3633_v4 = vcvt.s32.f32 %v3632_v61  ;;  %v3621_v59 = vsel %vm5594_vm3, %v3620_v18, %v5482_v33  ;;  %v3761_v33 = vcvt.s32.f32 %v3760_v35 }
 0x476   : > { %v5628_v54 = vcvt.s32.f32 %v3824_v30  ;;  %v5632_v13 = vcvt.s32.f32 %v3800_v49  ;;  %v5648_v49 = vcvt.s32.f32 %v3808_v45  ;;  %v2591_v61 = vmax.f32 %v3621_v59, -128.0 }
 0x477   : > { %v3634_v62 = vand.u32 2147483647, %v3633_v4  ;;  %v3745_v30 = vcvt.s32.f32 %v3744_v41  ;;  %v3747_v45 = vand.u32 2147483648, %v5478_v0  ;;  %v3763_v4 = vand.u32 2147483648, %v5497_v39 }
 0x478   : > { %v2623_v9 = vmin.f32 %v2591_v61, 127.0  ;;  %v3606_v59 = vand.u32 2147483647, %v5480_v27  ;;  %v3612_v35 = vor.u32 %v3611_v32, %v3610_v12  ;;  %v3622_v61 = vand.u32 2147483647, %v5499_v60 }
 0x479   : > { %v3636_v29 = vor.u32 %v3635_v55, %v3634_v62  ;;  %v3746_v18 = vand.u32 2147483647, %v3745_v30  ;;  %v3762_v62 = vand.u32 2147483647, %v3761_v33  ;;  %vm5694_vm9 = vcmp.lt.f32.partialorder %v3734_v2, 8388608.0 }
 0x47a   : > { %vm3607_vm7 = vcmp.lt.f32.partialorder %v3606_v59, 8388608.0  ;;  %vm3623_vm8 = vcmp.lt.f32.partialorder %v3622_v61, 8388608.0  ;;  %v2413_v59 = vld [vmem:[#allocation9 + $0x78] sm:$0xff]  ;;  %v3750_v55 = vand.u32 2147483647, %v5495_v28 }
 0x47b   : > { %v3637_v41 = vsel %vm5640_vm4, %v3636_v29, %v5501_v16  ;;  %v3748_v30 = vor.u32 %v3747_v45, %v3746_v18  ;;  %v3764_v53 = vor.u32 %v3763_v4, %v3762_v62  ;;  %v3613_v20 = vsel %vm3607_vm7, %v3612_v35, %v5480_v27  ;;  %v2484_v18 = vpop.permute.xlu1 %2483  ;;  %v2412_v4 = vld [vmem:[#allocation9 + $0x8] sm:$0xff]  ;;  %v2479_v35 = vpop.permute.xlu0 %2478 }
 0x47c   : > { %v2593_v50 = vmax.f32 %v3637_v41, -128.0  ;;  %v6000_v16 = vand.u32 2147483647, %v5522_v22  ;;  %v2590_v17 = vmax.f32 %v3613_v20, -128.0  ;;  %v2410_v20 = vld [vmem:[#allocation9 + $0x60] sm:$0xff]  ;;  %v5707_v2 = vmul.f32 %v2484_v18, %v2412_v4 }
 0x47d   : > { %v3749_v32 = vsel %vm5660_vm5, %v3748_v30, %v5478_v0  ;;  %v3765_v12 = vsel %vm5672_vm6, %v3764_v53, %v5497_v39  ;;  %v6004_v39 = vand.u32 2147483647, %v5491_v31  ;;  %v6005_v53 = vand.u32 2147483648, %v5476_v47 }
 0x47e   : > { %v3628_v29 = vor.u32 %v6001_v23, %v6000_v16  ;;  %v2625_v33 = vmin.f32 %v2593_v50, 127.0  ;;  %v2607_v45 = vmax.f32 %v3749_v32, -128.0  ;;  %v2609_v62 = vmax.f32 %v3765_v12, -128.0  ;;  %v2411_v50 = vld [vmem:[#allocation9 + $0xf0] sm:$0xff] }
 0x47f   : > { %v2622_v0 = vmin.f32 %v2590_v17, 127.0  ;;  %v6006_v61 = vand.u32 2147483647, %v5514_v19  ;;  %v6007_v16 = vand.u32 2147483648, %v5495_v28  ;;  %vm3751_vm10 = vcmp.lt.f32.partialorder %v3750_v55, 8388608.0 }
 0x480   : > { %v3629_v27 = vsel %vm3623_vm8, %v3628_v29, %v5499_v60  ;;  %v2655_v41 = vpack.c.bf16 %v2625_v33, %v2623_v9  ;;  %v2639_v30 = vmin.f32 %v2607_v45, 127.0  ;;  %v3740_v60 = vor.u32 %v6005_v53, %v6004_v39 }
 0x481   : > { %v2592_v37 = vmax.f32 %v3629_v27, -128.0  ;;  %v3756_v23 = vor.u32 %v6007_v16, %v6006_v61  ;;  %v2641_v9 = vmin.f32 %v2609_v62, 127.0  ;;  %v5709_v33 = vmul.f32 %v2484_v18, %v2413_v59  ;;  %v2524_v61 = vpop.permute.xlu1 %2523  ;;  %v2428_v16 = vld [vmem:[#allocation9 + $0x20] sm:$0xff] }
 0x482   : > { %2846 = vmatprep.mubr.bf16.mxu0 %v2655_v41  ;;  %v3741_v31 = vsel %vm5694_vm9, %v3740_v60, %v5476_v47  ;;  %v5714_v32 = vmul.f32 %v2479_v35, %v2410_v20  ;;  %v5716_v17 = vmul.f32 %v2479_v35, %v2411_v50  ;;  %v3720_v4 = vcvt.f32.s32 %v5707_v2 }
 0x483   : > { %v2624_v29 = vmin.f32 %v2592_v37, 127.0  ;;  %v2663_v19 = vpack.c.bf16 %v2641_v9, %v2639_v30  ;;  %v3757_v45 = vsel %vm3751_vm10, %v3756_v23, %v5495_v28  ;;  %v2606_v27 = vmax.f32 %v3741_v31, -128.0  ;;  %v2429_v23 = vld [vmem:[#allocation9 + $0x98] sm:$0xff] }
 0x484   : > { %v2608_v41 = vmax.f32 %v3757_v45, -128.0  ;;  %v3728_v59 = vcvt.f32.s32 %v5709_v33  ;;  %v3704_v62 = vcvt.f32.s32 %v5714_v32  ;;  %v5725_v35 = vcvt.s32.f32 %v3720_v4  ;;  %v2426_v45 = vld [vmem:[#allocation9 + $0xa0] sm:$0xff] }
 0x485   : > { %v2654_v12 = vpack.c.bf16 %v2624_v29, %v2622_v0  ;;  %2878 = vmatprep.mubr.bf16.mxu1 %v2663_v19  ;;  %v2638_v47 = vmin.f32 %v2606_v27, 127.0  ;;  %v3712_v20 = vcvt.f32.s32 %v5716_v17  ;;  %v3715_v30 = vand.u32 2147483648, %v5716_v17  ;;  %v2427_v27 = vld [vmem:[#allocation9 + $0xf8] sm:$0xff] }
 0x486   : > { %v2640_v0 = vmin.f32 %v2608_v41, 127.0  ;;  %v5727_v28 = vcvt.s32.f32 %v3728_v59  ;;  %v5730_v50 = vcvt.s32.f32 %v3704_v62  ;;  %v3646_v39 = vand.u32 2147483647, %v5524_v1 }
 0x487   : > { %2847 = vmatmul.mubr.bf16.vlgmr.msra.gmra.mxu0 %v2654_v12  ;;  %v6008_v53 = vand.u32 2147483647, %v5552_v6  ;;  %v6009_v60 = vand.u32 2147483648, %v5524_v1  ;;  %v5740_v19 = vcvt.s32.f32 %v3712_v20  ;;  %v2519_v12 = vpop.permute.xlu0 %2518  ;;  %v3662_v6 = vand.u32 2147483647, %v5518_v36 }
 0x488   : > { %v2662_v9 = vpack.c.bf16 %v2640_v0, %v2638_v47  ;;  %vm3647_vm11 = vcmp.lt.f32.partialorder %v3646_v39, 8388608.0  ;;  %v6010_v4 = vand.u32 2147483647, %v5538_v38  ;;  %v6011_v59 = vand.u32 2147483648, %v5518_v36 }
 0x489   : > { %v3652_v55 = vor.u32 %v6009_v60, %v6008_v53  ;;  %v3714_v47 = vand.u32 2147483647, %v5740_v19  ;;  %v5750_v20 = vmul.f32 %v2524_v61, %v2428_v16  ;;  %v5752_v53 = vmul.f32 %v2524_v61, %v2429_v23 }
 0x48a   : > { %v3668_v62 = vor.u32 %v6011_v59, %v6010_v4  ;;  %2879 = vmatmul.mubr.bf16.vlgmr.msra.gmra.mxu1 %v2662_v9  ;;  %vm3663_vm12 = vcmp.lt.f32.partialorder %v3662_v6, 8388608.0  ;;  %v5754_v18 = vmul.f32 %v2519_v12, %v2426_v45  ;;  %v5756_v39 = vmul.f32 %v2519_v12, %v2427_v27 }
 0x48b   : > { %v3653_v0 = vsel %vm3647_vm11, %v3652_v55, %v5524_v1  ;;  %v3848_v9 = vcvt.f32.s32 %v5750_v20  ;;  %v3851_v4 = vand.u32 2147483648, %v5750_v20  ;;  %v3856_v61 = vcvt.f32.s32 %v5752_v53 }
 0x48c   : > { %v2595_v60 = vmax.f32 %v3653_v0, -128.0  ;;  %v3669_v38 = vsel %vm3663_vm12, %v3668_v62, %v5518_v36  ;;  %v3859_v23 = vand.u32 2147483648, %v5752_v53  ;;  %v3832_v45 = vcvt.f32.s32 %v5754_v18 }
 0x48d   : > { %v2597_v59 = vmax.f32 %v3669_v38, -128.0  ;;  %v3849_v16 = vcvt.s32.f32 %v3848_v9  ;;  %v3857_v27 = vcvt.s32.f32 %v3856_v61  ;;  %v3835_v6 = vand.u32 2147483648, %v5754_v18 }
 0x48e   : > { %v2627_v1 = vmin.f32 %v2595_v60, 127.0  ;;  %v3833_v38 = vcvt.s32.f32 %v3832_v45  ;;  %v3840_v60 = vcvt.f32.s32 %v5756_v39  ;;  %v3843_v29 = vand.u32 2147483648, %v5756_v39 }
 0x48f   : > { %v2629_v36 = vmin.f32 %v2597_v59, 127.0  ;;  %v3850_v0 = vand.u32 2147483647, %v3849_v16  ;;  %v3858_v9 = vand.u32 2147483647, %v3857_v27  ;;  %v6013_v55 = vand.u32 2147483648, %v5554_v5 }
 0x490   : > { %v3774_v41 = vand.u32 2147483647, %v5554_v5  ;;  %v6012_v12 = vand.u32 2147483647, %v5580_v44  ;;  %v3834_v22 = vand.u32 2147483647, %v3833_v38  ;;  %v3841_v31 = vcvt.s32.f32 %v3840_v60 }
 0x491   : > { %v2657_v37 = vpack.c.bf16 %v2629_v36, %v2627_v1  ;;  %v5776_v61 = vor.u32 %v3851_v4, %v3850_v0  ;;  %v3790_v16 = vand.u32 2147483647, %v5546_v48  ;;  %v5779_v45 = vor.u32 %v3859_v23, %v3858_v9 }
 0x492   : > { %v3780_v59 = vor.u32 %v6013_v55, %v6012_v12  ;;  %vm3775_vm13 = vcmp.lt.f32.partialorder %v3774_v41, 8388608.0  ;;  %v6014_v1 = vand.u32 2147483647, %v5566_v63  ;;  %v6015_v36 = vand.u32 2147483648, %v5546_v48 }
 0x493   : > { %2854 = vmatprep.mubr.bf16.mxu0 %v2657_v37  ;;  %v3638_v44 = vand.u32 2147483647, %v5520_v56  ;;  %v5786_v62 = vor.u32 %v3835_v6, %v3834_v22  ;;  %v3842_v55 = vand.u32 2147483647, %v3841_v31  ;;  %vm3791_vm14 = vcmp.lt.f32.partialorder %v3790_v16, 8388608.0 }
 0x494   : > { %v3796_v27 = vor.u32 %v6015_v36, %v6014_v1  ;;  %v3781_v4 = vsel %vm3775_vm13, %v3780_v59, %v5554_v5  ;;  %v6016_v37 = vand.u32 2147483647, %v5542_v8  ;;  %v6017_v41 = vand.u32 2147483648, %v5520_v56 }
 0x495   : > { %v2611_v0 = vmax.f32 %v3781_v4, -128.0  ;;  %vm3639_vm15 = vcmp.lt.f32.partialorder %v3638_v44, 8388608.0  ;;  %v5794_v23 = vor.u32 %v3843_v29, %v3842_v55  ;;  %v3654_v60 = vand.u32 2147483647, %v5516_v34 }
 0x496   : > { %v3797_v12 = vsel %vm3791_vm14, %v3796_v27, %v5546_v48  ;;  %v3644_v63 = vor.u32 %v6017_v41, %v6016_v37  ;;  %v6018_v22 = vand.u32 2147483647, %v5536_v58  ;;  %v6019_v31 = vand.u32 2147483648, %v5516_v34 }
 0x497   : > { %v2613_v38 = vmax.f32 %v3797_v12, -128.0  ;;  %v2643_v6 = vmin.f32 %v2611_v0, 127.0  ;;  %v3766_v9 = vand.u32 2147483647, %v5548_v7  ;;  %v6020_v8 = vand.u32 2147483647, %v5570_v26 }
 0x498   : > { %v3660_v5 = vor.u32 %v6019_v31, %v6018_v22  ;;  %v3645_v48 = vsel %vm3639_vm15, %v3644_v63, %v5520_v56  ;;  %v6021_v59 = vand.u32 2147483648, %v5548_v7  ;;  %vm3655_vm0 = vcmp.lt.f32.partialorder %v3654_v60, 8388608.0 }
 0x499   : > { %v2645_v29 = vmin.f32 %v2613_v38, 127.0  ;;  %v2594_v1 = vmax.f32 %v3645_v48, -128.0  ;;  %v3782_v36 = vand.u32 2147483647, %v5544_v42  ;;  %vm3767_vm1 = vcmp.lt.f32.partialorder %v3766_v9, 8388608.0 }
 0x49a   : > { %v3772_v16 = vor.u32 %v6021_v59, %v6020_v8  ;;  %v3661_v58 = vsel %vm3655_vm0, %v3660_v5, %v5516_v34  ;;  %v6022_v27 = vand.u32 2147483647, %v5564_v43  ;;  %v6023_v44 = vand.u32 2147483648, %v5544_v42 }
 0x49b   : > { %v3678_v55 = vand.u32 2147483647, %v5582_v46  ;;  %v2665_v4 = vpack.c.bf16 %v2645_v29, %v2643_v6  ;;  %v2596_v26 = vmax.f32 %v3661_v58, -128.0  ;;  %v2626_v12 = vmin.f32 %v2594_v1, 127.0 }
 0x49c   : > { %v3788_v56 = vor.u32 %v6023_v44, %v6022_v27  ;;  %v3773_v0 = vsel %vm3767_vm1, %v3772_v16, %v5548_v7  ;;  %vm3783_vm2 = vcmp.lt.f32.partialorder %v3782_v36, 8388608.0  ;;  %v6024_v41 = vand.u32 2147483647, %v5614_v15 }
 0x49d   : > { %v2610_v37 = vmax.f32 %v3773_v0, -128.0  ;;  %vm3679_vm3 = vcmp.lt.f32.partialorder %v3678_v55, 8388608.0  ;;  %v6025_v34 = vand.u32 2147483648, %v5582_v46  ;;  %2886 = vmatprep.mubr.bf16.mxu1 %v2665_v4  ;;  %v2628_v43 = vmin.f32 %v2596_v26, 127.0 }
 0x49e   : > { %v3789_v38 = vsel %vm3783_vm2, %v3788_v56, %v5544_v42  ;;  %v3694_v60 = vand.u32 2147483647, %v5574_v11  ;;  %v6026_v22 = vand.u32 2147483647, %v5600_v10  ;;  %v6027_v31 = vand.u32 2147483648, %v5574_v11 }
 0x49f   : > { %v3684_v63 = vor.u32 %v6025_v34, %v6024_v41  ;;  %v2612_v7 = vmax.f32 %v3789_v38, -128.0  ;;  %v2642_v6 = vmin.f32 %v2610_v37, 127.0  ;;  %v3806_v15 = vand.u32 2147483647, %v5616_v57 }
 0x4a0   : > { %v3700_v5 = vor.u32 %v6027_v31, %v6026_v22  ;;  %v2656_v9 = vpack.c.bf16 %v2628_v43, %v2626_v12  ;;  %vm3695_vm4 = vcmp.lt.f32.partialorder %v3694_v60, 8388608.0  ;;  %v6028_v59 = vand.u32 2147483647, %v5648_v49 }
 0x4a1   : > { %v3685_v48 = vsel %vm3679_vm3, %v3684_v63, %v5582_v46  ;;  %v6029_v42 = vand.u32 2147483648, %v5616_v57  ;;  %v2644_v29 = vmin.f32 %v2612_v7, 127.0  ;;  %vm3807_vm5 = vcmp.lt.f32.partialorder %v3806_v15, 8388608.0 }
 0x4a2   : > { %v2599_v8 = vmax.f32 %v3685_v48, -128.0  ;;  %v3701_v10 = vsel %vm3695_vm4, %v3700_v5, %v5574_v11  ;;  %v3822_v1 = vand.u32 2147483647, %v5608_v21  ;;  %2855 = vmatmul.mubr.bf16.gmra.mxu0 %v2656_v9  ;;  %v6030_v27 = vand.u32 2147483647, %v5628_v54 }
 0x4a3   : > { %v3812_v16 = vor.u32 %v6029_v42, %v6028_v59  ;;  %v2601_v36 = vmax.f32 %v3701_v10, -128.0  ;;  %v6031_v44 = vand.u32 2147483648, %v5608_v21  ;;  %v2664_v49 = vpack.c.bf16 %v2644_v29, %v2642_v6 }
 0x4a4   : > { %v2631_v58 = vmin.f32 %v2599_v8, 127.0  ;;  %vm3823_vm6 = vcmp.lt.f32.partialorder %v3822_v1, 8388608.0  ;;  %v3670_v4 = vand.u32 2147483647, %v5576_v25  ;;  %v6032_v12 = vand.u32 2147483647, %v5604_v24 }
 0x4a5   : > { %v3813_v46 = vsel %vm3807_vm5, %v3812_v16, %v5616_v57  ;;  %v3828_v56 = vor.u32 %v6031_v44, %v6030_v27  ;;  %v2633_v26 = vmin.f32 %v2601_v36, 127.0  ;;  %v6033_v0 = vand.u32 2147483648, %v5576_v25  ;;  %2887 = vmatmul.mubr.bf16.gmra.mxu1 %v2664_v49 }
 0x4a6   : > { %v2615_v55 = vmax.f32 %v3813_v46, -128.0  ;;  %v3686_v57 = vand.u32 2147483647, %v5572_v52  ;;  %vm3671_vm7 = vcmp.lt.f32.partialorder %v3670_v4, 8388608.0  ;;  %v6034_v34 = vand.u32 2147483647, %v5598_v14 }
 0x4a7   : > { %v3829_v11 = vsel %vm3823_vm6, %v3828_v56, %v5608_v21  ;;  %v3676_v37 = vor.u32 %v6033_v0, %v6032_v12  ;;  %v6035_v63 = vand.u32 2147483648, %v5572_v52  ;;  %v2659_v38 = vpack.c.bf16 %v2633_v26, %v2631_v58 }
 0x4a8   : > { %v2617_v54 = vmax.f32 %v3829_v11, -128.0  ;;  %v2647_v41 = vmin.f32 %v2615_v55, 127.0  ;;  %vm3687_vm8 = vcmp.lt.f32.partialorder %v3686_v57, 8388608.0  ;;  %v3798_v24 = vand.u32 2147483647, %v5610_v51 }
 0x4a9   : > { %v3692_v43 = vor.u32 %v6035_v63, %v6034_v34  ;;  %v3677_v60 = vsel %vm3671_vm7, %v3676_v37, %v5576_v25  ;;  %v6036_v5 = vand.u32 2147483647, %v5632_v13  ;;  %v6037_v7 = vand.u32 2147483648, %v5610_v51  ;;  %2862 = vmatprep.mubr.bf16.mxu0 %v2659_v38 }
 0x4aa   : > { %v2649_v21 = vmin.f32 %v2617_v54, 127.0  ;;  %v2598_v31 = vmax.f32 %v3677_v60, -128.0  ;;  %vm3799_vm9 = vcmp.lt.f32.partialorder %v3798_v24, 8388608.0  ;;  %v3814_v48 = vand.u32 2147483647, %v5606_v40 }
 0x4ab   : > { %v3693_v22 = vsel %vm3687_vm8, %v3692_v43, %v5572_v52  ;;  %v3804_v6 = vor.u32 %v6037_v7, %v6036_v5  ;;  %v6038_v15 = vand.u32 2147483647, %v5626_v3  ;;  %v6039_v25 = vand.u32 2147483648, %v5606_v40 }
 0x4ac   : > { %v2600_v14 = vmax.f32 %v3693_v22, -128.0  ;;  %v2667_v8 = vpack.c.bf16 %v2649_v21, %v2647_v41  ;;  %v2630_v59 = vmin.f32 %v2598_v31, 127.0  ;;  %v3710_v42 = vand.u32 2147483647, %v5716_v17 }
 0x4ad   : > { %v3820_v9 = vor.u32 %v6039_v25, %v6038_v15  ;;  %v3805_v52 = vsel %vm3799_vm9, %v3804_v6, %v5610_v51  ;;  %vm3815_vm10 = vcmp.lt.f32.partialorder %v3814_v48, 8388608.0  ;;  %v3716_v29 = vor.u32 %v3715_v30, %v3714_v47  ;;  %v2670_v25 = vld [vmem:[#allocation10] sm:$0xff] }
 0x4ae   : > { %v2632_v13 = vmin.f32 %v2600_v14, 127.0  ;;  %v2614_v16 = vmax.f32 %v3805_v52, -128.0  ;;  %2894 = vmatprep.mubr.bf16.mxu1 %v2667_v8  ;;  %vm3711_vm11 = vcmp.lt.f32.partialorder %v3710_v42, 8388608.0  ;;  %v3726_v10 = vand.u32 2147483647, %v5709_v33  ;;  %v2678_v52 = vld [vmem:[#allocation10 + $0x70] sm:$0xff] }
 0x4af   : > { %v3821_v3 = vsel %vm3815_vm10, %v3820_v9, %v5606_v40  ;;  %v6040_v1 = vand.u32 2147483647, %v5727_v28  ;;  %v6041_v51 = vand.u32 2147483648, %v5709_v33  ;;  %v3717_v44 = vsel %vm3711_vm11, %v3716_v29, %v5716_v17 }
 0x4b0   : > { %v2658_v58 = vpack.c.bf16 %v2632_v13, %v2630_v59  ;;  %v2616_v46 = vmax.f32 %v3821_v3, -128.0  ;;  %v2646_v27 = vmin.f32 %v2614_v16, 127.0  ;;  %vm3727_vm12 = vcmp.lt.f32.partialorder %v3726_v10, 8388608.0 }
 0x4b1   : > { %v3732_v36 = vor.u32 %v6041_v51, %v6040_v1  ;;  %v2603_v19 = vmax.f32 %v3717_v44, -128.0  ;;  %v6042_v30 = vand.u32 2147483647, %v5756_v39  ;;  %v6043_v40 = vand.u32 2147483647, %v5752_v53  ;;  %v2679_v1 = vld [vmem:[#allocation10 + $0x60] sm:$0xff] }
 0x4b2   : > { %2863 = vmatmul.mubr.bf16.gmra.mxu0 %v2658_v58  ;;  %v2648_v47 = vmin.f32 %v2616_v46, 127.0  ;;  %v3702_v12 = vand.u32 2147483647, %v5714_v32  ;;  %v6044_v0 = vand.u32 2147483647, %v5730_v50  ;;  %v6045_v37 = vand.u32 2147483648, %v5714_v32 }
 0x4b3   : > { %vm3839_vm13 = vcmp.lt.f32.partialorder %v6042_v30, 8388608.0  ;;  %vm3855_vm14 = vcmp.lt.f32.partialorder %v6043_v40, 8388608.0  ;;  %v3733_v28 = vsel %vm3727_vm12, %v3732_v36, %v5709_v33  ;;  %v2635_v17 = vmin.f32 %v2603_v19, 127.0 }
 0x4b4   : > { %v3845_v56 = vsel %vm3839_vm13, %v5794_v23, %v5756_v39  ;;  %v3861_v49 = vsel %vm3855_vm14, %v5779_v45, %v5752_v53  ;;  %v2605_v55 = vmax.f32 %v3733_v28, -128.0  ;;  %v2666_v11 = vpack.c.bf16 %v2648_v47, %v2646_v27  ;;  %v2672_v27 = vld [vmem:[#allocation10 + $0x68] sm:$0xff]  ;;  %v2680_v28 = vld [vmem:[#allocation10 + $0x18] sm:$0xff] }
 0x4b5   : > { %v2619_v4 = vmax.f32 %v3845_v56, -128.0  ;;  %v2621_v26 = vmax.f32 %v3861_v49, -128.0  ;;  %v3708_v57 = vor.u32 %v6045_v37, %v6044_v0  ;;  %v3718_v33 = vand.u32 2147483647, %v5707_v2  ;;  %v2681_v0 = vld [vmem:[#allocation10 + $0x20] sm:$0xff] }
 0x4b6   : > { %v2637_v54 = vmin.f32 %v2605_v55, 127.0  ;;  %v6046_v23 = vand.u32 2147483647, %v5725_v35  ;;  %v6047_v53 = vand.u32 2147483648, %v5707_v2  ;;  %2895 = vmatmul.mubr.bf16.gmra.mxu1 %v2666_v11  ;;  %vm3703_vm15 = vcmp.lt.f32.partialorder %v3702_v12, 8388608.0  ;;  %v2673_v55 = vld [vmem:[#allocation10 + $0x78] sm:$0xff] }
 0x4b7   : > { %v2651_v41 = vmin.f32 %v2619_v4, 127.0  ;;  %v2653_v39 = vmin.f32 %v2621_v26, 127.0  ;;  %vm3719_vm0 = vcmp.lt.f32.partialorder %v3718_v33, 8388608.0  ;;  %v6048_v34 = vand.u32 2147483647, %v5754_v18 }
 0x4b8   : > { %v3724_v45 = vor.u32 %v6047_v53, %v6046_v23  ;;  %v6049_v50 = vand.u32 2147483647, %v5750_v20  ;;  %v2661_v63 = vpack.c.bf16 %v2637_v54, %v2635_v17  ;;  %v3709_v38 = vsel %vm3703_vm15, %v3708_v57, %v5714_v32 }
 0x4b9   : > { %vm3831_vm1 = vcmp.lt.f32.partialorder %v6048_v34, 8388608.0  ;;  %v2669_v43 = vpack.c.bf16 %v2653_v39, %v2651_v41  ;;  %v2602_v24 = vmax.f32 %v3709_v38, -128.0  ;;  %v2674_v41 = vld [vmem:[#allocation10 + $0x8] sm:$0xff] }
 0x4ba   : > { %vm3847_vm2 = vcmp.lt.f32.partialorder %v6049_v50, 8388608.0  ;;  %v3725_v60 = vsel %vm3719_vm0, %v3724_v45, %v5707_v2  ;;  %v3837_v21 = vsel %vm3831_vm1, %v5786_v62, %v5754_v18  ;;  %2870 = vmatprep.mubr.bf16.mxu0 %v2661_v63  ;;  %v2682_v50 = vld [vmem:[#allocation10 + $0x10] sm:$0xff] }
 0x4bb   : > { %v2604_v35 = vmax.f32 %v3725_v60, -128.0  ;;  %v3853_v22 = vsel %vm3847_vm2, %v5776_v61, %v5750_v20  ;;  %2902 = vmatprep.mubr.bf16.mxu1 %v2669_v43  ;;  %v2618_v31 = vmax.f32 %v3837_v21, -128.0  ;;  %v2634_v7 = vmin.f32 %v2602_v24, 127.0  ;;  %v2671_v20 = vld [vmem:[#allocation10 + $0x48] sm:$0xff]  ;;  %v2675_v43 = vld [vmem:[#allocation10 + $0x50] sm:$0xff] }
 0x4bc   : > { %v2620_v5 = vmax.f32 %v3853_v22, -128.0 }
 0x4bd   : > { %v2636_v6 = vmin.f32 %v2604_v35, 127.0  ;;  %v2650_v14 = vmin.f32 %v2618_v31, 127.0  ;;  %v2683_v31 = vld [vmem:[#allocation10 + $0x30] sm:$0xff] }
 0x4be   : > { %v2652_v48 = vmin.f32 %v2620_v5, 127.0 }
 0x4bf   : > { %v2660_v15 = vpack.c.bf16 %v2636_v6, %v2634_v7 }
 0x4c0   : > { %v2668_v32 = vpack.c.bf16 %v2652_v48, %v2650_v14 }
 0x4c1   : > { %2871 = vmatmul.mubr.bf16.gmra.mxu0 %v2660_v15  ;;  %v2676_v15 = vld [vmem:[#allocation10 + $0x40] sm:$0xff] }
 0x4c2   : > { %2903 = vmatmul.mubr.bf16.gmra.mxu1 %v2668_v32 }
 0x547   : > { %v3414_v2 = vpop.f32.mrf.mxu0 }
 0x549   : > { %v3415_v9 = vpop.f32.mrf.mxu0 }
 0x54a   : > { %v3416_v8 = vadd.f32 %v3415_v9, %v3414_v2  ;;  %v3438_v62 = vpop.f32.mrf.mxu1 }
 0x54b   : > { %v3417_v18 = vpop.f32.mrf.mxu0 }
 0x54c   : > { %v2911_v59 = vadd.f32 %v3416_v8, %v2670_v25  ;;  %v3439_v42 = vpop.f32.mrf.mxu1  ;;  %v2684_v25 = vld [vmem:[#allocation10 + $0x28] sm:$0xff] }
 0x54d   : > { %v3418_v61 = vpop.f32.mrf.mxu0  ;;  %v3440_v16 = vadd.f32 %v3439_v42, %v3438_v62 }
 0x54e   : > { %2927 = vst [vmem:[#allocation10] sm:$0xff] %v2911_v59  ;;  %v3419_v13 = vadd.f32 %v3418_v61, %v3417_v18  ;;  %v3441_v29 = vpop.f32.mrf.mxu1  ;;  %v2677_v61 = vld [vmem:[#allocation10 + $0x38] sm:$0xff] }
 0x54f   : > { %v2919_v10 = vadd.f32 %v3440_v16, %v2678_v52 }
 0x550   : > { %v2912_v3 = vadd.f32 %v3419_v13, %v2671_v20  ;;  %v3442_v51 = vpop.f32.mrf.mxu1  ;;  %v2685_v13 = vld [vmem:[#allocation10 + $0x58] sm:$0xff] }
 0x551   : > { %2935 = vst [vmem:[#allocation10 + $0x70] sm:$0xff] %v2919_v10  ;;  %v3443_v36 = vadd.f32 %v3442_v51, %v3441_v29 }
 0x552   : > { %2928 = vst [vmem:[#allocation10 + $0x48] sm:$0xff] %v2912_v3 }
 0x553   : > { %v2920_v58 = vadd.f32 %v3443_v36, %v2679_v1 }
 0x555   : > { %2936 = vst [vmem:[#allocation10 + $0x60] sm:$0xff] %v2920_v58 }
 0x562   : > { %v3420_v46 = vpop.f32.mrf.mxu0 }
 0x564   : > { %v3421_v44 = vpop.f32.mrf.mxu0 }
 0x565   : > { %v3444_v19 = vpop.f32.mrf.mxu1  ;;  %v3422_v30 = vadd.f32 %v3421_v44, %v3420_v46 }
 0x566   : > { %v3423_v40 = vpop.f32.mrf.mxu0 }
 0x567   : > { %v2913_v47 = vadd.f32 %v3422_v30, %v2672_v27  ;;  %v3445_v56 = vpop.f32.mrf.mxu1 }
 0x568   : > { %v3446_v49 = vadd.f32 %v3445_v56, %v3444_v19  ;;  %v3424_v17 = vpop.f32.mrf.mxu0 }
 0x569   : > { %2929 = vst [vmem:[#allocation10 + $0x68] sm:$0xff] %v2913_v47  ;;  %v3447_v4 = vpop.f32.mrf.mxu1  ;;  %v3425_v26 = vadd.f32 %v3424_v17, %v3423_v40 }
 0x56a   : > { %v2921_v11 = vadd.f32 %v3446_v49, %v2680_v28 }
 0x56b   : > { %v2914_v12 = vadd.f32 %v3425_v26, %v2673_v55  ;;  %v3448_v37 = vpop.f32.mrf.mxu1 }
 0x56c   : > { %2937 = vst [vmem:[#allocation10 + $0x18] sm:$0xff] %v2921_v11  ;;  %v3449_v57 = vadd.f32 %v3448_v37, %v3447_v4 }
 0x56d   : > { %2930 = vst [vmem:[#allocation10 + $0x78] sm:$0xff] %v2914_v12 }
 0x56e   : > { %v2922_v33 = vadd.f32 %v3449_v57, %v2681_v0 }
 0x570   : > { %2938 = vst [vmem:[#allocation10 + $0x20] sm:$0xff] %v2922_v33 }
 0x572   : > { %v3426_v54 = vpop.f32.mrf.mxu0 }
 0x574   : > { %v3427_v39 = vpop.f32.mrf.mxu0 }
 0x575   : > { %v3428_v23 = vadd.f32 %v3427_v39, %v3426_v54 }
 0x576   : > { %v3450_v53 = vpop.f32.mrf.mxu1  ;;  %v3429_v45 = vpop.f32.mrf.mxu0 }
 0x577   : > { %v2915_v34 = vadd.f32 %v3428_v23, %v2674_v41 }
 0x578   : > { %v3451_v63 = vpop.f32.mrf.mxu1  ;;  %v3430_v38 = vpop.f32.mrf.mxu0 }
 0x579   : > { %2931 = vst [vmem:[#allocation10 + $0x8] sm:$0xff] %v2915_v34  ;;  %v3452_v60 = vadd.f32 %v3451_v63, %v3450_v53  ;;  %v3431_v24 = vadd.f32 %v3430_v38, %v3429_v45 }
 0x57a   : > { %v3453_v35 = vpop.f32.mrf.mxu1 }
 0x57b   : > { %v2923_v21 = vadd.f32 %v3452_v60, %v2682_v50  ;;  %v2916_v22 = vadd.f32 %v3431_v24, %v2675_v43 }
 0x57c   : > { %v3454_v5 = vpop.f32.mrf.mxu1 }
 0x57d   : > { %2939 = vst [vmem:[#allocation10 + $0x10] sm:$0xff] %v2923_v21  ;;  %2932 = vst [vmem:[#allocation10 + $0x50] sm:$0xff] %v2916_v22  ;;  %v3455_v7 = vadd.f32 %v3454_v5, %v3453_v35 }
 0x57f   : > { %v2924_v14 = vadd.f32 %v3455_v7, %v2683_v31 }
 0x581   : > { %v3432_v6 = vpop.f32.mrf.mxu0  ;;  %2940 = vst [vmem:[#allocation10 + $0x30] sm:$0xff] %v2924_v14 }
 0x582   : > { %v3456_v48 = vpop.f32.mrf.mxu1 }
 0x583   : > { %v3433_v32 = vpop.f32.mrf.mxu0 }
 0x584   : > { %v3434_v2 = vadd.f32 %v3433_v32, %v3432_v6  ;;  %v3457_v9 = vpop.f32.mrf.mxu1 }
 0x585   : > { %v3458_v8 = vadd.f32 %v3457_v9, %v3456_v48  ;;  %v3435_v18 = vpop.f32.mrf.mxu0 }
 0x586   : > { %v2917_v62 = vadd.f32 %v3434_v2, %v2676_v15  ;;  %v3459_v59 = vpop.f32.mrf.mxu1 }
 0x587   : > { %v2925_v20 = vadd.f32 %v3458_v8, %v2684_v25  ;;  %v3436_v52 = vpop.f32.mrf.mxu0 }
 0x588   : > { %2933 = vst [vmem:[#allocation10 + $0x40] sm:$0xff] %v2917_v62  ;;  %v3437_v42 = vadd.f32 %v3436_v52, %v3435_v18  ;;  %v3460_v16 = vpop.f32.mrf.mxu1 }
 0x589   : > { %2941 = vst [vmem:[#allocation10 + $0x28] sm:$0xff] %v2925_v20  ;;  %v3461_v29 = vadd.f32 %v3460_v16, %v3459_v59 }
 0x58a   : > { %v2918_v3 = vadd.f32 %v3437_v42, %v2677_v61 }
 0x58b   : > { %v2926_v10 = vadd.f32 %v3461_v29, %v2685_v13 }
 0x58c   : > { %2934 = vst [vmem:[#allocation10 + $0x38] sm:$0xff] %v2918_v3 }
 0x58d   : > { %2942 = vst [vmem:[#allocation10 + $0x58] sm:$0xff] %v2926_v10 }
 0x58e PF: > { %2944 = sbr.rel (!%p2144_p3) target bundleno = 1579 (0x62b), region = 64  ;;  %v2963_v1 = vld [vmem:[#allocation8 + $0x10] sm:$0xff] (%p2144_p3)  ;;  %v2961_v51 = vld [vmem:[#allocation8] sm:$0xff] (%p2144_p3)  ;;  %v4284_v36 = vmov (%p2144_p3), 0   ;;  %v2964_v58 = vld [vmem:[#allocation8 + $0x18] sm:$0xff] (%p2144_p3) }
 0x58f   : > { %4235 = vset.pattern.permute.xlu1 (%p2144_p3), %v4284_v36  ;;  %4234 = vset.pattern.permute.xlu0 (%p2144_p3), %v4284_v36  ;;  %v2962_v46 = vld [vmem:[#allocation8 + $0x8] sm:$0xff] (%p2144_p3)  ;;  %v2965_v44 = vld [vmem:[#allocation8 + $0x20] sm:$0xff] (%p2144_p3)  ;;  %v2968_v19 = vld [vmem:[#allocation8 + $0x38] sm:$0xff] (%p2144_p3) }
 0x590   : > { %2989 = vperm.xlu1 (%p2144_p3), %4235, %v2963_v1   ;;  %2979 = vperm.xlu0 (%p2144_p3), %4234, %v2961_v51   ;;  %v2966_v27 = vld [vmem:[#allocation8 + $0x28] sm:$0xff] (%p2144_p3)  ;;  %v2967_v30 = vld [vmem:[#allocation8 + $0x30] sm:$0xff] (%p2144_p3)  ;;  %v2969_v47 = vld [vmem:[#allocation8 + $0x40] sm:$0xff] (%p2144_p3) }
 0x591   : > { %v2970_v40 = vld [vmem:[#allocation8 + $0x48] sm:$0xff] (%p2144_p3)  ;;  %v2972_v28 = vld [vmem:[#allocation8 + $0x58] sm:$0xff] (%p2144_p3)  ;;  %v2971_v56 = vld [vmem:[#allocation8 + $0x50] sm:$0xff] (%p2144_p3) }
 0x592   : > { %v2974_v49 = vld [vmem:[#allocation8 + $0x68] sm:$0xff] (%p2144_p3)  ;;  %v2973_v55 = vld [vmem:[#allocation8 + $0x60] sm:$0xff] (%p2144_p3)  ;;  %v2976_v17 = vld [vmem:[#allocation8 + $0x78] sm:$0xff] (%p2144_p3) }
 0x593   : > { %v2975_v4 = vld [vmem:[#allocation8 + $0x70] sm:$0xff]  ;;  %v2947_v26 = vld [vmem:[#allocation10 + $0x68] sm:$0xff]  ;;  %v2945_v11 = vld [vmem:[#allocation10] sm:$0xff] }
 0x594   : > { %2994 = vperm.xlu1 %4235, %v2964_v58   ;;  %2984 = vperm.xlu0 %4234, %v2962_v46   ;;  %v2948_v33 = vld [vmem:[#allocation10 + $0x78] sm:$0xff]  ;;  %v2946_v54 = vld [vmem:[#allocation10 + $0x48] sm:$0xff]  ;;  %v2950_v45 = vld [vmem:[#allocation10 + $0x50] sm:$0xff] }
 0x595   : > { %v2949_v34 = vld [vmem:[#allocation10 + $0x8] sm:$0xff]  ;;  %v2952_v60 = vld [vmem:[#allocation10 + $0x38] sm:$0xff]  ;;  %v2951_v24 = vld [vmem:[#allocation10 + $0x40] sm:$0xff] }
 0x596   : > { %v2954_v5 = vld [vmem:[#allocation10 + $0x60] sm:$0xff]  ;;  %v2953_v7 = vld [vmem:[#allocation10 + $0x70] sm:$0xff]  ;;  %v2955_v2 = vld [vmem:[#allocation10 + $0x18] sm:$0xff] }
 0x597   : > { %v2956_v32 = vld [vmem:[#allocation10 + $0x20] sm:$0xff]  ;;  %v2958_v62 = vld [vmem:[#allocation10 + $0x30] sm:$0xff]  ;;  %v2960_v13 = vld [vmem:[#allocation10 + $0x58] sm:$0xff] }
 0x598   : > { %3004 = vperm.xlu1 %4235, %v2966_v27   ;;  %2999 = vperm.xlu0 %4234, %v2965_v44   ;;  %v2957_v59 = vld [vmem:[#allocation10 + $0x10] sm:$0xff]  ;;  %v2959_v16 = vld [vmem:[#allocation10 + $0x28] sm:$0xff] }
 0x59c   : > { %3014 = vperm.xlu1 %4235, %v2968_v19   ;;  %3009 = vperm.xlu0 %4234, %v2967_v30  }
 0x5a0   : > { %3024 = vperm.xlu1 %4235, %v2970_v40   ;;  %3019 = vperm.xlu0 %4234, %v2969_v47  }
 0x5a4   : > { %3034 = vperm.xlu1 %4235, %v2972_v28   ;;  %3029 = vperm.xlu0 %4234, %v2971_v56  }
 0x5a8   : > { %3044 = vperm.xlu1 %4235, %v2974_v49   ;;  %3039 = vperm.xlu0 %4234, %v2973_v55  }
 0x5ac   : > { %3054 = vperm.xlu1 %4235, %v2976_v17   ;;  %3049 = vperm.xlu0 %4234, %v2975_v4  }
 0x60b   : > { %v2990_v12 = vpop.permute.xlu1 %2989  ;;  %v2980_v0 = vpop.permute.xlu0 %2979 }
 0x60c   : > { %v3059_v37 = vmul.f32 %v2990_v12, %v2947_v26  ;;  %v3057_v57 = vmul.f32 %v2980_v0, %v2945_v11 }
 0x60e   : > { %3075 = vst [vmem:[%s5967_s5 + $0x10] sm:$0xff] %v3059_v37  ;;  %3073 = vst [vmem:[%s5967_s5] sm:$0xff] %v3057_v57 }
 0x60f   : > { %v2995_v41 = vpop.permute.xlu1 %2994  ;;  %v2985_v39 = vpop.permute.xlu0 %2984 }
 0x610   : > { %v3060_v23 = vmul.f32 %v2995_v41, %v2948_v33  ;;  %v3058_v53 = vmul.f32 %v2985_v39, %v2946_v54 }
 0x612   : > { %3076 = vst [vmem:[%s5967_s5 + $0x18] sm:$0xff] %v3060_v23  ;;  %3074 = vst [vmem:[%s5967_s5 + $0x8] sm:$0xff] %v3058_v53 }
 0x613   : > { %v3005_v50 = vpop.permute.xlu1 %3004  ;;  %v3000_v63 = vpop.permute.xlu0 %2999 }
 0x614   : > { %v3062_v43 = vmul.f32 %v3005_v50, %v2950_v45  ;;  %v3061_v38 = vmul.f32 %v3000_v63, %v2949_v34 }
 0x616   : > { %3078 = vst [vmem:[%s5967_s5 + $0x28] sm:$0xff] %v3062_v43  ;;  %3077 = vst [vmem:[%s5967_s5 + $0x20] sm:$0xff] %v3061_v38 }
 0x617   : > { %v3015_v35 = vpop.permute.xlu1 %3014  ;;  %v3010_v21 = vpop.permute.xlu0 %3009 }
 0x618   : > { %v3064_v22 = vmul.f32 %v3015_v35, %v2952_v60  ;;  %v3063_v31 = vmul.f32 %v3010_v21, %v2951_v24 }
 0x61a   : > { %3080 = vst [vmem:[%s5967_s5 + $0x38] sm:$0xff] %v3064_v22  ;;  %3079 = vst [vmem:[%s5967_s5 + $0x30] sm:$0xff] %v3063_v31 }
 0x61b   : > { %v3025_v6 = vpop.permute.xlu1 %3024  ;;  %v3020_v14 = vpop.permute.xlu0 %3019 }
 0x61c   : > { %v3066_v48 = vmul.f32 %v3025_v6, %v2954_v5  ;;  %v3065_v15 = vmul.f32 %v3020_v14, %v2953_v7 }
 0x61e   : > { %3082 = vst [vmem:[%s5967_s5 + $0x48] sm:$0xff] %v3066_v48  ;;  %3081 = vst [vmem:[%s5967_s5 + $0x40] sm:$0xff] %v3065_v15 }
 0x61f   : > { %v3035_v25 = vpop.permute.xlu1 %3034  ;;  %v3030_v9 = vpop.permute.xlu0 %3029 }
 0x620   : > { %v3068_v8 = vmul.f32 %v3035_v25, %v2956_v32  ;;  %v3067_v18 = vmul.f32 %v3030_v9, %v2955_v2 }
 0x622   : > { %3084 = vst [vmem:[%s5967_s5 + $0x58] sm:$0xff] %v3068_v8  ;;  %3083 = vst [vmem:[%s5967_s5 + $0x50] sm:$0xff] %v3067_v18 }
 0x623   : > { %v3045_v20 = vpop.permute.xlu1 %3044  ;;  %v3040_v61 = vpop.permute.xlu0 %3039 }
 0x624   : > { %v3070_v52 = vmul.f32 %v3045_v20, %v2958_v62  ;;  %v3069_v42 = vmul.f32 %v3040_v61, %v2957_v59 }
 0x626   : > { %3086 = vst [vmem:[%s5967_s5 + $0x68] sm:$0xff] %v3070_v52  ;;  %3085 = vst [vmem:[%s5967_s5 + $0x60] sm:$0xff] %v3069_v42 }
 0x627   : > { %v3055_v29 = vpop.permute.xlu1 %3054  ;;  %v3050_v3 = vpop.permute.xlu0 %3049 }
 0x628   : > { %v3072_v10 = vmul.f32 %v3055_v29, %v2960_v13  ;;  %v3071_v1 = vmul.f32 %v3050_v3, %v2959_v16 }
 0x62a   : > { %3088 = vst [vmem:[%s5967_s5 + $0x78] sm:$0xff] %v3072_v10  ;;  %3087 = vst [vmem:[%s5967_s5 + $0x70] sm:$0xff] %v3071_v1 }
 0x62b PF: > { %s16_s20 = sadd.s32 1, %s4277_s20   ;;  %s6050_s18 = smov %s4273_s19 }
 0x62c   : > { %p13_p5 = scmp.ge.s32.totalorder %s16_s20, 4   ;;  %s6051_s19 = smov %s6053_s22 }
 0x62e   :  { %15 = sbr.rel (!%p13_p5) target bundleno = 2 (0x2), region = 106 }
 0x633   :  { %3111 = vsyncpa [#allocation12], 1 }
 0x634   :  { %3113 = vsyncpa [#allocation12 + $0x1], 1 }

</bundles_post_ra>
